<compile_context>
chip_gen: v7x
topology: tpu7x:2x2x1
jax: 0.10.0
libtpu: 0.0.40
codegen_flags: <defaults>
</compile_context>

<pallas_src>
import functools

import jax
import jax.numpy as jnp
from jax.experimental import pallas as pl
from jax.experimental.pallas import tpu as pltpu


def vae_kernel(x_ref, u_ref, eps_ref,
               W0, b0, W1, b1, Wh, bh,
               dW0, db0, dW1, db1, Wmu, bmu,
               small_ref, recon_ref,
               *, temperature, n_components, latent_dim, small_pad):
    f32 = jnp.float32
    bf16 = jnp.bfloat16
    K, D = n_components, latent_dim
    KD = K * D
    x = x_ref[...]                                           # (Bb, IN) f32
    Bb, IN = x.shape

    def linear(h, W_r, b_r):
        # bf16 operands on the MXU, f32 accumulation, f32 bias add
        return jnp.dot(h.astype(bf16), W_r[...],
                       preferred_element_type=f32) + b_r[...]

    # ---------------- fused encoder trunk (GateNN + GaussianNN2) ----------------
    h1 = jnp.maximum(linear(x, W0, b0), 0.0)                 # (Bb, 2H): [gate | gauss]
    h2 = jnp.maximum(linear(h1, W1, b1), 0.0)                # (Bb, 2H) block-diag keeps trunks apart
    head = linear(h2, Wh, bh)                                # (Bb, 2*K*D + K): [means|logvar|gate]
    means = head[:, :KD]
    logvar = head[:, KD:2 * KD]
    gate_logits = head[:, 2 * KD:]

    # ---------------- gates: softmax -> gumbel-softmax -> stable log-softmax ----------------
    g_max = jnp.max(gate_logits, axis=-1, keepdims=True)
    ge = jnp.exp(gate_logits - g_max)
    gates = ge / jnp.sum(ge, axis=-1, keepdims=True)         # GateNN output probabilities
    gumbel = -jnp.log(-jnp.log(u_ref[...] + 1e-20) + 1e-20)
    s = (gates + gumbel) / temperature                       # torch adds noise to the probabilities
    s_max = jnp.max(s, axis=-1, keepdims=True)
    se = jnp.exp(s - s_max)
    log_gates = (s - s_max) - jnp.log(jnp.sum(se, axis=-1, keepdims=True))   # log(softmax(s))

    # ---------------- reparameterized sample + KLD (off the MXU, f32) ----------------
    std = jnp.exp(logvar)                                    # torch: Normal(means, exp(logvar))
    z = means + std * eps_ref[...]                           # (Bb, K*D)
    kld_term = 1.0 + logvar - means * means - std
    kld = -0.5 * jnp.concatenate(
        [jnp.sum(kld_term[:, k * D:(k + 1) * D], axis=-1, keepdims=True)
         for k in range(K)], axis=-1)                        # (Bb, K)

    # ---------------- all K decoders in ONE block-diagonal pass ----------------
    hd = jnp.maximum(linear(z, dW0, db0), 0.0)               # (Bb, K*H)
    hd = jnp.maximum(linear(hd, dW1, db1), 0.0)              # (Bb, K*H)
    a = linear(hd, Wmu, bmu)                                 # (Bb, K*IN) pre-sigmoid logits

    # shared-transcendental softplus pair; sigmoid(a) = exp(-softplus(-a))
    t = jnp.log(1.0 + jnp.exp(-jnp.abs(a)))
    sp_pos = jnp.maximum(a, 0.0) + t                         # softplus(a)  = -log(1-p)
    sp_neg = jnp.maximum(-a, 0.0) + t                        # softplus(-a) = -log(p)
    recon = jnp.exp(-sp_neg)                                 # sigmoid(a)
    recon_ref[...] = recon                                   # lane-dense (Bb, K*IN) store
    # TODO(synk): emit recon as bf16 if downstream tolerates it (halves the dominant HBM write).

    # BCE with torch's -100 log clamp, one multiply on the big slab
    sp_pos_c = jnp.minimum(sp_pos, 100.0)
    sp_neg_c = jnp.minimum(sp_neg, 100.0)
    x_tiled = jnp.concatenate([x] * K, axis=-1)              # (Bb, K*IN)
    bce = sp_pos_c + x_tiled * (sp_neg_c - sp_pos_c)
    # per-component sums kept off the MXU (4 useful lanes only)
    lik = jnp.concatenate(
        [jnp.sum(bce[:, k * IN:(k + 1) * IN], axis=-1, keepdims=True)
         for k in range(K)], axis=-1)                        # (Bb, K)

    # pack small outputs lane-dense & 128-aligned: [z | log_gates | kld | lik | 0-pad]
    pad = small_pad - (KD + 3 * K)
    pieces = [z, log_gates, kld, lik]
    if pad > 0:
        pieces.append(jnp.zeros((Bb, pad), f32))
    small_ref[...] = jnp.concatenate(pieces, axis=-1)


def init_params(key, input_dim, hidden_dim, latent_dim, n_components):
    """Deterministic synthetic parameters. Weights stored (in, out); biases (1, out)."""
    K, D, H, IN = n_components, latent_dim, hidden_dim, input_dim
    shapes = [
        # GateNN: Linear(784,H), Linear(H,H), fc_gate Linear(H,K)
        (IN, H), (1, H), (H, H), (1, H), (H, K), (1, K),
        # GaussianNN2: Linear(784,H), Linear(H,H), fc_mean Linear(H,K*D), logvar Linear(H,K*D)
        (IN, H), (1, H), (H, H), (1, H), (H, K * D), (1, K * D), (H, K * D), (1, K * D),
        # Decoder: Linear(D,H), Linear(H,H), fc_mu Linear(H,784)
        (D, H), (1, H), (H, H), (1, H), (H, IN), (1, IN),
    ]
    keys = jax.random.split(key, len(shapes))
    params = [0.05 * jax.random.normal(k, s, dtype=jnp.float32) for k, s in zip(keys, shapes)]
    # init_bias_gate = [0.0]*n_components  -> fc_gate bias is zero
    params[5] = jnp.zeros((1, K), dtype=jnp.float32)
    return tuple(params)
    # NOTE: GaussianNN2.fc0 exists in __init__ but is never used in forward -> omitted.


def pack_params(params, *, input_dim, hidden_dim, latent_dim, n_components):
    """Host-side weight packing (done once): fuse same-input matmuls, build block-diagonal
    decoder weights for the single K-component pass. Weights cast to bf16 (MXU fast path);
    biases stay f32 (added after the f32-accumulated dot)."""
    (gW0, gb0, gW1, gb1, gWg, gbg,
     hW0, hb0, hW1, hb1, Wm, bm, Wv, bv,
     dW0, db0, dW1, db1, Wmu, bmu) = params
    K, D, H, IN = n_components, latent_dim, hidden_dim, input_dim
    KD = K * D
    f32, bf16 = jnp.float32, jnp.bfloat16
    eyeK = jnp.eye(K, dtype=f32)

    # encoder layer 0: both networks read x -> concat along output lanes
    W0f = jnp.concatenate([gW0, hW0], axis=1)                 # (IN, 2H)
    b0f = jnp.concatenate([gb0, hb0], axis=1)                 # (1, 2H)
    # encoder layer 1: block-diagonal keeps the two trunks independent in one matmul
    W1f = jnp.zeros((2 * H, 2 * H), f32).at[:H, :H].set(gW1).at[H:, H:].set(hW1)
    b1f = jnp.concatenate([gb1, hb1], axis=1)                 # (1, 2H)
    # fused heads, lane-friendly order: [means | logvar | gate logits]
    Wh = jnp.zeros((2 * H, 2 * KD + K), f32)
    Wh = Wh.at[H:, :KD].set(Wm)
    Wh = Wh.at[H:, KD:2 * KD].set(Wv)
    Wh = Wh.at[:H, 2 * KD:].set(gWg)
    bh = jnp.concatenate([bm, bv, gbg], axis=1)               # (1, 2*K*D + K)

    # decoder: run all K components at once with block-diagonal weights
    dW0b = jnp.kron(eyeK, dW0)                                # (K*D, K*H)
    db0b = jnp.tile(db0, (1, K))                              # (1, K*H)
    dW1b = jnp.kron(eyeK, dW1)                                # (K*H, K*H)
    db1b = jnp.tile(db1, (1, K))                              # (1, K*H)
    Wmub = jnp.kron(eyeK, Wmu)                                # (K*H, K*IN)
    bmub = jnp.tile(bmu, (1, K))                              # (1, K*IN)

    return (W0f.astype(bf16), b0f, W1f.astype(bf16), b1f, Wh.astype(bf16), bh,
            dW0b.astype(bf16), db0b, dW1b.astype(bf16), db1b, Wmub.astype(bf16), bmub)


def vae_forward(x, packed, u_noise, eps_noise, *, n_components, latent_dim,
                temperature=1.0, block_b=128):
    B, IN = x.shape
    K, D = n_components, latent_dim
    KD = K * D
    small_w = KD + 3 * K
    small_pad = ((small_w + 127) // 128) * 128                # lane-aligned small-output slab

    # batch tile: small enough for VMEM, and >=2 grid steps when B allows so the
    # "parallel" axis can shard across v7x's 2 TensorCores.
    bb = min(block_b, B)
    if B >= 16:
        half = -(-B // 2)                                     # cdiv(B, 2)
        half = -(-half // 8) * 8                              # round up to sublane multiple
        bb = min(bb, half)
    grid = (pl.cdiv(B, bb),)

    def row_spec(ncols):
        return pl.BlockSpec((bb, ncols), lambda i: (i, 0))

    def resident(arr):
        return pl.BlockSpec(arr.shape, lambda i: (0, 0))      # weights stay resident across the grid

    in_specs = [row_spec(IN), row_spec(K), row_spec(KD)] + [resident(w) for w in packed]
    out_specs = (row_spec(small_pad), row_spec(K * IN))
    out_shape = (
        jax.ShapeDtypeStruct((B, small_pad), jnp.float32),    # [z | log_gates | kld | lik | pad]
        jax.ShapeDtypeStruct((B, K * IN), jnp.float32),       # recon (lane-dense, B-major K-minor)
    )

    kernel = functools.partial(vae_kernel, temperature=temperature,
                               n_components=K, latent_dim=D, small_pad=small_pad)
    small, recon_flat = pl.pallas_call(
        kernel,
        out_shape=out_shape,
        grid=grid,
        in_specs=in_specs,
        out_specs=out_specs,
        compiler_params=pltpu.CompilerParams(
            dimension_semantics=("parallel",),
            vmem_limit_bytes=48 * 1024 * 1024),               # > v5e's 16 MiB default, < v7x physical
    )(x, u_noise, eps_noise, *packed)

    # plain-JAX glue: split the packed slab and restore PyTorch output shapes (no transposes)
    z = small[:, :KD].reshape(B, K, D)                        # (B, n_components, latent_dim)
    log_gates = small[:, KD:KD + K]
    kld = small[:, KD + K:KD + 2 * K]
    lik = small[:, KD + 2 * K:KD + 3 * K]
    recon_mean = recon_flat.reshape(B, K, IN)                 # (B, n_components, input_dim)
    log_responsibility = None                                 # projection=False path
    return log_gates, z, log_responsibility, kld, lik, recon_mean


if __name__ == "__main__":
    # Small config consistent with the module (input dim is hard-coded to 784 in the encoder).
    input_dim = 784
    hidden_dim = 32
    latent_dim = 8
    n_components = 4
    batch = 2

    key = jax.random.PRNGKey(0)
    k_x, k_u, k_eps, k_p = jax.random.split(key, 4)

    x = jax.random.uniform(k_x, (batch, input_dim), dtype=jnp.float32)     # BCE target in [0,1]
    u_noise = jax.random.uniform(k_u, (batch, n_components), dtype=jnp.float32)
    eps_noise = jax.random.normal(k_eps, (batch, n_components * latent_dim), dtype=jnp.float32)

    raw_params = init_params(k_p, input_dim, hidden_dim, latent_dim, n_components)
    packed = pack_params(raw_params, input_dim=input_dim, hidden_dim=hidden_dim,
                         latent_dim=latent_dim, n_components=n_components)

    outs = vae_forward(x, packed, u_noise, eps_noise,
                       n_components=n_components, latent_dim=latent_dim,
                       temperature=1.0)
    log_gates, z, log_resp, kld, lik, recon_mean = outs
    jax.block_until_ready((log_gates, z, kld, lik, recon_mean))

    assert log_gates.shape == (batch, n_components)
    assert z.shape == (batch, n_components, latent_dim)
    assert log_resp is None
    assert kld.shape == (batch, n_components)
    assert lik.shape == (batch, n_components)
    assert recon_mean.shape == (batch, n_components, input_dim)
    for a in (log_gates, z, kld, lik, recon_mean):
        assert bool(jnp.all(jnp.isfinite(a)))
    assert bool(jnp.all(recon_mean >= 0.0)) and bool(jnp.all(recon_mean <= 1.0))

    # TODO(synk): projection=True branch (split_kl_projection / MultivariateNormal KL) and
    # hard=True straight-through Gumbel (argmax scatter) are not implemented (default path only).
    print("KERNEL_OK")
</pallas_src>

<mosaic_0001>
module attributes {stable_mosaic.version = 11 : i64} {
  func.func @vae_kernel(%arg0: i32, %arg1: memref<2x784xf32, #tpu.memory_space<vmem>>, %arg2: memref<2x4xf32, #tpu.memory_space<vmem>>, %arg3: memref<2x32xf32, #tpu.memory_space<vmem>>, %arg4: memref<784x64xbf16, #tpu.memory_space<vmem>>, %arg5: memref<1x64xf32, #tpu.memory_space<vmem>>, %arg6: memref<64x64xbf16, #tpu.memory_space<vmem>>, %arg7: memref<1x64xf32, #tpu.memory_space<vmem>>, %arg8: memref<64x68xbf16, #tpu.memory_space<vmem>>, %arg9: memref<1x68xf32, #tpu.memory_space<vmem>>, %arg10: memref<32x128xbf16, #tpu.memory_space<vmem>>, %arg11: memref<1x128xf32, #tpu.memory_space<vmem>>, %arg12: memref<128x128xbf16, #tpu.memory_space<vmem>>, %arg13: memref<1x128xf32, #tpu.memory_space<vmem>>, %arg14: memref<128x3136xbf16, #tpu.memory_space<vmem>>, %arg15: memref<1x3136xf32, #tpu.memory_space<vmem>>, %arg16: memref<2x128xf32, #tpu.memory_space<vmem>>, %arg17: memref<2x3136xf32, #tpu.memory_space<vmem>>) attributes {dimension_semantics = [#tpu.dimension_semantics<parallel>], iteration_bounds = array<i64: 1>, scalar_prefetch = 0 : i64, scratch_operands = 0 : i64, tpu.core_type = #tpu.core_type<tc>, window_params = [{transform_indices = @transform_0, window_bounds = array<i64: 2, 784>}, {transform_indices = @transform_1, window_bounds = array<i64: 2, 4>}, {transform_indices = @transform_2, window_bounds = array<i64: 2, 32>}, {pipeline_mode = #tpu.pipeline_mode<synchronous>, transform_indices = @transform_3, window_bounds = array<i64: 784, 64>}, {pipeline_mode = #tpu.pipeline_mode<synchronous>, transform_indices = @transform_4, window_bounds = array<i64: 1, 64>}, {pipeline_mode = #tpu.pipeline_mode<synchronous>, transform_indices = @transform_5, window_bounds = array<i64: 64, 64>}, {pipeline_mode = #tpu.pipeline_mode<synchronous>, transform_indices = @transform_6, window_bounds = array<i64: 1, 64>}, {pipeline_mode = #tpu.pipeline_mode<synchronous>, transform_indices = @transform_7, window_bounds = array<i64: 64, 68>}, {pipeline_mode = #tpu.pipeline_mode<synchronous>, transform_indices = @transform_8, window_bounds = array<i64: 1, 68>}, {pipeline_mode = #tpu.pipeline_mode<synchronous>, transform_indices = @transform_9, window_bounds = array<i64: 32, 128>}, {pipeline_mode = #tpu.pipeline_mode<synchronous>, transform_indices = @transform_10, window_bounds = array<i64: 1, 128>}, {pipeline_mode = #tpu.pipeline_mode<synchronous>, transform_indices = @transform_11, window_bounds = array<i64: 128, 128>}, {pipeline_mode = #tpu.pipeline_mode<synchronous>, transform_indices = @transform_12, window_bounds = array<i64: 1, 128>}, {pipeline_mode = #tpu.pipeline_mode<synchronous>, transform_indices = @transform_13, window_bounds = array<i64: 128, 3136>}, {pipeline_mode = #tpu.pipeline_mode<synchronous>, transform_indices = @transform_14, window_bounds = array<i64: 1, 3136>}, {transform_indices = @transform_15, window_bounds = array<i64: 2, 128>}, {transform_indices = @transform_16, window_bounds = array<i64: 2, 3136>}]} {
    %c0 = arith.constant 0 : index
    %c0_0 = arith.constant 0 : index
    %0 = vector.load %arg1[%c0, %c0_0] : memref<2x784xf32, #tpu.memory_space<vmem>>, vector<2x784xf32>
    %1 = arith.truncf %0 : vector<2x784xf32> to vector<2x784xbf16>
    %c0_1 = arith.constant 0 : index
    %c0_2 = arith.constant 0 : index
    %2 = vector.load %arg4[%c0_1, %c0_2] : memref<784x64xbf16, #tpu.memory_space<vmem>>, vector<784x64xbf16>
    %cst = arith.constant dense<0.000000e+00> : vector<2x64xf32>
    %3 = tpu.matmul %1, %2, %cst {dimension_numbers = #tpu.dot_dimension_numbers<[1], [0], [0], [1], [0, 0, 1, 1], [], []>} : vector<2x784xbf16>, vector<784x64xbf16>, vector<2x64xf32> -> vector<2x64xf32>
    %c0_3 = arith.constant 0 : index
    %c0_4 = arith.constant 0 : index
    %4 = vector.load %arg5[%c0_3, %c0_4] : memref<1x64xf32, #tpu.memory_space<vmem>>, vector<1x64xf32>
    %5 = vector.broadcast %4 : vector<1x64xf32> to vector<2x64xf32>
    %6 = arith.addf %3, %5 : vector<2x64xf32>
    %cst_5 = arith.constant 0.000000e+00 : f32
    %7 = vector.broadcast %cst_5 : f32 to vector<2x64xf32>
    %8 = arith.maximumf %6, %7 : vector<2x64xf32>
    %9 = arith.truncf %8 : vector<2x64xf32> to vector<2x64xbf16>
    %c0_6 = arith.constant 0 : index
    %c0_7 = arith.constant 0 : index
    %10 = vector.load %arg6[%c0_6, %c0_7] : memref<64x64xbf16, #tpu.memory_space<vmem>>, vector<64x64xbf16>
    %cst_8 = arith.constant dense<0.000000e+00> : vector<2x64xf32>
    %11 = tpu.matmul %9, %10, %cst_8 {dimension_numbers = #tpu.dot_dimension_numbers<[1], [0], [0], [1], [0, 0, 1, 1], [], []>} : vector<2x64xbf16>, vector<64x64xbf16>, vector<2x64xf32> -> vector<2x64xf32>
    %c0_9 = arith.constant 0 : index
    %c0_10 = arith.constant 0 : index
    %12 = vector.load %arg7[%c0_9, %c0_10] : memref<1x64xf32, #tpu.memory_space<vmem>>, vector<1x64xf32>
    %13 = vector.broadcast %12 : vector<1x64xf32> to vector<2x64xf32>
    %14 = arith.addf %11, %13 : vector<2x64xf32>
    %cst_11 = arith.constant 0.000000e+00 : f32
    %15 = vector.broadcast %cst_11 : f32 to vector<2x64xf32>
    %16 = arith.maximumf %14, %15 : vector<2x64xf32>
    %17 = arith.truncf %16 : vector<2x64xf32> to vector<2x64xbf16>
    %c0_12 = arith.constant 0 : index
    %c0_13 = arith.constant 0 : index
    %18 = vector.load %arg8[%c0_12, %c0_13] : memref<64x68xbf16, #tpu.memory_space<vmem>>, vector<64x68xbf16>
    %cst_14 = arith.constant dense<0.000000e+00> : vector<2x68xf32>
    %19 = tpu.matmul %17, %18, %cst_14 {dimension_numbers = #tpu.dot_dimension_numbers<[1], [0], [0], [1], [0, 0, 1, 1], [], []>} : vector<2x64xbf16>, vector<64x68xbf16>, vector<2x68xf32> -> vector<2x68xf32>
    %c0_15 = arith.constant 0 : index
    %c0_16 = arith.constant 0 : index
    %20 = vector.load %arg9[%c0_15, %c0_16] : memref<1x68xf32, #tpu.memory_space<vmem>>, vector<1x68xf32>
    %21 = vector.broadcast %20 : vector<1x68xf32> to vector<2x68xf32>
    %22 = arith.addf %19, %21 : vector<2x68xf32>
    %23 = vector.extract_strided_slice %22 {offsets = [0, 0], sizes = [2, 32], strides = [1, 1]} : vector<2x68xf32> to vector<2x32xf32>
    %24 = vector.extract_strided_slice %22 {offsets = [0, 32], sizes = [2, 32], strides = [1, 1]} : vector<2x68xf32> to vector<2x32xf32>
    %25 = vector.extract_strided_slice %22 {offsets = [0, 64], sizes = [2, 4], strides = [1, 1]} : vector<2x68xf32> to vector<2x4xf32>
    %cst_17 = arith.constant dense<0xFF800000> : vector<2xf32>
    %26 = vector.multi_reduction <maximumf>, %25, %cst_17 [1] : vector<2x4xf32> to vector<2xf32>
    %27 = vector.shape_cast %26 : vector<2xf32> to vector<2x1xf32>
    %28 = vector.broadcast %27 : vector<2x1xf32> to vector<2x4xf32>
    %29 = arith.subf %25, %28 : vector<2x4xf32>
    %30 = math.exp %29 : vector<2x4xf32>
    %cst_18 = arith.constant dense<0.000000e+00> : vector<2xf32>
    %31 = vector.multi_reduction <add>, %30, %cst_18 [1] : vector<2x4xf32> to vector<2xf32>
    %32 = vector.shape_cast %31 : vector<2xf32> to vector<2x1xf32>
    %33 = vector.broadcast %32 : vector<2x1xf32> to vector<2x4xf32>
    %34 = arith.divf %30, %33 : vector<2x4xf32>
    %c0_19 = arith.constant 0 : index
    %c0_20 = arith.constant 0 : index
    %35 = vector.load %arg2[%c0_19, %c0_20] : memref<2x4xf32, #tpu.memory_space<vmem>>, vector<2x4xf32>
    %cst_21 = arith.constant 9.99999968E-21 : f32
    %36 = vector.broadcast %cst_21 : f32 to vector<2x4xf32>
    %37 = arith.addf %35, %36 : vector<2x4xf32>
    %38 = math.log %37 : vector<2x4xf32>
    %cst_22 = arith.constant 0.000000e+00 : f32
    %39 = vector.broadcast %cst_22 : f32 to vector<2x4xf32>
    %40 = arith.subf %39, %38 : vector<2x4xf32>
    %cst_23 = arith.constant 9.99999968E-21 : f32
    %41 = vector.broadcast %cst_23 : f32 to vector<2x4xf32>
    %42 = arith.addf %40, %41 : vector<2x4xf32>
    %43 = math.log %42 : vector<2x4xf32>
    %cst_24 = arith.constant 0.000000e+00 : f32
    %44 = vector.broadcast %cst_24 : f32 to vector<2x4xf32>
    %45 = arith.subf %44, %43 : vector<2x4xf32>
    %46 = arith.addf %34, %45 : vector<2x4xf32>
    %cst_25 = arith.constant 1.000000e+00 : f32
    %47 = vector.broadcast %cst_25 : f32 to vector<2x4xf32>
    %48 = arith.divf %46, %47 : vector<2x4xf32>
    %cst_26 = arith.constant dense<0xFF800000> : vector<2xf32>
    %49 = vector.multi_reduction <maximumf>, %48, %cst_26 [1] : vector<2x4xf32> to vector<2xf32>
    %50 = vector.shape_cast %49 : vector<2xf32> to vector<2x1xf32>
    %51 = vector.broadcast %50 : vector<2x1xf32> to vector<2x4xf32>
    %52 = arith.subf %48, %51 : vector<2x4xf32>
    %53 = math.exp %52 : vector<2x4xf32>
    %54 = vector.broadcast %50 : vector<2x1xf32> to vector<2x4xf32>
    %55 = arith.subf %48, %54 : vector<2x4xf32>
    %cst_27 = arith.constant dense<0.000000e+00> : vector<2xf32>
    %56 = vector.multi_reduction <add>, %53, %cst_27 [1] : vector<2x4xf32> to vector<2xf32>
    %57 = vector.shape_cast %56 : vector<2xf32> to vector<2x1xf32>
    %58 = math.log %57 : vector<2x1xf32>
    %59 = vector.broadcast %58 : vector<2x1xf32> to vector<2x4xf32>
    %60 = arith.subf %55, %59 : vector<2x4xf32>
    %61 = math.exp %24 : vector<2x32xf32>
    %c0_28 = arith.constant 0 : index
    %c0_29 = arith.constant 0 : index
    %62 = vector.load %arg3[%c0_28, %c0_29] : memref<2x32xf32, #tpu.memory_space<vmem>>, vector<2x32xf32>
    %63 = arith.mulf %61, %62 : vector<2x32xf32>
    %64 = arith.addf %23, %63 : vector<2x32xf32>
    %cst_30 = arith.constant 1.000000e+00 : f32
    %65 = vector.broadcast %cst_30 : f32 to vector<2x32xf32>
    %66 = arith.addf %65, %24 : vector<2x32xf32>
    %67 = arith.mulf %23, %23 : vector<2x32xf32>
    %68 = arith.subf %66, %67 : vector<2x32xf32>
    %69 = arith.subf %68, %61 : vector<2x32xf32>
    %70 = vector.extract_strided_slice %69 {offsets = [0, 0], sizes = [2, 8], strides = [1, 1]} : vector<2x32xf32> to vector<2x8xf32>
    %cst_31 = arith.constant dense<0.000000e+00> : vector<2xf32>
    %71 = vector.multi_reduction <add>, %70, %cst_31 [1] : vector<2x8xf32> to vector<2xf32>
    %72 = vector.shape_cast %71 : vector<2xf32> to vector<2x1xf32>
    %73 = vector.extract_strided_slice %69 {offsets = [0, 8], sizes = [2, 8], strides = [1, 1]} : vector<2x32xf32> to vector<2x8xf32>
    %cst_32 = arith.constant dense<0.000000e+00> : vector<2xf32>
    %74 = vector.multi_reduction <add>, %73, %cst_32 [1] : vector<2x8xf32> to vector<2xf32>
    %75 = vector.shape_cast %74 : vector<2xf32> to vector<2x1xf32>
    %76 = vector.extract_strided_slice %69 {offsets = [0, 16], sizes = [2, 8], strides = [1, 1]} : vector<2x32xf32> to vector<2x8xf32>
    %cst_33 = arith.constant dense<0.000000e+00> : vector<2xf32>
    %77 = vector.multi_reduction <add>, %76, %cst_33 [1] : vector<2x8xf32> to vector<2xf32>
    %78 = vector.shape_cast %77 : vector<2xf32> to vector<2x1xf32>
    %79 = vector.extract_strided_slice %69 {offsets = [0, 24], sizes = [2, 8], strides = [1, 1]} : vector<2x32xf32> to vector<2x8xf32>
    %cst_34 = arith.constant dense<0.000000e+00> : vector<2xf32>
    %80 = vector.multi_reduction <add>, %79, %cst_34 [1] : vector<2x8xf32> to vector<2xf32>
    %81 = vector.shape_cast %80 : vector<2xf32> to vector<2x1xf32>
    %82 = tpu.concatenate %72, %75, %78, %81 in 1 : vector<2x1xf32>, vector<2x1xf32>, vector<2x1xf32>, vector<2x1xf32> -> vector<2x4xf32>
    %cst_35 = arith.constant -5.000000e-01 : f32
    %83 = vector.broadcast %cst_35 : f32 to vector<2x4xf32>
    %84 = arith.mulf %83, %82 : vector<2x4xf32>
    %85 = arith.truncf %64 : vector<2x32xf32> to vector<2x32xbf16>
    %c0_36 = arith.constant 0 : index
    %c0_37 = arith.constant 0 : index
    %86 = vector.load %arg10[%c0_36, %c0_37] : memref<32x128xbf16, #tpu.memory_space<vmem>>, vector<32x128xbf16>
    %cst_38 = arith.constant dense<0.000000e+00> : vector<2x128xf32>
    %87 = tpu.matmul %85, %86, %cst_38 {dimension_numbers = #tpu.dot_dimension_numbers<[1], [0], [0], [1], [0, 0, 1, 1], [], []>} : vector<2x32xbf16>, vector<32x128xbf16>, vector<2x128xf32> -> vector<2x128xf32>
    %c0_39 = arith.constant 0 : index
    %c0_40 = arith.constant 0 : index
    %88 = vector.load %arg11[%c0_39, %c0_40] : memref<1x128xf32, #tpu.memory_space<vmem>>, vector<1x128xf32>
    %89 = vector.broadcast %88 : vector<1x128xf32> to vector<2x128xf32>
    %90 = arith.addf %87, %89 : vector<2x128xf32>
    %cst_41 = arith.constant 0.000000e+00 : f32
    %91 = vector.broadcast %cst_41 : f32 to vector<2x128xf32>
    %92 = arith.maximumf %90, %91 : vector<2x128xf32>
    %93 = arith.truncf %92 : vector<2x128xf32> to vector<2x128xbf16>
    %c0_42 = arith.constant 0 : index
    %c0_43 = arith.constant 0 : index
    %94 = vector.load %arg12[%c0_42, %c0_43] : memref<128x128xbf16, #tpu.memory_space<vmem>>, vector<128x128xbf16>
    %cst_44 = arith.constant dense<0.000000e+00> : vector<2x128xf32>
    %95 = tpu.matmul %93, %94, %cst_44 {dimension_numbers = #tpu.dot_dimension_numbers<[1], [0], [0], [1], [0, 0, 1, 1], [], []>} : vector<2x128xbf16>, vector<128x128xbf16>, vector<2x128xf32> -> vector<2x128xf32>
    %c0_45 = arith.constant 0 : index
    %c0_46 = arith.constant 0 : index
    %96 = vector.load %arg13[%c0_45, %c0_46] : memref<1x128xf32, #tpu.memory_space<vmem>>, vector<1x128xf32>
    %97 = vector.broadcast %96 : vector<1x128xf32> to vector<2x128xf32>
    %98 = arith.addf %95, %97 : vector<2x128xf32>
    %cst_47 = arith.constant 0.000000e+00 : f32
    %99 = vector.broadcast %cst_47 : f32 to vector<2x128xf32>
    %100 = arith.maximumf %98, %99 : vector<2x128xf32>
    %101 = arith.truncf %100 : vector<2x128xf32> to vector<2x128xbf16>
    %c0_48 = arith.constant 0 : index
    %c0_49 = arith.constant 0 : index
    %102 = vector.load %arg14[%c0_48, %c0_49] : memref<128x3136xbf16, #tpu.memory_space<vmem>>, vector<128x3136xbf16>
    %cst_50 = arith.constant dense<0.000000e+00> : vector<2x3136xf32>
    %103 = tpu.matmul %101, %102, %cst_50 {dimension_numbers = #tpu.dot_dimension_numbers<[1], [0], [0], [1], [0, 0, 1, 1], [], []>} : vector<2x128xbf16>, vector<128x3136xbf16>, vector<2x3136xf32> -> vector<2x3136xf32>
    %c0_51 = arith.constant 0 : index
    %c0_52 = arith.constant 0 : index
    %104 = vector.load %arg15[%c0_51, %c0_52] : memref<1x3136xf32, #tpu.memory_space<vmem>>, vector<1x3136xf32>
    %105 = vector.broadcast %104 : vector<1x3136xf32> to vector<2x3136xf32>
    %106 = arith.addf %103, %105 : vector<2x3136xf32>
    %107 = math.absf %106 : vector<2x3136xf32>
    %cst_53 = arith.constant 0.000000e+00 : f32
    %108 = vector.broadcast %cst_53 : f32 to vector<2x3136xf32>
    %109 = arith.subf %108, %107 : vector<2x3136xf32>
    %110 = math.exp %109 : vector<2x3136xf32>
    %cst_54 = arith.constant 1.000000e+00 : f32
    %111 = vector.broadcast %cst_54 : f32 to vector<2x3136xf32>
    %112 = arith.addf %111, %110 : vector<2x3136xf32>
    %113 = math.log %112 : vector<2x3136xf32>
    %cst_55 = arith.constant 0.000000e+00 : f32
    %114 = vector.broadcast %cst_55 : f32 to vector<2x3136xf32>
    %115 = arith.maximumf %106, %114 : vector<2x3136xf32>
    %116 = arith.addf %115, %113 : vector<2x3136xf32>
    %cst_56 = arith.constant 0.000000e+00 : f32
    %117 = vector.broadcast %cst_56 : f32 to vector<2x3136xf32>
    %118 = arith.subf %117, %106 : vector<2x3136xf32>
    %cst_57 = arith.constant 0.000000e+00 : f32
    %119 = vector.broadcast %cst_57 : f32 to vector<2x3136xf32>
    %120 = arith.maximumf %118, %119 : vector<2x3136xf32>
    %121 = arith.addf %120, %113 : vector<2x3136xf32>
    %cst_58 = arith.constant 0.000000e+00 : f32
    %122 = vector.broadcast %cst_58 : f32 to vector<2x3136xf32>
    %123 = arith.subf %122, %121 : vector<2x3136xf32>
    %124 = math.exp %123 : vector<2x3136xf32>
    %c0_59 = arith.constant 0 : index
    %c0_60 = arith.constant 0 : index
    %125 = vector.load %arg17[%c0_59, %c0_60] : memref<2x3136xf32, #tpu.memory_space<vmem>>, vector<2x3136xf32>
    tpu.vector_store %arg17[%c0_59, %c0_60], %124 {strides = array<i32>} : memref<2x3136xf32, #tpu.memory_space<vmem>>, vector<2x3136xf32>,
    %cst_61 = arith.constant 1.000000e+02 : f32
    %126 = vector.broadcast %cst_61 : f32 to vector<2x3136xf32>
    %127 = arith.minimumf %116, %126 : vector<2x3136xf32>
    %cst_62 = arith.constant 1.000000e+02 : f32
    %128 = vector.broadcast %cst_62 : f32 to vector<2x3136xf32>
    %129 = arith.minimumf %121, %128 : vector<2x3136xf32>
    %130 = tpu.concatenate %0, %0, %0, %0 in 1 : vector<2x784xf32>, vector<2x784xf32>, vector<2x784xf32>, vector<2x784xf32> -> vector<2x3136xf32>
    %131 = arith.subf %129, %127 : vector<2x3136xf32>
    %132 = arith.mulf %130, %131 : vector<2x3136xf32>
    %133 = arith.addf %127, %132 : vector<2x3136xf32>
    %134 = vector.extract_strided_slice %133 {offsets = [0, 0], sizes = [2, 784], strides = [1, 1]} : vector<2x3136xf32> to vector<2x784xf32>
    %cst_63 = arith.constant dense<0.000000e+00> : vector<2xf32>
    %135 = vector.multi_reduction <add>, %134, %cst_63 [1] : vector<2x784xf32> to vector<2xf32>
    %136 = vector.shape_cast %135 : vector<2xf32> to vector<2x1xf32>
    %137 = vector.extract_strided_slice %133 {offsets = [0, 784], sizes = [2, 784], strides = [1, 1]} : vector<2x3136xf32> to vector<2x784xf32>
    %cst_64 = arith.constant dense<0.000000e+00> : vector<2xf32>
    %138 = vector.multi_reduction <add>, %137, %cst_64 [1] : vector<2x784xf32> to vector<2xf32>
    %139 = vector.shape_cast %138 : vector<2xf32> to vector<2x1xf32>
    %140 = vector.extract_strided_slice %133 {offsets = [0, 1568], sizes = [2, 784], strides = [1, 1]} : vector<2x3136xf32> to vector<2x784xf32>
    %cst_65 = arith.constant dense<0.000000e+00> : vector<2xf32>
    %141 = vector.multi_reduction <add>, %140, %cst_65 [1] : vector<2x784xf32> to vector<2xf32>
    %142 = vector.shape_cast %141 : vector<2xf32> to vector<2x1xf32>
    %143 = vector.extract_strided_slice %133 {offsets = [0, 2352], sizes = [2, 784], strides = [1, 1]} : vector<2x3136xf32> to vector<2x784xf32>
    %cst_66 = arith.constant dense<0.000000e+00> : vector<2xf32>
    %144 = vector.multi_reduction <add>, %143, %cst_66 [1] : vector<2x784xf32> to vector<2xf32>
    %145 = vector.shape_cast %144 : vector<2xf32> to vector<2x1xf32>
    %146 = tpu.concatenate %136, %139, %142, %145 in 1 : vector<2x1xf32>, vector<2x1xf32>, vector<2x1xf32>, vector<2x1xf32> -> vector<2x4xf32>
    %cst_67 = arith.constant 0.000000e+00 : f32
    %147 = vector.broadcast %cst_67 : f32 to vector<2x84xf32>
    %148 = tpu.concatenate %64, %60, %84, %146, %147 in 1 : vector<2x32xf32>, vector<2x4xf32>, vector<2x4xf32>, vector<2x4xf32>, vector<2x84xf32> -> vector<2x128xf32>
    %c0_68 = arith.constant 0 : index
    %c0_69 = arith.constant 0 : index
    %149 = vector.load %arg16[%c0_68, %c0_69] : memref<2x128xf32, #tpu.memory_space<vmem>>, vector<2x128xf32>
    tpu.vector_store %arg16[%c0_68, %c0_69], %148 {strides = array<i32>} : memref<2x128xf32, #tpu.memory_space<vmem>>, vector<2x128xf32>,
    return
  }
  func.func @transform_0(%arg0: i32) -> (i32, i32) {
    %c0_i32 = arith.constant 0 : i32
    %c0_i32_0 = arith.constant 0 : i32
    return %arg0, %c0_i32 : i32, i32
  }
  func.func @transform_1(%arg0: i32) -> (i32, i32) {
    %c0_i32 = arith.constant 0 : i32
    %c0_i32_0 = arith.constant 0 : i32
    return %arg0, %c0_i32 : i32, i32
  }
  func.func @transform_2(%arg0: i32) -> (i32, i32) {
    %c0_i32 = arith.constant 0 : i32
    %c0_i32_0 = arith.constant 0 : i32
    return %arg0, %c0_i32 : i32, i32
  }
  func.func @transform_3(%arg0: i32) -> (i32, i32) {
    %c0_i32 = arith.constant 0 : i32
    %c0_i32_0 = arith.constant 0 : i32
    %c0_i32_1 = arith.constant 0 : i32
    return %c0_i32, %c0_i32_0 : i32, i32
  }
  func.func @transform_4(%arg0: i32) -> (i32, i32) {
    %c0_i32 = arith.constant 0 : i32
    %c0_i32_0 = arith.constant 0 : i32
    %c0_i32_1 = arith.constant 0 : i32
    return %c0_i32, %c0_i32_0 : i32, i32
  }
  func.func @transform_5(%arg0: i32) -> (i32, i32) {
    %c0_i32 = arith.constant 0 : i32
    %c0_i32_0 = arith.constant 0 : i32
    %c0_i32_1 = arith.constant 0 : i32
    return %c0_i32, %c0_i32_0 : i32, i32
  }
  func.func @transform_6(%arg0: i32) -> (i32, i32) {
    %c0_i32 = arith.constant 0 : i32
    %c0_i32_0 = arith.constant 0 : i32
    %c0_i32_1 = arith.constant 0 : i32
    return %c0_i32, %c0_i32_0 : i32, i32
  }
  func.func @transform_7(%arg0: i32) -> (i32, i32) {
    %c0_i32 = arith.constant 0 : i32
    %c0_i32_0 = arith.constant 0 : i32
    %c0_i32_1 = arith.constant 0 : i32
    return %c0_i32, %c0_i32_0 : i32, i32
  }
  func.func @transform_8(%arg0: i32) -> (i32, i32) {
    %c0_i32 = arith.constant 0 : i32
    %c0_i32_0 = arith.constant 0 : i32
    %c0_i32_1 = arith.constant 0 : i32
    return %c0_i32, %c0_i32_0 : i32, i32
  }
  func.func @transform_9(%arg0: i32) -> (i32, i32) {
    %c0_i32 = arith.constant 0 : i32
    %c0_i32_0 = arith.constant 0 : i32
    %c0_i32_1 = arith.constant 0 : i32
    return %c0_i32, %c0_i32_0 : i32, i32
  }
  func.func @transform_10(%arg0: i32) -> (i32, i32) {
    %c0_i32 = arith.constant 0 : i32
    %c0_i32_0 = arith.constant 0 : i32
    %c0_i32_1 = arith.constant 0 : i32
    return %c0_i32, %c0_i32_0 : i32, i32
  }
  func.func @transform_11(%arg0: i32) -> (i32, i32) {
    %c0_i32 = arith.constant 0 : i32
    %c0_i32_0 = arith.constant 0 : i32
    %c0_i32_1 = arith.constant 0 : i32
    return %c0_i32, %c0_i32_0 : i32, i32
  }
  func.func @transform_12(%arg0: i32) -> (i32, i32) {
    %c0_i32 = arith.constant 0 : i32
    %c0_i32_0 = arith.constant 0 : i32
    %c0_i32_1 = arith.constant 0 : i32
    return %c0_i32, %c0_i32_0 : i32, i32
  }
  func.func @transform_13(%arg0: i32) -> (i32, i32) {
    %c0_i32 = arith.constant 0 : i32
    %c0_i32_0 = arith.constant 0 : i32
    %c0_i32_1 = arith.constant 0 : i32
    return %c0_i32, %c0_i32_0 : i32, i32
  }
  func.func @transform_14(%arg0: i32) -> (i32, i32) {
    %c0_i32 = arith.constant 0 : i32
    %c0_i32_0 = arith.constant 0 : i32
    %c0_i32_1 = arith.constant 0 : i32
    return %c0_i32, %c0_i32_0 : i32, i32
  }
  func.func @transform_15(%arg0: i32) -> (i32, i32) {
    %c0_i32 = arith.constant 0 : i32
    %c0_i32_0 = arith.constant 0 : i32
    return %arg0, %c0_i32 : i32, i32
  }
  func.func @transform_16(%arg0: i32) -> (i32, i32) {
    %c0_i32 = arith.constant 0 : i32
    %c0_i32_0 = arith.constant 0 : i32
    return %arg0, %c0_i32 : i32, i32
  }
}

</mosaic_0001>

<bundles_post_ra>
// kernel: tpu_custom_call.1
= control target key start
LH: loop header
LB: loop body
LE: loop exit
PB: predicated region body
PF: predicated region fallthrough
CT: control target
= control target key end

     0   :  { %s6624_s0 = inlined_call_operand.vmem [shape: f32[2,784], index: 0, kind: input, shape index: {}]   ;;  %s6625_s1 = inlined_call_operand.vmem [shape: f32[2,4], index: 1, kind: input, shape index: {}]   ;;  %s6626_s2 = inlined_call_operand.vmem [shape: f32[2,32], index: 2, kind: input, shape index: {}]   ;;  %s6627_s3 = inlined_call_operand.vmem [shape: bf16[784,64], index: 3, kind: input, shape index: {}]   ;;  %s6628_s4 = inlined_call_operand.vmem [shape: f32[1,64], index: 4, kind: input, shape index: {}]   ;;  %s6629_s5 = inlined_call_operand.vmem [shape: bf16[64,64], index: 5, kind: input, shape index: {}]   ;;  %s6630_s6 = inlined_call_operand.vmem [shape: f32[1,64], index: 6, kind: input, shape index: {}]   ;;  %s6631_s7 = inlined_call_operand.vmem [shape: bf16[64,68], index: 7, kind: input, shape index: {}]   ;;  %s6632_s8 = inlined_call_operand.vmem [shape: f32[1,68], index: 8, kind: input, shape index: {}]   ;;  %s6633_s9 = inlined_call_operand.vmem [shape: bf16[32,128], index: 9, kind: input, shape index: {}]   ;;  %s6634_s10 = inlined_call_operand.vmem [shape: f32[1,128], index: 10, kind: input, shape index: {}]   ;;  %s6635_s11 = inlined_call_operand.vmem [shape: bf16[128,128], index: 11, kind: input, shape index: {}]   ;;  %s6636_s12 = inlined_call_operand.vmem [shape: f32[1,128], index: 12, kind: input, shape index: {}]   ;;  %s6637_s13 = inlined_call_operand.vmem [shape: bf16[128,3136], index: 13, kind: input, shape index: {}]   ;;  %s6638_s14 = inlined_call_operand.vmem [shape: f32[1,3136], index: 14, kind: input, shape index: {}]   ;;  %s6639_s15 = inlined_call_operand.hbm [shape: f32[2,128], index: 15, kind: output, shape index: {0}]   ;;  %s6640_s16 = inlined_call_operand.hbm [shape: f32[2,3136], index: 16, kind: output, shape index: {1}]  }
   0x1   :  { %6654 = sst [smem:[#allocation23_spill]] %s6624_s0 }
   0x2   :  { %22 = vsyncpa [#allocation3], 0  ;;  %v4424_v0 = vld [vmem:[%s6627_s3 + $0x40] sm:$0xff]   ;;  %v4428_v4 = vld [vmem:[%s6627_s3 + $0x48] sm:$0xff]   ;;  %v63_v27 = vlaneseq  ;;  %s6655_s25 = sld [smem:[#allocation23_spill]]  ;;  %v5002_v40 = vmov 0.0  }
   0x3   :  { %v4425_v1 = vld [vmem:[%s6627_s3] sm:$0xff]   ;;  %4230 = vmatprep.subr.bf16.mxu0 %v4424_v0  ;;  %v4429_v5 = vld [vmem:[%s6627_s3 + $0x8] sm:$0xff]   ;;  %v4432_v8 = vld [vmem:[%s6627_s3 + $0x50] sm:$0xff]   ;;  %v5001_v35 = vmov 1983009808   ;;  %vm5003_vm0 = vmmov 0  }
   0x4   :  { %v4426_v2 = vld [vmem:[%s6627_s3 + $0xc0] sm:$0xff]   ;;  %4231 = vmatpush3.bf16.msra.mxu0 %v4425_v1  ;;  %v4430_v6 = vld [vmem:[%s6627_s3 + $0xc8] sm:$0xff]   ;;  %v4433_v9 = vld [vmem:[%s6627_s3 + $0x10] sm:$0xff]   ;;  %v5196_v32 = vshrl.u32 %v63_v27, 7  ;;  %v61_v36 = vunpack.c.l.s4 %v5001_v35  ;;  %vm505_vm1 = vcmask 130048  }
   0x5   :  { %v4427_v3 = vld [vmem:[%s6627_s3 + $0x80] sm:$0xff]   ;;  %4252 = vmatprep.subr.bf16.mxu1 %v4426_v2  ;;  %4232 = vmatprep.subr.bf16.mxu0 %v4428_v4  ;;  %v4431_v7 = vld [vmem:[%s6627_s3 + $0x88] sm:$0xff]   ;;  %v4434_v10 = vld [vmem:[%s6627_s3 + $0xd0] sm:$0xff]  }
   0x6   :  { %4253 = vmatpush3.bf16.msra.mxu1 %v4427_v3  ;;  %v4435_v11 = vld [vmem:[%s6627_s3 + $0x90] sm:$0xff]   ;;  %v4436_v12 = vld [vmem:[%s6627_s3 + $0x58] sm:$0xff]   ;;  %v4440_v16 = vld [vmem:[%s6627_s3 + $0x60] sm:$0xff]   ;;  %v62_v38 = vunpack.c.0.s8 %v61_v36 }
   0x7   :  { %4254 = vmatprep.subr.bf16.mxu1 %v4430_v6  ;;  %v4437_v13 = vld [vmem:[%s6627_s3 + $0x18] sm:$0xff]   ;;  %v4441_v17 = vld [vmem:[%s6627_s3 + $0x20] sm:$0xff]   ;;  %v4444_v20 = vld [vmem:[%s6627_s3 + $0x68] sm:$0xff]  }
   0x8   :  { %4233 = vmatpush3.bf16.msra.mxu0 %v4429_v5  ;;  %v4438_v14 = vld [vmem:[%s6627_s3 + $0xd8] sm:$0xff]   ;;  %v4442_v18 = vld [vmem:[%s6627_s3 + $0xe0] sm:$0xff]   ;;  %v4445_v21 = vld [vmem:[%s6627_s3 + $0x28] sm:$0xff]   ;;  %v5209_v41 = vsub.s32 %v62_v38, %v5196_v32 }
   0x9   :  { %4234 = vmatprep.subr.bf16.mxu0 %v4432_v8  ;;  %v4439_v15 = vld [vmem:[%s6627_s3 + $0x98] sm:$0xff]   ;;  %v4443_v19 = vld [vmem:[%s6627_s3 + $0xa0] sm:$0xff]   ;;  %v4446_v22 = vld [vmem:[%s6627_s3 + $0xe8] sm:$0xff]  }
   0xa   :  { %4255 = vmatpush3.bf16.msra.mxu1 %v4431_v7  ;;  %v4447_v23 = vld [vmem:[%s6627_s3 + $0xa8] sm:$0xff]   ;;  %v4448_v24 = vld [vmem:[%s6627_s3 + $0x70] sm:$0xff]   ;;  %v4452_v29 = vld [vmem:[%s6627_s3 + $0x78] sm:$0xff]  }
   0xb   :  { %4256 = vmatprep.subr.bf16.mxu1 %v4434_v10  ;;  %v4449_v25 = vld [vmem:[%s6627_s3 + $0x30] sm:$0xff]   ;;  %v4453_v30 = vld [vmem:[%s6627_s3 + $0x38] sm:$0xff]   ;;  %v55_v33 = vld [vmem:[%s6655_s25] sm:$0xff] }
   0xc   :  { %4235 = vmatpush3.bf16.msra.mxu0 %v4433_v9  ;;  %v4450_v26 = vld [vmem:[%s6627_s3 + $0xf0] sm:$0xff]   ;;  %v4454_v31 = vld [vmem:[%s6627_s3 + $0xf8] sm:$0xff]   ;;  %v4456_v37 = vld [vmem:[%s6627_s3 + $0x140] sm:$0xff]   ;;  %v59_v39 = vcombine.high %v55_v33, %v55_v33  ;;  %v5212_v42 = vrot.slane %v55_v33, %v5209_v41 }
   0xd   :  { %4236 = vmatprep.subr.bf16.mxu0 %v4436_v12  ;;  %v4451_v28 = vld [vmem:[%s6627_s3 + $0xb0] sm:$0xff]   ;;  %v4455_v34 = vld [vmem:[%s6627_s3 + $0xb8] sm:$0xff]   ;;  %v4458_v50 = vld [vmem:[%s6627_s3 + $0x100] sm:$0xff]  }
   0xe   :  { %4257 = vmatpush3.bf16.msra.mxu1 %v4435_v11  ;;  %v5215_v43 = vrot.slane %v59_v39, %v5209_v41  ;;  %v5219_v44 = vcombine.high %v5212_v42, %v5212_v42  ;;  %v99_v46 = vpack.c.bf16 %v5212_v42, %v5212_v42  ;;  %v4459_v51 = vld [vmem:[%s6627_s3 + $0x148] sm:$0xff]   ;;  %v4461_v53 = vld [vmem:[%s6627_s3 + $0x150] sm:$0xff]   ;;  %v4463_v55 = vld [vmem:[%s6627_s3 + $0x158] sm:$0xff]  }
   0xf   :  { %4258 = vmatprep.subr.bf16.mxu1 %v4438_v14  ;;  %v4460_v52 = vld [vmem:[%s6627_s3 + $0x108] sm:$0xff]   ;;  %v4462_v54 = vld [vmem:[%s6627_s3 + $0x110] sm:$0xff]   ;;  %v4473_v56 = vld [vmem:[%s6627_s3 + $0x180] sm:$0xff]  }
  0x10   :  { %4237 = vmatpush3.bf16.msra.mxu0 %v4437_v13  ;;  %v5223_v45 = vcombine.high %v5215_v43, %v5215_v43  ;;  %v101_v47 = vpack.c.bf16 %v5215_v43, %v5215_v43  ;;  %v100_v48 = vpack.c.bf16 %v5219_v44, %v5219_v44  ;;  %v56_v57 = vld [vmem:[%s6655_s25 + $0x8] sm:$0x3f]  ;;  %v4464_v60 = vld [vmem:[%s6627_s3 + $0x118] sm:$0xff]   ;;  %v4465_v63 = vld [vmem:[%s6627_s3 + $0x160] sm:$0xff]  }
  0x11   :  { %4238 = vmatprep.subr.bf16.mxu0 %v4440_v16  ;;  %v5260_v58 = vrot.slane %v56_v57, %v5209_v41  ;;  %v76_v59 = vcombine.high %v56_v57, %v56_v57  ;;  %v4466_v2 = vld [vmem:[%s6627_s3 + $0x120] sm:$0xff]   ;;  %v4467_v3 = vld [vmem:[%s6627_s3 + $0x168] sm:$0xff]   ;;  %v4469_v5 = vld [vmem:[%s6627_s3 + $0x170] sm:$0xff]  }
  0x12   :  { %4259 = vmatpush3.bf16.msra.mxu1 %v4439_v15  ;;  %v102_v49 = vpack.c.bf16 %v5223_v45, %v5223_v45  ;;  %541 = vmatprep.mubr.bf16.mxu0 %v100_v48  ;;  %v4468_v4 = vld [vmem:[%s6627_s3 + $0x128] sm:$0xff]   ;;  %v4470_v6 = vld [vmem:[%s6627_s3 + $0x130] sm:$0xff]   ;;  %v4471_v7 = vld [vmem:[%s6627_s3 + $0x178] sm:$0xff]  }
  0x13   :  { %4260 = vmatprep.subr.bf16.mxu1 %v4442_v18  ;;  %v5267_v61 = vcombine.high %v5260_v58, %v5260_v58  ;;  %v5270_v62 = vrot.slane %v76_v59, %v5209_v41  ;;  %v4472_v8 = vld [vmem:[%s6627_s3 + $0x138] sm:$0xff]   ;;  %v103_v9 = vpack.c.bf16 %v5260_v58, %v5260_v58 }
  0x14   :  { %4239 = vmatpush3.bf16.msra.mxu0 %v4441_v17  ;;  %581 = vmatprep.mubr.bf16.mxu1 %v102_v49 }
  0x15   :  { %4240 = vmatprep.subr.bf16.mxu0 %v4444_v20  ;;  %v104_v0 = vpack.c.bf16 %v5267_v61, %v5267_v61  ;;  %v105_v1 = vpack.c.bf16 %v5270_v62, %v5270_v62 }
  0x16   :  { %4261 = vmatpush3.bf16.msra.mxu1 %v4443_v19 }
  0x17   :  { %4262 = vmatprep.subr.bf16.mxu1 %v4446_v22 }
  0x18   :  { %4241 = vmatpush3.bf16.msra.mxu0 %v4445_v21 }
  0x19   :  { %4242 = vmatprep.subr.bf16.mxu0 %v4448_v24 }
  0x1a   :  { %4263 = vmatpush3.bf16.msra.mxu1 %v4447_v23 }
  0x1b   :  { %4264 = vmatprep.subr.bf16.mxu1 %v4450_v26 }
  0x1c   :  { %4243 = vmatpush3.bf16.msra.mxu0 %v4449_v25 }
  0x1d   :  { %4244 = vmatprep.subr.bf16.mxu0 %v4452_v29 }
  0x1e   :  { %4265 = vmatpush3.bf16.msra.mxu1 %v4451_v28 }
  0x1f   :  { %4266 = vmatprep.subr.bf16.mxu1 %v4454_v31 }
  0x20   :  { %4245 = vmatpush3.bf16.msra.mxu0 %v4453_v30 }
  0x21   :  { %4274 = vmatprep.subr.bf16.mxu0 %v4456_v37 }
  0x22   :  { %4267 = vmatpush3.bf16.msra.mxu1 %v4455_v34 }
  0x23   :  { %4329 = vmatprep.subr.bf16.mxu1 %v5002_v40  ;;  %542 = vmatmul.mubr.bf16.vlgmr.msra.gmra.mrb[0].mxu0 %v99_v46 }
  0x24   :  { %4275 = vmatpush3.bf16.msra.mxu0 %v4458_v50  ;;  %621 = vmatprep.mubr.bf16.mxu0 %v104_v0 }
  0x25   :  { %582 = vmatmul.mubr.bf16.vlgmr.msra.gmra.mrb[0].mxu1 %v101_v47  ;;  %4276 = vmatprep.subr.bf16.mxu0 %v4459_v51 }
  0x26   :  { %4331 = vmatprep.mubr.msk.bf16.mxu1 %vm5003_vm0, %v5002_v40  ;;  %4330 = vmatpush3.bf16.msra.mxu1 %v4473_v56 }
  0x27   :  { %4335 = vmatprep.subr.bf16.mxu1 %v5002_v40 }
  0x28   :  { %4277 = vmatpush3.bf16.msra.mxu0 %v4460_v52 }
  0x29   :  { %4278 = vmatprep.subr.bf16.mxu0 %v4461_v53 }
  0x2c   :  { %4279 = vmatpush3.bf16.msra.mxu0 %v4462_v54 }
  0x2d   :  { %4280 = vmatprep.subr.bf16.mxu0 %v4463_v55  ;;  %4332 = vmatmul.mubr.msk.bf16.vlgmr.msra.gmra.mrb[4].mxu1 %vm505_vm1, %v105_v1 }
  0x2e   :  { %4343 = vmatprep.mubr.msk.bf16.mxu1 %vm5003_vm0, %v5002_v40 }
  0x30   :  { %4281 = vmatpush3.bf16.msra.mxu0 %v4464_v60 }
  0x31   :  { %4282 = vmatprep.subr.bf16.mxu0 %v4465_v63 }
  0x34   :  { %4283 = vmatpush3.bf16.msra.mxu0 %v4466_v2 }
  0x35   :  { %4284 = vmatprep.subr.bf16.mxu0 %v4467_v3 }
  0x38   :  { %4285 = vmatpush3.bf16.msra.mxu0 %v4468_v4 }
  0x39   :  { %4286 = vmatprep.subr.bf16.mxu0 %v4469_v5 }
  0x3c   :  { %4287 = vmatpush3.bf16.msra.mxu0 %v4470_v6 }
  0x3d   :  { %4288 = vmatprep.subr.bf16.mxu0 %v4471_v7 }
  0x40   :  { %4289 = vmatpush3.bf16.msra.mxu0 %v4472_v8 }
  0x41   :  { %4359 = vmatprep.subr.bf16.mxu0 %v5002_v40 }
  0x43   :  { %622 = vmatmul.mubr.bf16.vlgmr.msra.gmra.mrb[4].mxu0 %v103_v9 }
  0x44   :  { %4363 = vmatprep.mubr.msk.bf16.mxu0 %vm5003_vm0, %v5002_v40 }
  0x45   :  { %23 = vsyncpa [#allocation5], 0  ;;  %v4475_v10 = vld [vmem:[%s6629_s5] sm:$0xff]   ;;  %v4476_v11 = vld [vmem:[%s6629_s5 + $0x8] sm:$0xff]   ;;  %vm710_vm2 = vcmask 523264   ;;  %s5004_s3 = smov 32  }
  0x46   :  { %4336 = vmatpush3.bf16.msra.mxu1 %v4475_v10  ;;  %v4477_v12 = vld [vmem:[%s6629_s5 + $0x10] sm:$0xff]   ;;  %v4478_v13 = vld [vmem:[%s6629_s5 + $0x18] sm:$0xff]   ;;  %v3953_v16 = vld [vmem:[%s6628_s4] ss:$0 sm:$0xff]  ;;  %vm838_vm3 = vcmask 550400   ;;  %s5006_s27 = smov 16  }
  0x47   :  { %4337 = vmatprep.subr.bf16.mxu1 %v5002_v40  ;;  %v4479_v46 = vld [vmem:[%s6631_s7] sm:$0xff]   ;;  %v4480_v48 = vld [vmem:[%s6631_s7 + $0x8] sm:$0xff]   ;;  %v4481_v49 = vld [vmem:[%s6631_s7 + $0x10] sm:$0xff]   ;;  %vm963_vm4 = vcmask 261120   ;;  %vm849_vm5 = vcmask 25600   ;;  %vm910_vm6 = vcmask 58368  }
  0x48   :  { %v4482_v50 = vld [vmem:[%s6631_s7 + $0x18] sm:$0xff]   ;;  %v887_v51 = vld [vmem:[%s6626_s2] sm:$0x3]  ;;  %v4484_v8 = vld [vmem:[%s6633_s9 + $0x8] sm:$0xff]   ;;  %vm3645_vm7 = vcmask 392192   ;;  %vm3737_vm8 = vcmask 1041408  }
  0x49   :  { %889 = vrot.lane.b32.xlu0 %v887_v51, %s5004_s3  ;;  %v4004_v52 = vld [vmem:[%s6630_s6] ss:$0 sm:$0xff]  ;;  %s5009_s6 = smov 88   ;;  %vm3749_vm9 = vcmask 123904   ;;  %s5012_s17 = smov 80   ;;  %vm3525_vm10 = vcmask 517120  }
  0x4a   :  { %4338 = vmatpush3.bf16.msra.mxu1 %v4476_v11  ;;  %v4483_v63 = vld [vmem:[%s6633_s9] sm:$0xff]   ;;  %vm3775_vm11 = vcmask 916480   ;;  %vm3824_vm12 = vcmask 785408   ;;  %vm3873_vm13 = vcmask 654336   ;;  %vm932_vm14 = vcmask 7168   ;;  %s5014_s19 = smov [#allocation4]  }
  0x4b   :  { %4339 = vmatprep.subr.bf16.mxu1 %v5002_v40  ;;  %4360 = vmatpush3.bf16.msra.mxu0 %v4483_v63  ;;  %v4010_v0 = vld [vmem:[%s6632_s8] ss:$0 sm:$0xff]  ;;  %s5005_s8 = smov 96   ;;  %vm934_vm15 = vcmask 15360   ;;  %s3941_s20 = sshll.u32 %s5014_s19, 4  ;;  %s3942_s20 = int_to_ptr.vmem [resolvable:$true] %s3941_s20 }
  0x4c   :  { %4361 = vmatprep.subr.bf16.mxu0 %v5002_v40  ;;  %s4953_s21 = scalar_lea.vmem %s3942_s20, 800  ;;  %p4958_p1 = scmp.lt.s32.totalorder %s3942_s20, %s3942_s20 }
  0x4d   :  { %p4954_p0 = scmp.ne.s32.totalorder %s3942_s20, %s4953_s21  ;;  %p4959_p2 = scmp.lt.s32.totalorder %s4953_s21, %s4953_s21 }
  0x4e   :  { %4340 = vmatpush3.bf16.msra.mxu1 %v4477_v12  ;;  %v855_v12 = vld [vmem:[%s6625_s1] sm:$0x3]  ;;  %s5007_s1 = smov 64  }
  0x4f   :  { %4341 = vmatprep.subr.bf16.mxu1 %v5002_v40  ;;  %4362 = vmatpush3.bf16.msra.mxu0 %v4484_v8  ;;  %v4504_v8 = vld [vmem:[%s6637_s13 + $0xd4] ss:$100 sps:$4 sm:$0xff]   ;;  %p4960_p3 = por %p4959_p2, %p4958_p1 }
  0x50   :  { %4367 = vmatprep.subr.bf16.mxu0 %v5002_v40 }
  0x51   :  { %p4961_p4 = pnand %p4960_p3, %p4954_p0 }
  0x52   :  { %4342 = vmatpush3.bf16.msra.mxu1 %v4478_v13  ;;  %v856_v13 = vadd.f32 1e-20, %v855_v12 }
  0x53   :  { %4347 = vmatprep.subr.bf16.mxu1 %v5002_v40 }
  0xbb   :  { %v890_v9 = vpop.permute.xlu0 %889 }
  0xf6   :  { %v4246_v14 = vpop.f32.mrb[0].mxu0 }
  0xf7   :  { %v4247_v17 = vpop.f32.mrb[1].mxu0 }
  0xf8   :  { %v4268_v15 = vpop.f32.mrb[0].mxu1  ;;  %v4248_v19 = vadd.f32 %v4247_v17, %v4246_v14  ;;  %v4249_v20 = vpop.f32.mrb[2].mxu0 }
  0xf9   :  { %v4269_v18 = vpop.f32.mrb[1].mxu1  ;;  %v4250_v23 = vpop.f32.mrb[3].mxu0 }
  0xfa   :  { %v4270_v21 = vadd.f32 %v4269_v18, %v4268_v15  ;;  %v4271_v22 = vpop.f32.mrb[2].mxu1  ;;  %v544_v25 = vadd.f32 %v4248_v19, %v3953_v16 }
  0xfb   :  { %v4272_v24 = vpop.f32.mrb[3].mxu1 }
  0xfc   :  { %v584_v26 = vadd.f32 %v4270_v21, %v544_v25 }
 0x100   :  { %v663_v27 = vpop.f32.mrb[4].mxu1 }
 0x101   :  { %v4333_v28 = vpop.f32.mrb[5].mxu1 }
 0x102   :  { %v666_v29 = vpop.f32.mrb[6].mxu1 }
 0x103   :  { %v4334_v30 = vpop.f32.mrb[7].mxu1  ;;  %v4485_v29 = vld [vmem:[%s6635_s11] sm:$0xff]  }
 0x104   :  { %v4486_v30 = vld [vmem:[%s6635_s11 + $0x8] sm:$0xff]  }
 0x116   :  { %v4290_v31 = vpop.f32.mrb[4].mxu0 }
 0x117   :  { %v4291_v33 = vpop.f32.mrb[5].mxu0 }
 0x118   :  { %v4292_v34 = vadd.f32 %v4291_v33, %v4290_v31  ;;  %v4293_v35 = vpop.f32.mrb[6].mxu0  ;;  %v4487_v31 = vld [vmem:[%s6635_s11 + $0x10] sm:$0xff]   ;;  %v4488_v33 = vld [vmem:[%s6635_s11 + $0x18] sm:$0xff]  }
 0x119   :  { %v4294_v36 = vpop.f32.mrb[7].mxu0  ;;  %v4490_v35 = vld [vmem:[%s6635_s11 + $0x28] sm:$0xff]  }
 0x11a   :  { %v624_v37 = vadd.f32 %v4292_v34, %v584_v26  ;;  %v4489_v34 = vld [vmem:[%s6635_s11 + $0x20] sm:$0xff]   ;;  %v4491_v36 = vld [vmem:[%s6635_s11 + $0x30] sm:$0xff]  }
 0x11c   :  { %v664_v38 = vadd.f32 %v663_v27, %v624_v37  ;;  %v4492_v37 = vld [vmem:[%s6635_s11 + $0x38] sm:$0xff]   ;;  %s5008_s11 = smov 48  }
 0x11e   :  { %v669_v39 = vmax.f32 %v664_v38, 0.0 }
 0x120   :  { %v670_v47 = vpack.c.bf16 %v669_v39, %v669_v39 }
 0x122   :  { %4344 = vmatmul.mubr.msk.bf16.vlgmr.msra.gmra.mrb[8].mxu1 %vm710_vm2, %v670_v47 }
 0x123   :  { %4348 = vmatpush3.bf16.msra.mxu1 %v4479_v46  ;;  %4355 = vmatprep.mubr.msk.bf16.mxu1 %vm5003_vm0, %v5002_v40 }
 0x124   :  { %4349 = vmatprep.subr.bf16.mxu1 %v5002_v40 }
 0x127   :  { %4350 = vmatpush3.bf16.msra.mxu1 %v4480_v48 }
 0x128   :  { %4351 = vmatprep.subr.bf16.mxu1 %v5002_v40 }
 0x12b   :  { %4352 = vmatpush3.bf16.msra.mxu1 %v4481_v49 }
 0x12c   :  { %4353 = vmatprep.subr.bf16.mxu1 %v5002_v40 }
 0x12f   :  { %4354 = vmatpush3.bf16.msra.mxu1 %v4482_v50 }
 0x1f5   :  { %v748_v53 = vpop.f32.mrb[8].mxu1 }
 0x1f6   :  { %v749_v54 = vadd.f32 %v4004_v52, %v748_v53  ;;  %v4345_v55 = vpop.f32.mrb[9].mxu1 }
 0x1f7   :  { %v751_v56 = vpop.f32.mrb[10].mxu1 }
 0x1f8   :  { %v754_v57 = vmax.f32 %v749_v54, 0.0  ;;  %v4346_v59 = vpop.f32.mrb[11].mxu1  ;;  %v4016_v54 = vld [vmem:[%s6634_s10] ss:$0 sm:$0xff]  ;;  %s5011_s10 = smov 112  }
 0x1fa   :  { %v755_v60 = vpack.c.bf16 %v754_v57, %v754_v57 }
 0x1fc   :  { %4356 = vmatmul.mubr.msk.bf16.vlgmr.msra.gmra.mrb[12].mxu1 %vm710_vm2, %v755_v60 }
 0x2cf   :  { %v832_v1 = vpop.f32.mrb[12].mxu1 }
 0x2d0   :  { %v5361_v2 = vadd.f32 %v4010_v0, %v832_v1  ;;  %v4357_v3 = vpop.f32.mrb[13].mxu1 }
 0x2d1   :  { %v835_v4 = vpop.f32.mrb[14].mxu1  ;;  %v4495_v3 = vld [vmem:[%s6637_s13 + $0x4] ss:$100 sps:$4 sm:$0xff]  }
 0x2d2   :  { %v4358_v5 = vpop.f32.mrb[15].mxu1  ;;  %v839_v6 = vsel %vm838_vm3, %v5361_v2, -inf  ;;  %v885_v7 = vmul.f32 1.442695, %v5361_v2  ;;  %v899_v28 = vmul.f32 %v5361_v2, %v5361_v2  ;;  %v898_v50 = vadd.f32 1.0, %v5361_v2  ;;  %2471 = vmatprep.subr.bf16.mxu1 %v4495_v3 }
 0x2d3   :  { %840 = vmax.xlane.f32.xlu1 %v839_v6  ;;  %v4496_v4 = vld [vmem:[%s6637_s13 + $0x8] ss:$100 sps:$4 sm:$0xff]  }
 0x2d4   :  { %4789 = vpow2.f32 %v885_v7  ;;  %v4498_v6 = vld [vmem:[%s6637_s13 + $0xc] ss:$100 sps:$4 sm:$0xff]  }
 0x2d5   :  { %4791 = vlog2.f32 %v856_v13  ;;  %v4501_v7 = vld [vmem:[%s6637_s13 + $0xcc] ss:$100 sps:$4 sm:$0xff]  }
 0x2d6   :  { %v4505_v13 = vld [vmem:[%s6637_s13 + $0x190] ss:$100 sps:$4 sm:$0xff]  }
 0x2de   :  { %v5370_v10 = vpop.eup %4789 }
 0x2df   :  { %v892_v11 = vmul.f32 %v5370_v10, %v890_v9  ;;  %v4792_v14 = vpop.eup %4791  ;;  %v4499_v9 = vld [vmem:[%s6637_s13 + $0xc8] ss:$100 sps:$4 sm:$0xff]  }
 0x2e0   :  { %v858_v16 = vmul.f32 0.6931472, %v4792_v14  ;;  %v4507_v14 = vld [vmem:[%s6637_s13 + $0x194] ss:$100 sps:$4 sm:$0xff]  }
 0x2e1   :  { %894 = vrot.lane.b32.xlu0 %v892_v11, %s5005_s8  ;;  %v4502_v11 = vld [vmem:[%s6637_s13 + $0xd0] ss:$100 sps:$4 sm:$0xff]  }
 0x2e2   :  { %v859_v19 = vsub.f32 0.0, %v858_v16 }
 0x2e4   :  { %v860_v20 = vadd.f32 1e-20, %v859_v19  ;;  %v4513_v19 = vld [vmem:[%s6637_s13 + $0x25c] ss:$100 sps:$4 sm:$0xff]  }
 0x2e5   :  { %3577 = vrot.lane.b32.xlu0 %v5212_v42, %s5006_s27 }
 0x2e6   :  { %4793 = vlog2.f32 %v860_v20 }
 0x2e9   :  { %3579 = vrot.lane.b32.xlu0 %v5219_v44, %s5006_s27 }
 0x2ed   :  { %3581 = vrot.lane.b32.xlu0 %v5215_v43, %s5006_s27 }
 0x2f0   :  { %v4794_v24 = vpop.eup %4793 }
 0x2f1   :  { %3589 = vrot.lane.b32.xlu0 %v5270_v62, %s5006_s27  ;;  %v862_v25 = vmul.f32 0.6931472, %v4794_v24  ;;  %v4514_v24 = vld [vmem:[%s6637_s13 + $0x260] ss:$100 sps:$4 sm:$0xff]  }
 0x2f3   :  { %v863_v27 = vsub.f32 0.0, %v862_v25 }
 0x353   :  { %v895_v15 = vpop.permute.xlu0 %894 }
 0x354   :  { %v5386_v17 = vadd.f32 %v895_v15, %v5361_v2  ;;  %v4508_v15 = vld [vmem:[%s6637_s13 + $0x198] ss:$100 sps:$4 sm:$0xff]  }
 0x356   :  { %6656 = vst [vmem:[#allocation8_spill] sm:$0xff] %v5386_v17  ;;  %v939_v18 = vpack.c.bf16 %v5386_v17, %v5386_v17 }
 0x357   :  { %v5433_v38 = vpop.permute.xlu0 %3577 }
 0x358   :  { %4364 = vmatmul.mubr.msk.bf16.vlgmr.msra.gmra.mrb[8].mxu0 %vm963_vm4, %v939_v18  ;;  %v4510_v18 = vld [vmem:[%s6637_s13 + $0x19c] ss:$100 sps:$4 sm:$0xff]  }
 0x359   :  { %4383 = vmatprep.mubr.msk.bf16.mxu0 %vm5003_vm0, %v5002_v40  ;;  %4368 = vmatpush3.bf16.msra.mxu0 %v4485_v29 }
 0x35a   :  { %4369 = vmatprep.subr.bf16.mxu0 %v5002_v40 }
 0x35b   :  { %v5436_v47 = vpop.permute.xlu0 %3579 }
 0x35c   :  { %v5441_v48 = vsel %vm505_vm1, %v5433_v38, %v5436_v47 }
 0x35d   :  { %4370 = vmatpush3.bf16.msra.mxu0 %v4486_v30  ;;  %v4517_v30 = vld [vmem:[%s6637_s13 + $0x320] ss:$100 sps:$4 sm:$0xff]  }
 0x35e   :  { %4371 = vmatprep.subr.bf16.mxu0 %v5002_v40 }
 0x360   :  { %v841_v21 = vpop.xlane.xlu1 %840 }
 0x361   :  { %v842_v22 = vsub.f32 %v5361_v2, %v841_v21  ;;  %4372 = vmatpush3.bf16.msra.mxu0 %v4487_v31  ;;  %v4493_v2 = vld [vmem:[%s6637_s13] ss:$100 sps:$4 sm:$0xff]   ;;  %v4520_v31 = vld [vmem:[%s6637_s13 + $0x328] ss:$100 sps:$4 sm:$0xff]  }
 0x362   :  { %4373 = vmatprep.subr.bf16.mxu0 %v5002_v40  ;;  %2472 = vmatpush1.bf16.msra.mxu1 %v4493_v2  ;;  %v4516_v21 = vld [vmem:[%s6637_s13 + $0x264] ss:$100 sps:$4 sm:$0xff]  }
 0x363   :  { %v843_v23 = vmul.f32 1.442695, %v842_v22  ;;  %2473 = vmatprep.subr.bf16.mxu1 %v4501_v7 }
 0x365   :  { %4795 = vpow2.f32 %v843_v23  ;;  %4374 = vmatpush3.bf16.msra.mxu0 %v4488_v33  ;;  %v4511_v23 = vld [vmem:[%s6637_s13 + $0x258] ss:$100 sps:$4 sm:$0xff]  }
 0x366   :  { %4375 = vmatprep.subr.bf16.mxu0 %v5002_v40  ;;  %2474 = vmatpush1.bf16.msra.mxu1 %v4499_v9 }
 0x367   :  { %2475 = vmatprep.subr.bf16.mxu1 %v4507_v14 }
 0x369   :  { %4376 = vmatpush3.bf16.msra.mxu0 %v4489_v34  ;;  %v4525_v34 = vld [vmem:[%s6637_s13 + $0x3ec] ss:$100 sps:$4 sm:$0xff]  }
 0x36a   :  { %4377 = vmatprep.subr.bf16.mxu0 %v5002_v40  ;;  %2476 = vmatpush1.bf16.msra.mxu1 %v4505_v13 }
 0x36b   :  { %2477 = vmatprep.subr.bf16.mxu1 %v4513_v19 }
 0x36d   :  { %4378 = vmatpush3.bf16.msra.mxu0 %v4490_v35  ;;  %v4528_v35 = vld [vmem:[%s6637_s13 + $0x3f4] ss:$100 sps:$4 sm:$0xff]  }
 0x36e   :  { %4379 = vmatprep.subr.bf16.mxu0 %v5002_v40  ;;  %2478 = vmatpush1.bf16.msra.mxu1 %v4511_v23 }
 0x36f   :  { %v5394_v26 = vpop.eup %4795 }
 0x370   :  { %846 = vrot.lane.b32.xlu1 %v5394_v26, %s5007_s1 }
 0x371   :  { %4380 = vmatpush3.bf16.msra.mxu0 %v4491_v36 }
 0x372   :  { %4381 = vmatprep.subr.bf16.mxu0 %v5002_v40 }
 0x374   :  { %865 = vrot.lane.b32.xlu1 %v863_v27, %s5007_s1  ;;  %v4519_v27 = vld [vmem:[%s6637_s13 + $0x324] ss:$100 sps:$4 sm:$0xff]  }
 0x375   :  { %4382 = vmatpush3.bf16.msra.mxu0 %v4492_v37  ;;  %2479 = vmatprep.subr.bf16.mxu1 %v4519_v27  ;;  %v4523_v37 = vld [vmem:[%s6637_s13 + $0x3e8] ss:$100 sps:$4 sm:$0xff]  }
 0x376   :  { %2512 = vmatprep.subr.bf16.mxu0 %v4498_v6  ;;  %2480 = vmatpush1.bf16.msra.mxu1 %v4517_v30  ;;  %v4541_v30 = vld [vmem:[%s6637_s13 + $0x10] ss:$100 sps:$4 sm:$0xff]  }
 0x377   :  { %2481 = vmatprep.subr.bf16.mxu1 %v4525_v34 }
 0x378   :  { %901 = vrot.lane.b32.xlu1 %v899_v28, %s5004_s3  ;;  %v4522_v28 = vld [vmem:[%s6637_s13 + $0x32c] ss:$100 sps:$4 sm:$0xff]  }
 0x37a   :  { %2482 = vmatpush1.bf16.msra.mxu1 %v4523_v37  ;;  %v4549_v37 = vld [vmem:[%s6637_s13 + $0xdc] ss:$100 sps:$4 sm:$0xff]  }
 0x3e2   :  { %v847_v39 = vpop.permute.xlu1 %846 }
 0x3e3   :  { %v850_v46 = vsel %vm849_vm5, %v847_v39, 0.0  ;;  %v4526_v39 = vld [vmem:[%s6637_s13 + $0x3f0] ss:$100 sps:$4 sm:$0xff]  }
 0x3e4   :  { %851 = vadd.xlane.f32.xlu0 %v850_v46  ;;  %v4531_v46 = vld [vmem:[%s6637_s13 + $0x4b4] ss:$100 sps:$4 sm:$0xff]  }
 0x3e5   :  { %2483 = vmatprep.subr.bf16.mxu1 %v4531_v46  ;;  %v4547_v46 = vld [vmem:[%s6637_s13 + $0xd8] ss:$100 sps:$4 sm:$0xff]  }
 0x3e6   :  { %v5443_v49 = vpop.permute.xlu1 %865 }
 0x3ea   :  { %v902_v51 = vpop.permute.xlu1 %901 }
 0x3eb   :  { %v904_v52 = vsub.f32 %v898_v50, %v902_v51  ;;  %v4534_v50 = vld [vmem:[%s6637_s13 + $0x4bc] ss:$100 sps:$4 sm:$0xff]   ;;  %v4529_v51 = vld [vmem:[%s6637_s13 + $0x4b0] ss:$100 sps:$4 sm:$0xff]  }
 0x3ec   :  { %2484 = vmatpush1.bf16.msra.mxu1 %v4529_v51  ;;  %v4555_v51 = vld [vmem:[%s6637_s13 + $0x1a4] ss:$100 sps:$4 sm:$0xff]  }
 0x3ed   :  { %v5447_v53 = vsub.f32 %v904_v52, %v5370_v10  ;;  %v5497_v10 = vpop.permute.xlu0 %3581  ;;  %v4532_v52 = vld [vmem:[%s6637_s13 + $0x4b8] ss:$100 sps:$4 sm:$0xff]  }
 0x3ef   :  { %6657 = vst [vmem:[#allocation9_spill] sm:$0xff] %v5447_v53  ;;  %907 = vrot.lane.b32.xlu1 %v5447_v53, %s5005_s8 }
 0x3f1   :  { %v3590_v12 = vpop.permute.xlu0 %3589 }
 0x3f3   :  { %3587 = vrot.lane.b32.xlu1 %v5267_v61, %s5006_s27 }
 0x3fa   :  { %3604 = vrot.lane.b32.xlu0 %v5212_v42, %s5004_s3 }
 0x3fe   :  { %3606 = vrot.lane.b32.xlu0 %v5219_v44, %s5004_s3 }
 0x402   :  { %3608 = vrot.lane.b32.xlu0 %v5215_v43, %s5004_s3 }
 0x406   :  { %3616 = vrot.lane.b32.xlu0 %v5270_v62, %s5004_s3 }
 0x40a   :  { %3631 = vrot.lane.b32.xlu0 %v5212_v42, %s5008_s11 }
 0x40e   :  { %3635 = vrot.lane.b32.xlu0 %v5215_v43, %s5008_s11 }
 0x412   :  { %3585 = vrot.lane.b32.xlu0 %v5260_v58, %s5006_s27 }
 0x416   :  { %3612 = vrot.lane.b32.xlu0 %v5260_v58, %s5004_s3 }
 0x41a   :  { %3641 = vrot.lane.b32.xlu0 %v5267_v61, %s5008_s11 }
 0x41e   :  { %914 = vrot.lane.b32.xlu0 %v5447_v53, %s5009_s6 }
 0x42b   :  { %v1001_v55 = vpop.f32.mrb[8].mxu0 }
 0x42c   :  { %v1002_v56 = vadd.f32 %v4016_v54, %v1001_v55  ;;  %v4365_v57 = vpop.f32.mrb[9].mxu0  ;;  %v4537_v54 = vld [vmem:[%s6637_s13 + $0x57c] ss:$100 sps:$4 sm:$0xff]   ;;  %v4540_v55 = vld [vmem:[%s6637_s13 + $0x584] ss:$100 sps:$4 sm:$0xff]  }
 0x42d   :  { %v1004_v59 = vpop.f32.mrb[10].mxu0  ;;  %v4538_v57 = vld [vmem:[%s6637_s13 + $0x580] ss:$100 sps:$4 sm:$0xff]   ;;  %2485 = vmatprep.subr.bf16.mxu1 %v4537_v54 }
 0x42e   :  { %v1007_v60 = vmax.f32 %v1002_v56, 0.0  ;;  %v4366_v63 = vpop.f32.mrb[11].mxu0  ;;  %v4535_v56 = vld [vmem:[%s6637_s13 + $0x578] ss:$100 sps:$4 sm:$0xff]   ;;  %v4553_v54 = vld [vmem:[%s6637_s13 + $0x1a0] ss:$100 sps:$4 sm:$0xff]  }
 0x42f   :  { %2486 = vmatpush1.bf16.msra.mxu1 %v4535_v56  ;;  %v4543_v59 = vld [vmem:[%s6637_s13 + $0x14] ss:$100 sps:$4 sm:$0xff]   ;;  %v4546_v63 = vld [vmem:[%s6637_s13 + $0x1c] ss:$100 sps:$4 sm:$0xff]   ;;  %v4561_v56 = vld [vmem:[%s6637_s13 + $0x26c] ss:$100 sps:$4 sm:$0xff]  }
 0x430   :  { %v1008_v0 = vpack.c.bf16 %v1007_v60, %v1007_v60  ;;  %v5010_v60 = vmov 0   ;;  %2553 = vmatprep.subr.bf16.mxu1 %v4543_v59  ;;  %v4559_v59 = vld [vmem:[%s6637_s13 + $0x268] ss:$100 sps:$4 sm:$0xff]  }
 0x431   :  { %2503 = vmatprep.mubr.bf16.mxu1 %v5010_v60 }
 0x432   :  { %4384 = vmatmul.mubr.bf16.vlgmr.msra.gmra.mrb[12].mxu0 %v1008_v0 }
 0x433   :  { %2513 = vmatpush1.bf16.msra.mxu0 %v4496_v4  ;;  %2544 = vmatprep.mubr.bf16.mxu0 %v5010_v60 }
 0x434   :  { %2514 = vmatprep.subr.bf16.mxu0 %v4504_v8 }
 0x437   :  { %2515 = vmatpush1.bf16.msra.mxu0 %v4502_v11 }
 0x438   :  { %2516 = vmatprep.subr.bf16.mxu0 %v4510_v18  ;;  %v4020_v18 = vld [vmem:[%s6636_s12] ss:$0 sm:$0xff] }
 0x43b   :  { %2517 = vmatpush1.bf16.msra.mxu0 %v4508_v15 }
 0x43c   :  { %2518 = vmatprep.subr.bf16.mxu0 %v4516_v21 }
 0x43f   :  { %2519 = vmatpush1.bf16.msra.mxu0 %v4514_v24 }
 0x440   :  { %2520 = vmatprep.subr.bf16.mxu0 %v4522_v28 }
 0x443   :  { %2521 = vmatpush1.bf16.msra.mxu0 %v4520_v31  ;;  %v4544_v31 = vld [vmem:[%s6637_s13 + $0x18] ss:$100 sps:$4 sm:$0xff]  }
 0x444   :  { %2522 = vmatprep.subr.bf16.mxu0 %v4528_v35 }
 0x447   :  { %2523 = vmatpush1.bf16.msra.mxu0 %v4526_v39  ;;  %v4552_v39 = vld [vmem:[%s6637_s13 + $0xe4] ss:$100 sps:$4 sm:$0xff]  }
 0x448   :  { %2524 = vmatprep.subr.bf16.mxu0 %v4534_v50  ;;  %v4550_v50 = vld [vmem:[%s6637_s13 + $0xe0] ss:$100 sps:$4 sm:$0xff]  }
 0x44b   :  { %2525 = vmatpush1.bf16.msra.mxu0 %v4532_v52  ;;  %v4558_v52 = vld [vmem:[%s6637_s13 + $0x1ac] ss:$100 sps:$4 sm:$0xff]  }
 0x44c   :  { %2526 = vmatprep.subr.bf16.mxu0 %v4540_v55  ;;  %v4556_v55 = vld [vmem:[%s6637_s13 + $0x1a8] ss:$100 sps:$4 sm:$0xff]  }
 0x44f   :  { %2527 = vmatpush1.bf16.msra.mxu0 %v4538_v57  ;;  %v4564_v57 = vld [vmem:[%s6637_s13 + $0x274] ss:$100 sps:$4 sm:$0xff]  }
 0x450   :  { %2594 = vmatprep.subr.bf16.mxu0 %v4546_v63  ;;  %v4562_v63 = vld [vmem:[%s6637_s13 + $0x270] ss:$100 sps:$4 sm:$0xff]  }
 0x461   :  { %v908_v1 = vpop.permute.xlu1 %907 }
 0x462   :  { %v911_v5 = vsel %vm910_vm6, %v908_v1, 0.0 }
 0x463   :  { %912 = vadd.xlane.f32.xlu1 %v911_v5 }
 0x465   :  { %v5519_v20 = vpop.permute.xlu1 %3587 }
 0x466   :  { %v3596_v22 = vsel %vm505_vm1, %v5519_v20, %v3590_v12 }
 0x471   :  { %v5511_v16 = vpop.xlane.xlu0 %851 }
 0x472   :  { %4797 = vrcp.f32 %v5511_v16 }
 0x474   :  { %3614 = vrot.lane.b32.xlu1 %v5267_v61, %s5004_s3 }
 0x475   :  { %v3605_v25 = vpop.permute.xlu0 %3604 }
 0x476   :  { %v5541_v29 = vsel %vm963_vm4, %v3596_v22, %v3605_v25 }
 0x478   :  { %3583 = vrot.lane.b32.xlu1 %v5223_v45, %s5006_s27 }
 0x479   :  { %v5551_v33 = vpop.permute.xlu0 %3606 }
 0x47a   :  { %v5561_v36 = vsel %vm963_vm4, %v3605_v25, %v5551_v33 }
 0x47b   :  { %6658 = vst [vmem:[#allocation10_spill] sm:$0xff] %v5561_v36 }
 0x47c   :  { %3633 = vrot.lane.b32.xlu1 %v5219_v44, %s5008_s11  ;;  %v4798_v0 = vpop.eup %4797 }
 0x47d   :  { %v854_v1 = vmul.f32 %v4798_v0, %v5394_v26  ;;  %v5616_v4 = vpop.permute.xlu0 %3608  ;;  %v4567_v0 = vld [vmem:[%s6637_s13 + $0x334] ss:$100 sps:$4 sm:$0xff]  }
 0x47f   :  { %v5612_v2 = vadd.f32 %v5443_v49, %v854_v1  ;;  %v4570_v1 = vld [vmem:[%s6637_s13 + $0x33c] ss:$100 sps:$4 sm:$0xff]  }
 0x480   :  { %3610 = vrot.lane.b32.xlu1 %v5223_v45, %s5004_s3 }
 0x481   :  { %v869_v3 = vsel %vm838_vm3, %v5612_v2, -inf  ;;  %v5618_v5 = vpop.permute.xlu0 %3616 }
 0x482   :  { %6659 = vst [vmem:[#allocation11_spill] sm:$0xff] %v5618_v5 }
 0x484   :  { %3637 = vrot.lane.b32.xlu1 %v5223_v45, %s5008_s11 }
 0x485   :  { %v5622_v6 = vpop.permute.xlu0 %3631 }
 0x486   :  { %6660 = vst [vmem:[#allocation12_spill] sm:$0xff] %v5622_v6 }
 0x488   :  { %3639 = vrot.lane.b32.xlu1 %v5260_v58, %s5008_s11 }
 0x489   :  { %v5624_v7 = vpop.permute.xlu0 %3635 }
 0x48a   :  { %6661 = vst [vmem:[#allocation13_spill] sm:$0xff] %v5624_v7 }
 0x48d   :  { %v5626_v8 = vpop.permute.xlu0 %3585 }
 0x491   :  { %v5628_v26 = vpop.permute.xlu0 %3612 }
 0x492   :  { %6662 = vst [vmem:[#allocation14_spill] sm:$0xff] %v5628_v26 }
 0x495   :  { %v5630_v49 = vpop.permute.xlu0 %3641 }
 0x496   :  { %6663 = vst [vmem:[#allocation15_spill] sm:$0xff] %v5630_v49 }
 0x499   :  { %v915_v9 = vpop.permute.xlu0 %914 }
 0x49a   :  { %v917_v11 = vsel %vm910_vm6, %v915_v9, 0.0  ;;  %v4568_v9 = vld [vmem:[%s6637_s13 + $0x338] ss:$100 sps:$4 sm:$0xff]  }
 0x4ac   :  { %870 = vmax.xlane.f32.xlu1 %v869_v3  ;;  %v4565_v3 = vld [vmem:[%s6637_s13 + $0x330] ss:$100 sps:$4 sm:$0xff]  }
 0x4bd   :  { %3643 = vrot.lane.b32.xlu1 %v5270_v62, %s5008_s11 }
 0x4e1   :  { %918 = vadd.xlane.f32.xlu1 %v917_v11  ;;  %v4573_v11 = vld [vmem:[%s6637_s13 + $0x3fc] ss:$100 sps:$4 sm:$0xff]  }
 0x4f0   :  { %v5633_v12 = vpop.xlane.xlu1 %912 }
 0x4f1   :  { %6664 = vst [vmem:[#allocation16_spill] sm:$0xff] %v5633_v12 }
 0x4f4   :  { %v5635_v13 = vpop.permute.xlu1 %3614 }
 0x4f5   :  { %6665 = vst [vmem:[#allocation17_spill] sm:$0xff] %v5635_v13 }
 0x4f8   :  { %v5637_v14 = vpop.permute.xlu1 %3583 }
 0x4fc   :  { %v5639_v15 = vpop.permute.xlu1 %3633 }
 0x4fd   :  { %6666 = vst [vmem:[#allocation18_spill] sm:$0xff] %v5639_v15 }
 0x500   :  { %v5641_v16 = vpop.permute.xlu1 %3610 }
 0x504   :  { %v5646_v19 = vpop.permute.xlu1 %3637 }
 0x505   :  { %6667 = vst [vmem:[#allocation19_spill] sm:$0xff] %v5646_v19  ;;  %v1114_v21 = vpop.f32.mrb[12].mxu0 }
 0x506   :  { %v1115_v22 = vadd.f32 %v4020_v18, %v1114_v21  ;;  %v4385_v23 = vpop.f32.mrb[13].mxu0  ;;  %v4576_v18 = vld [vmem:[%s6637_s13 + $0x404] ss:$100 sps:$4 sm:$0xff]   ;;  %v4571_v21 = vld [vmem:[%s6637_s13 + $0x3f8] ss:$100 sps:$4 sm:$0xff]  }
 0x507   :  { %v1117_v24 = vpop.f32.mrb[14].mxu0  ;;  %v4579_v23 = vld [vmem:[%s6637_s13 + $0x4c4] ss:$100 sps:$4 sm:$0xff]  }
 0x508   :  { %v1120_v25 = vmax.f32 %v1115_v22, 0.0  ;;  %v4386_v27 = vpop.f32.mrb[15].mxu0  ;;  %v5648_v28 = vpop.permute.xlu1 %3639  ;;  %v4574_v22 = vld [vmem:[%s6637_s13 + $0x400] ss:$100 sps:$4 sm:$0xff]   ;;  %v4582_v24 = vld [vmem:[%s6637_s13 + $0x4cc] ss:$100 sps:$4 sm:$0xff]  }
 0x509   :  { %6668 = vst [vmem:[#allocation20_spill] sm:$0xff] %v5648_v28  ;;  %v5659_v34 = vsel %vm3645_vm7, %v5646_v19, %v5648_v28  ;;  %v4580_v27 = vld [vmem:[%s6637_s13 + $0x4c8] ss:$100 sps:$4 sm:$0xff]  }
 0x50a   :  { %6669 = vst [vmem:[#allocation21_spill] sm:$0xff] %v5659_v34  ;;  %v5661_v35 = vpack.c.bf16 %v1120_v25, %v1120_v25  ;;  %v4577_v25 = vld [vmem:[%s6637_s13 + $0x4c0] ss:$100 sps:$4 sm:$0xff]  }
 0x50c   :  { %2504 = vmatmul.mubr.bf16.vlgmr.msra.gmra.mrb[16].mxu1 %v5661_v35  ;;  %2545 = vmatmul.mubr.bf16.vlgmr.msra.gmra.mrb[16].mxu0 %v5661_v35 }
 0x50d   :  { %2554 = vmatpush1.bf16.msra.mxu1 %v4541_v30  ;;  %2595 = vmatpush1.bf16.msra.mxu0 %v4544_v31  ;;  %v4585_v30 = vld [vmem:[%s6637_s13 + $0x58c] ss:$100 sps:$4 sm:$0xff]   ;;  %v4588_v31 = vld [vmem:[%s6637_s13 + $0x594] ss:$100 sps:$4 sm:$0xff]  }
 0x50e   :  { %2555 = vmatprep.subr.bf16.mxu1 %v4549_v37  ;;  %2596 = vmatprep.subr.bf16.mxu0 %v4552_v39  ;;  %v4583_v37 = vld [vmem:[%s6637_s13 + $0x588] ss:$100 sps:$4 sm:$0xff]   ;;  %v4586_v39 = vld [vmem:[%s6637_s13 + $0x590] ss:$100 sps:$4 sm:$0xff]  }
 0x50f   :  { %2585 = vmatprep.mubr.bf16.mxu1 %v5010_v60  ;;  %2626 = vmatprep.mubr.bf16.mxu0 %v5010_v60 }
 0x511   :  { %2556 = vmatpush1.bf16.msra.mxu1 %v4547_v46  ;;  %2597 = vmatpush1.bf16.msra.mxu0 %v4550_v50  ;;  %v4591_v46 = vld [vmem:[%s6637_s13 + $0x24] ss:$100 sps:$4 sm:$0xff]   ;;  %v4594_v50 = vld [vmem:[%s6637_s13 + $0x2c] ss:$100 sps:$4 sm:$0xff]  }
 0x512   :  { %2557 = vmatprep.subr.bf16.mxu1 %v4555_v51  ;;  %2598 = vmatprep.subr.bf16.mxu0 %v4558_v52  ;;  %v4589_v51 = vld [vmem:[%s6637_s13 + $0x20] ss:$100 sps:$4 sm:$0xff]   ;;  %v4592_v52 = vld [vmem:[%s6637_s13 + $0x28] ss:$100 sps:$4 sm:$0xff]  }
 0x515   :  { %2558 = vmatpush1.bf16.msra.mxu1 %v4553_v54  ;;  %2599 = vmatpush1.bf16.msra.mxu0 %v4556_v55  ;;  %v4597_v54 = vld [vmem:[%s6637_s13 + $0xec] ss:$100 sps:$4 sm:$0xff]   ;;  %v4600_v55 = vld [vmem:[%s6637_s13 + $0xf4] ss:$100 sps:$4 sm:$0xff]  }
 0x516   :  { %2559 = vmatprep.subr.bf16.mxu1 %v4561_v56  ;;  %2600 = vmatprep.subr.bf16.mxu0 %v4564_v57  ;;  %v4595_v56 = vld [vmem:[%s6637_s13 + $0xe8] ss:$100 sps:$4 sm:$0xff]   ;;  %v4598_v57 = vld [vmem:[%s6637_s13 + $0xf0] ss:$100 sps:$4 sm:$0xff]  }
 0x519   :  { %2560 = vmatpush1.bf16.msra.mxu1 %v4559_v59  ;;  %2601 = vmatpush1.bf16.msra.mxu0 %v4562_v63  ;;  %v4603_v59 = vld [vmem:[%s6637_s13 + $0x1b4] ss:$100 sps:$4 sm:$0xff]   ;;  %v4606_v63 = vld [vmem:[%s6637_s13 + $0x1bc] ss:$100 sps:$4 sm:$0xff]  }
 0x51a   :  { %2561 = vmatprep.subr.bf16.mxu1 %v4567_v0  ;;  %2602 = vmatprep.subr.bf16.mxu0 %v4570_v1  ;;  %v4601_v0 = vld [vmem:[%s6637_s13 + $0x1b0] ss:$100 sps:$4 sm:$0xff]   ;;  %v4604_v1 = vld [vmem:[%s6637_s13 + $0x1b8] ss:$100 sps:$4 sm:$0xff]  }
 0x51d   :  { %2562 = vmatpush1.bf16.msra.mxu1 %v4565_v3  ;;  %2603 = vmatpush1.bf16.msra.mxu0 %v4568_v9  ;;  %v4609_v3 = vld [vmem:[%s6637_s13 + $0x27c] ss:$100 sps:$4 sm:$0xff]   ;;  %v4612_v9 = vld [vmem:[%s6637_s13 + $0x284] ss:$100 sps:$4 sm:$0xff]  }
 0x51e   :  { %2563 = vmatprep.subr.bf16.mxu1 %v4573_v11  ;;  %2604 = vmatprep.subr.bf16.mxu0 %v4576_v18  ;;  %v4607_v11 = vld [vmem:[%s6637_s13 + $0x278] ss:$100 sps:$4 sm:$0xff]   ;;  %v4610_v18 = vld [vmem:[%s6637_s13 + $0x280] ss:$100 sps:$4 sm:$0xff]  }
 0x521   :  { %2564 = vmatpush1.bf16.msra.mxu1 %v4571_v21  ;;  %2605 = vmatpush1.bf16.msra.mxu0 %v4574_v22  ;;  %v4615_v21 = vld [vmem:[%s6637_s13 + $0x344] ss:$100 sps:$4 sm:$0xff]   ;;  %v4618_v22 = vld [vmem:[%s6637_s13 + $0x34c] ss:$100 sps:$4 sm:$0xff]  }
 0x522   :  { %2565 = vmatprep.subr.bf16.mxu1 %v4579_v23  ;;  %2606 = vmatprep.subr.bf16.mxu0 %v4582_v24  ;;  %v4613_v24 = vld [vmem:[%s6637_s13 + $0x340] ss:$100 sps:$4 sm:$0xff]  }
 0x525   :  { %2566 = vmatpush1.bf16.msra.mxu1 %v4577_v25  ;;  %2607 = vmatpush1.bf16.msra.mxu0 %v4580_v27  ;;  %v4616_v25 = vld [vmem:[%s6637_s13 + $0x348] ss:$100 sps:$4 sm:$0xff]  }
 0x526   :  { %2567 = vmatprep.subr.bf16.mxu1 %v4585_v30  ;;  %2608 = vmatprep.subr.bf16.mxu0 %v4588_v31  ;;  %v4621_v30 = vld [vmem:[%s6637_s13 + $0x40c] ss:$100 sps:$4 sm:$0xff]   ;;  %v4624_v31 = vld [vmem:[%s6637_s13 + $0x414] ss:$100 sps:$4 sm:$0xff]  }
 0x529   :  { %2568 = vmatpush1.bf16.msra.mxu1 %v4583_v37  ;;  %2609 = vmatpush1.bf16.msra.mxu0 %v4586_v39  ;;  %v4619_v39 = vld [vmem:[%s6637_s13 + $0x408] ss:$100 sps:$4 sm:$0xff]  }
 0x52a   :  { %2635 = vmatprep.subr.bf16.mxu1 %v4591_v46  ;;  %2676 = vmatprep.subr.bf16.mxu0 %v4594_v50  ;;  %v4627_v46 = vld [vmem:[%s6637_s13 + $0x4d4] ss:$100 sps:$4 sm:$0xff]   ;;  %v4630_v50 = vld [vmem:[%s6637_s13 + $0x4dc] ss:$100 sps:$4 sm:$0xff]  }
 0x52c   :  { %2586 = vmatmul.mubr.bf16.vlgmr.msra.gmra.mrb[20].mxu1 %v5661_v35  ;;  %2627 = vmatmul.mubr.bf16.vlgmr.msra.gmra.mrb[20].mxu0 %v5661_v35 }
 0x52d   :  { %2636 = vmatpush1.bf16.msra.mxu1 %v4589_v51  ;;  %2677 = vmatpush1.bf16.msra.mxu0 %v4592_v52  ;;  %v4625_v51 = vld [vmem:[%s6637_s13 + $0x4d0] ss:$100 sps:$4 sm:$0xff]   ;;  %v4628_v52 = vld [vmem:[%s6637_s13 + $0x4d8] ss:$100 sps:$4 sm:$0xff]  }
 0x52e   :  { %2637 = vmatprep.subr.bf16.mxu1 %v4597_v54  ;;  %2678 = vmatprep.subr.bf16.mxu0 %v4600_v55  ;;  %v4633_v54 = vld [vmem:[%s6637_s13 + $0x59c] ss:$100 sps:$4 sm:$0xff]   ;;  %v4636_v55 = vld [vmem:[%s6637_s13 + $0x5a4] ss:$100 sps:$4 sm:$0xff]  }
 0x52f   :  { %2667 = vmatprep.mubr.bf16.mxu1 %v5010_v60  ;;  %2708 = vmatprep.mubr.bf16.mxu0 %v5010_v60 }
 0x531   :  { %2638 = vmatpush1.bf16.msra.mxu1 %v4595_v56  ;;  %2679 = vmatpush1.bf16.msra.mxu0 %v4598_v57  ;;  %v4631_v56 = vld [vmem:[%s6637_s13 + $0x598] ss:$100 sps:$4 sm:$0xff]   ;;  %v4634_v57 = vld [vmem:[%s6637_s13 + $0x5a0] ss:$100 sps:$4 sm:$0xff]  }
 0x532   :  { %2639 = vmatprep.subr.bf16.mxu1 %v4603_v59  ;;  %2680 = vmatprep.subr.bf16.mxu0 %v4606_v63  ;;  %v4639_v59 = vld [vmem:[%s6637_s13 + $0x34] ss:$100 sps:$4 sm:$0xff]   ;;  %v4642_v63 = vld [vmem:[%s6637_s13 + $0x3c] ss:$100 sps:$4 sm:$0xff]  }
 0x535   :  { %2640 = vmatpush1.bf16.msra.mxu1 %v4601_v0  ;;  %2681 = vmatpush1.bf16.msra.mxu0 %v4604_v1  ;;  %v4637_v1 = vld [vmem:[%s6637_s13 + $0x30] ss:$100 sps:$4 sm:$0xff]  }
 0x536   :  { %2641 = vmatprep.subr.bf16.mxu1 %v4609_v3  ;;  %2682 = vmatprep.subr.bf16.mxu0 %v4612_v9  ;;  %v4640_v3 = vld [vmem:[%s6637_s13 + $0x38] ss:$100 sps:$4 sm:$0xff]  }
 0x537   :  { %v4645_v9 = vld [vmem:[%s6637_s13 + $0xfc] ss:$100 sps:$4 sm:$0xff]  }
 0x539   :  { %2642 = vmatpush1.bf16.msra.mxu1 %v4607_v11  ;;  %2683 = vmatpush1.bf16.msra.mxu0 %v4610_v18  ;;  %v871_v23 = vpop.xlane.xlu1 %870  ;;  %v4648_v11 = vld [vmem:[%s6637_s13 + $0x104] ss:$100 sps:$4 sm:$0xff]   ;;  %v4643_v18 = vld [vmem:[%s6637_s13 + $0xf8] ss:$100 sps:$4 sm:$0xff]  }
 0x53a   :  { %v5816_v27 = vsub.f32 %v5612_v2, %v871_v23  ;;  %2643 = vmatprep.subr.bf16.mxu1 %v4615_v21  ;;  %2684 = vmatprep.subr.bf16.mxu0 %v4618_v22  ;;  %v4622_v2 = vld [vmem:[%s6637_s13 + $0x410] ss:$100 sps:$4 sm:$0xff]   ;;  %v4646_v21 = vld [vmem:[%s6637_s13 + $0x100] ss:$100 sps:$4 sm:$0xff]  }
 0x53b   :  { %v4651_v22 = vld [vmem:[%s6637_s13 + $0x1c4] ss:$100 sps:$4 sm:$0xff]   ;;  %v4654_v23 = vld [vmem:[%s6637_s13 + $0x1cc] ss:$100 sps:$4 sm:$0xff]  }
 0x53c   :  { %6670 = vst [vmem:[#allocation22_spill] sm:$0xff] %v5816_v27  ;;  %v873_v37 = vmul.f32 1.442695, %v5816_v27 }
 0x53d   :  { %2644 = vmatpush1.bf16.msra.mxu1 %v4613_v24  ;;  %2685 = vmatpush1.bf16.msra.mxu0 %v4616_v25  ;;  %v4649_v24 = vld [vmem:[%s6637_s13 + $0x1c0] ss:$100 sps:$4 sm:$0xff]   ;;  %v4652_v25 = vld [vmem:[%s6637_s13 + $0x1c8] ss:$100 sps:$4 sm:$0xff]  }
 0x53e   :  { %4799 = vpow2.f32 %v873_v37  ;;  %2645 = vmatprep.subr.bf16.mxu1 %v4621_v30  ;;  %2686 = vmatprep.subr.bf16.mxu0 %v4624_v31  ;;  %v4657_v30 = vld [vmem:[%s6637_s13 + $0x28c] ss:$100 sps:$4 sm:$0xff]   ;;  %v4660_v31 = vld [vmem:[%s6637_s13 + $0x294] ss:$100 sps:$4 sm:$0xff]  }
 0x53f   :  { %v4655_v37 = vld [vmem:[%s6637_s13 + $0x288] ss:$100 sps:$4 sm:$0xff]  }
 0x541   :  { %2646 = vmatpush1.bf16.msra.mxu1 %v4619_v39  ;;  %2687 = vmatpush1.bf16.msra.mxu0 %v4622_v2  ;;  %v4658_v39 = vld [vmem:[%s6637_s13 + $0x290] ss:$100 sps:$4 sm:$0xff]  }
 0x542   :  { %2647 = vmatprep.subr.bf16.mxu1 %v4627_v46  ;;  %2688 = vmatprep.subr.bf16.mxu0 %v4630_v50  ;;  %v4663_v2 = vld [vmem:[%s6637_s13 + $0x354] ss:$100 sps:$4 sm:$0xff]   ;;  %v4666_v46 = vld [vmem:[%s6637_s13 + $0x35c] ss:$100 sps:$4 sm:$0xff]  }
 0x543   :  { %v4661_v50 = vld [vmem:[%s6637_s13 + $0x350] ss:$100 sps:$4 sm:$0xff]  }
 0x545   :  { %2648 = vmatpush1.bf16.msra.mxu1 %v4625_v51  ;;  %2689 = vmatpush1.bf16.msra.mxu0 %v4628_v52  ;;  %v4664_v51 = vld [vmem:[%s6637_s13 + $0x358] ss:$100 sps:$4 sm:$0xff]  }
 0x546   :  { %2649 = vmatprep.subr.bf16.mxu1 %v4633_v54  ;;  %2690 = vmatprep.subr.bf16.mxu0 %v4636_v55  ;;  %v4669_v52 = vld [vmem:[%s6637_s13 + $0x41c] ss:$100 sps:$4 sm:$0xff]   ;;  %v4672_v54 = vld [vmem:[%s6637_s13 + $0x424] ss:$100 sps:$4 sm:$0xff]  }
 0x547   :  { %v4667_v55 = vld [vmem:[%s6637_s13 + $0x418] ss:$100 sps:$4 sm:$0xff]  }
 0x548   :  { %v4800_v0 = vpop.eup %4799 }
 0x549   :  { %2650 = vmatpush1.bf16.msra.mxu1 %v4631_v56  ;;  %2691 = vmatpush1.bf16.msra.mxu0 %v4634_v57  ;;  %v4670_v56 = vld [vmem:[%s6637_s13 + $0x420] ss:$100 sps:$4 sm:$0xff]  }
 0x54a   :  { %876 = vrot.lane.b32.xlu0 %v4800_v0, %s5007_s1  ;;  %2717 = vmatprep.subr.bf16.mxu1 %v4639_v59  ;;  %v4675_v57 = vld [vmem:[%s6637_s13 + $0x4e4] ss:$100 sps:$4 sm:$0xff]   ;;  %v4678_v59 = vld [vmem:[%s6637_s13 + $0x4ec] ss:$100 sps:$4 sm:$0xff]  }
 0x54b   :  { %2758 = vmatprep.subr.bf16.mxu0 %v4642_v63  ;;  %v4673_v63 = vld [vmem:[%s6637_s13 + $0x4e0] ss:$100 sps:$4 sm:$0xff]   ;;  %v4676_v0 = vld [vmem:[%s6637_s13 + $0x4e8] ss:$100 sps:$4 sm:$0xff]  }
 0x54c   :  { %2668 = vmatmul.mubr.bf16.vlgmr.msra.gmra.mrb[24].mxu1 %v5661_v35  ;;  %2709 = vmatmul.mubr.bf16.vlgmr.msra.gmra.mrb[24].mxu0 %v5661_v35 }
 0x54d   :  { %2718 = vmatpush1.bf16.msra.mxu1 %v4637_v1  ;;  %2759 = vmatpush1.bf16.msra.mxu0 %v4640_v3  ;;  %v4681_v1 = vld [vmem:[%s6637_s13 + $0x5ac] ss:$100 sps:$4 sm:$0xff]   ;;  %v4684_v3 = vld [vmem:[%s6637_s13 + $0x5b4] ss:$100 sps:$4 sm:$0xff]  }
 0x54e   :  { %2719 = vmatprep.subr.bf16.mxu1 %v4645_v9  ;;  %2760 = vmatprep.subr.bf16.mxu0 %v4648_v11  ;;  %v4679_v9 = vld [vmem:[%s6637_s13 + $0x5a8] ss:$100 sps:$4 sm:$0xff]   ;;  %v4682_v11 = vld [vmem:[%s6637_s13 + $0x5b0] ss:$100 sps:$4 sm:$0xff]  }
 0x54f   :  { %2749 = vmatprep.mubr.bf16.mxu1 %v5010_v60  ;;  %2790 = vmatprep.mubr.bf16.mxu0 %v5010_v60 }
 0x551   :  { %2720 = vmatpush1.bf16.msra.mxu1 %v4643_v18  ;;  %2761 = vmatpush1.bf16.msra.mxu0 %v4646_v21  ;;  %v4687_v18 = vld [vmem:[%s6637_s13 + $0x44] ss:$100 sps:$4 sm:$0xff]   ;;  %v4690_v21 = vld [vmem:[%s6637_s13 + $0x4c] ss:$100 sps:$4 sm:$0xff]  }
 0x552   :  { %2721 = vmatprep.subr.bf16.mxu1 %v4651_v22  ;;  %2762 = vmatprep.subr.bf16.mxu0 %v4654_v23  ;;  %v4685_v22 = vld [vmem:[%s6637_s13 + $0x40] ss:$100 sps:$4 sm:$0xff]   ;;  %v4688_v23 = vld [vmem:[%s6637_s13 + $0x48] ss:$100 sps:$4 sm:$0xff]  }
 0x555   :  { %2722 = vmatpush1.bf16.msra.mxu1 %v4649_v24  ;;  %2763 = vmatpush1.bf16.msra.mxu0 %v4652_v25  ;;  %v4693_v24 = vld [vmem:[%s6637_s13 + $0x10c] ss:$100 sps:$4 sm:$0xff]   ;;  %v4696_v25 = vld [vmem:[%s6637_s13 + $0x114] ss:$100 sps:$4 sm:$0xff]  }
 0x556   :  { %2723 = vmatprep.subr.bf16.mxu1 %v4657_v30  ;;  %2764 = vmatprep.subr.bf16.mxu0 %v4660_v31  ;;  %v4691_v30 = vld [vmem:[%s6637_s13 + $0x108] ss:$100 sps:$4 sm:$0xff]   ;;  %v4694_v31 = vld [vmem:[%s6637_s13 + $0x110] ss:$100 sps:$4 sm:$0xff]  }
 0x559   :  { %2724 = vmatpush1.bf16.msra.mxu1 %v4655_v37  ;;  %2765 = vmatpush1.bf16.msra.mxu0 %v4658_v39  ;;  %v4699_v37 = vld [vmem:[%s6637_s13 + $0x1d4] ss:$100 sps:$4 sm:$0xff]   ;;  %v4702_v39 = vld [vmem:[%s6637_s13 + $0x1dc] ss:$100 sps:$4 sm:$0xff]  }
 0x55a   :  { %2725 = vmatprep.subr.bf16.mxu1 %v4663_v2  ;;  %2766 = vmatprep.subr.bf16.mxu0 %v4666_v46  ;;  %v4697_v2 = vld [vmem:[%s6637_s13 + $0x1d0] ss:$100 sps:$4 sm:$0xff]   ;;  %v4700_v46 = vld [vmem:[%s6637_s13 + $0x1d8] ss:$100 sps:$4 sm:$0xff]  }
 0x55d   :  { %2726 = vmatpush1.bf16.msra.mxu1 %v4661_v50  ;;  %2767 = vmatpush1.bf16.msra.mxu0 %v4664_v51  ;;  %v4705_v50 = vld [vmem:[%s6637_s13 + $0x29c] ss:$100 sps:$4 sm:$0xff]   ;;  %v4708_v51 = vld [vmem:[%s6637_s13 + $0x2a4] ss:$100 sps:$4 sm:$0xff]  }
 0x55e   :  { %2727 = vmatprep.subr.bf16.mxu1 %v4669_v52  ;;  %2768 = vmatprep.subr.bf16.mxu0 %v4672_v54  ;;  %v4703_v52 = vld [vmem:[%s6637_s13 + $0x298] ss:$100 sps:$4 sm:$0xff]   ;;  %v4706_v54 = vld [vmem:[%s6637_s13 + $0x2a0] ss:$100 sps:$4 sm:$0xff]  }
 0x561   :  { %2728 = vmatpush1.bf16.msra.mxu1 %v4667_v55  ;;  %2769 = vmatpush1.bf16.msra.mxu0 %v4670_v56  ;;  %v4711_v55 = vld [vmem:[%s6637_s13 + $0x364] ss:$100 sps:$4 sm:$0xff]   ;;  %v4714_v56 = vld [vmem:[%s6637_s13 + $0x36c] ss:$100 sps:$4 sm:$0xff]  }
 0x562   :  { %2729 = vmatprep.subr.bf16.mxu1 %v4675_v57  ;;  %2770 = vmatprep.subr.bf16.mxu0 %v4678_v59  ;;  %v4709_v57 = vld [vmem:[%s6637_s13 + $0x360] ss:$100 sps:$4 sm:$0xff]   ;;  %v4712_v59 = vld [vmem:[%s6637_s13 + $0x368] ss:$100 sps:$4 sm:$0xff]  }
 0x565   :  { %2730 = vmatpush1.bf16.msra.mxu1 %v4673_v63  ;;  %2771 = vmatpush1.bf16.msra.mxu0 %v4676_v0  ;;  %v4717_v63 = vld [vmem:[%s6637_s13 + $0x42c] ss:$100 sps:$4 sm:$0xff]   ;;  %v4720_v0 = vld [vmem:[%s6637_s13 + $0x434] ss:$100 sps:$4 sm:$0xff]  }
 0x566   :  { %2731 = vmatprep.subr.bf16.mxu1 %v4681_v1  ;;  %2772 = vmatprep.subr.bf16.mxu0 %v4684_v3  ;;  %v4715_v1 = vld [vmem:[%s6637_s13 + $0x428] ss:$100 sps:$4 sm:$0xff]   ;;  %v4718_v3 = vld [vmem:[%s6637_s13 + $0x430] ss:$100 sps:$4 sm:$0xff]  }
 0x569   :  { %2732 = vmatpush1.bf16.msra.mxu1 %v4679_v9  ;;  %2773 = vmatpush1.bf16.msra.mxu0 %v4682_v11  ;;  %v4723_v9 = vld [vmem:[%s6637_s13 + $0x4f4] ss:$100 sps:$4 sm:$0xff]   ;;  %v4726_v11 = vld [vmem:[%s6637_s13 + $0x4fc] ss:$100 sps:$4 sm:$0xff]  }
 0x56a   :  { %2799 = vmatprep.subr.bf16.mxu1 %v4687_v18  ;;  %2840 = vmatprep.subr.bf16.mxu0 %v4690_v21  ;;  %v4721_v18 = vld [vmem:[%s6637_s13 + $0x4f0] ss:$100 sps:$4 sm:$0xff]   ;;  %v4724_v21 = vld [vmem:[%s6637_s13 + $0x4f8] ss:$100 sps:$4 sm:$0xff]  }
 0x56c   :  { %2750 = vmatmul.mubr.bf16.vlgmr.msra.gmra.mrb[28].mxu1 %v5661_v35  ;;  %2791 = vmatmul.mubr.bf16.vlgmr.msra.gmra.mrb[28].mxu0 %v5661_v35 }
 0x56d   :  { %2800 = vmatpush1.bf16.msra.mxu1 %v4685_v22  ;;  %2841 = vmatpush1.bf16.msra.mxu0 %v4688_v23  ;;  %v4729_v22 = vld [vmem:[%s6637_s13 + $0x5bc] ss:$100 sps:$4 sm:$0xff]   ;;  %v4732_v23 = vld [vmem:[%s6637_s13 + $0x5c4] ss:$100 sps:$4 sm:$0xff]  }
 0x56e   :  { %2801 = vmatprep.subr.bf16.mxu1 %v4693_v24  ;;  %2842 = vmatprep.subr.bf16.mxu0 %v4696_v25  ;;  %v4727_v24 = vld [vmem:[%s6637_s13 + $0x5b8] ss:$100 sps:$4 sm:$0xff]   ;;  %v4730_v25 = vld [vmem:[%s6637_s13 + $0x5c0] ss:$100 sps:$4 sm:$0xff]  }
 0x56f   :  { %2831 = vmatprep.mubr.bf16.mxu1 %v5010_v60  ;;  %2872 = vmatprep.mubr.bf16.mxu0 %v5010_v60 }
 0x571   :  { %2802 = vmatpush1.bf16.msra.mxu1 %v4691_v30  ;;  %2843 = vmatpush1.bf16.msra.mxu0 %v4694_v31  ;;  %v4735_v30 = vld [vmem:[%s6637_s13 + $0x54] ss:$100 sps:$4 sm:$0xff]   ;;  %v4738_v31 = vld [vmem:[%s6637_s13 + $0x5c] ss:$100 sps:$4 sm:$0xff]  }
 0x572   :  { %2803 = vmatprep.subr.bf16.mxu1 %v4699_v37  ;;  %2844 = vmatprep.subr.bf16.mxu0 %v4702_v39  ;;  %v4733_v37 = vld [vmem:[%s6637_s13 + $0x50] ss:$100 sps:$4 sm:$0xff]   ;;  %v4736_v39 = vld [vmem:[%s6637_s13 + $0x58] ss:$100 sps:$4 sm:$0xff]  }
 0x575   :  { %2804 = vmatpush1.bf16.msra.mxu1 %v4697_v2  ;;  %2845 = vmatpush1.bf16.msra.mxu0 %v4700_v46  ;;  %v4741_v2 = vld [vmem:[%s6637_s13 + $0x11c] ss:$100 sps:$4 sm:$0xff]   ;;  %v4744_v46 = vld [vmem:[%s6637_s13 + $0x124] ss:$100 sps:$4 sm:$0xff]  }
 0x576   :  { %2805 = vmatprep.subr.bf16.mxu1 %v4705_v50  ;;  %2846 = vmatprep.subr.bf16.mxu0 %v4708_v51  ;;  %v4739_v50 = vld [vmem:[%s6637_s13 + $0x118] ss:$100 sps:$4 sm:$0xff]   ;;  %v4742_v51 = vld [vmem:[%s6637_s13 + $0x120] ss:$100 sps:$4 sm:$0xff]  }
 0x579   :  { %2806 = vmatpush1.bf16.msra.mxu1 %v4703_v52  ;;  %2847 = vmatpush1.bf16.msra.mxu0 %v4706_v54  ;;  %v4747_v52 = vld [vmem:[%s6637_s13 + $0x1e4] ss:$100 sps:$4 sm:$0xff]   ;;  %v4750_v54 = vld [vmem:[%s6637_s13 + $0x1ec] ss:$100 sps:$4 sm:$0xff]  }
 0x57a   :  { %2807 = vmatprep.subr.bf16.mxu1 %v4711_v55  ;;  %2848 = vmatprep.subr.bf16.mxu0 %v4714_v56  ;;  %v4745_v55 = vld [vmem:[%s6637_s13 + $0x1e0] ss:$100 sps:$4 sm:$0xff]   ;;  %v4748_v56 = vld [vmem:[%s6637_s13 + $0x1e8] ss:$100 sps:$4 sm:$0xff]  }
 0x57d   :  { %2808 = vmatpush1.bf16.msra.mxu1 %v4709_v57  ;;  %2849 = vmatpush1.bf16.msra.mxu0 %v4712_v59  ;;  %v4753_v57 = vld [vmem:[%s6637_s13 + $0x2ac] ss:$100 sps:$4 sm:$0xff]  }
 0x57e   :  { %2809 = vmatprep.subr.bf16.mxu1 %v4717_v63  ;;  %2850 = vmatprep.subr.bf16.mxu0 %v4720_v0  ;;  %v4751_v59 = vld [vmem:[%s6637_s13 + $0x2a8] ss:$100 sps:$4 sm:$0xff]   ;;  %v4754_v63 = vld [vmem:[%s6637_s13 + $0x2b0] ss:$100 sps:$4 sm:$0xff]  }
 0x57f   :  { %v4759_v0 = vld [vmem:[%s6637_s13 + $0x374] ss:$100 sps:$4 sm:$0xff]  }
 0x581   :  { %2810 = vmatpush1.bf16.msra.mxu1 %v4715_v1  ;;  %2851 = vmatpush1.bf16.msra.mxu0 %v4718_v3  ;;  %v4762_v1 = vld [vmem:[%s6637_s13 + $0x37c] ss:$100 sps:$4 sm:$0xff]   ;;  %v4757_v3 = vld [vmem:[%s6637_s13 + $0x370] ss:$100 sps:$4 sm:$0xff]  }
 0x582   :  { %2811 = vmatprep.subr.bf16.mxu1 %v4723_v9  ;;  %2852 = vmatprep.subr.bf16.mxu0 %v4726_v11  ;;  %v4760_v9 = vld [vmem:[%s6637_s13 + $0x378] ss:$100 sps:$4 sm:$0xff]  }
 0x583   :  { %v4765_v11 = vld [vmem:[%s6637_s13 + $0x43c] ss:$100 sps:$4 sm:$0xff]  }
 0x585   :  { %2812 = vmatpush1.bf16.msra.mxu1 %v4721_v18  ;;  %2853 = vmatpush1.bf16.msra.mxu0 %v4724_v21  ;;  %v4768_v18 = vld [vmem:[%s6637_s13 + $0x444] ss:$100 sps:$4 sm:$0xff]   ;;  %v4763_v21 = vld [vmem:[%s6637_s13 + $0x438] ss:$100 sps:$4 sm:$0xff]  }
 0x586   :  { %2813 = vmatprep.subr.bf16.mxu1 %v4729_v22  ;;  %2854 = vmatprep.subr.bf16.mxu0 %v4732_v23  ;;  %v4766_v22 = vld [vmem:[%s6637_s13 + $0x440] ss:$100 sps:$4 sm:$0xff]  }
 0x587   :  { %v4771_v23 = vld [vmem:[%s6637_s13 + $0x504] ss:$100 sps:$4 sm:$0xff]  }
 0x589   :  { %2814 = vmatpush1.bf16.msra.mxu1 %v4727_v24  ;;  %2855 = vmatpush1.bf16.msra.mxu0 %v4730_v25  ;;  %v4774_v24 = vld [vmem:[%s6637_s13 + $0x50c] ss:$100 sps:$4 sm:$0xff]   ;;  %v4769_v25 = vld [vmem:[%s6637_s13 + $0x500] ss:$100 sps:$4 sm:$0xff]  }
 0x58a   :  { %2881 = vmatprep.subr.bf16.mxu1 %v4735_v30  ;;  %2922 = vmatprep.subr.bf16.mxu0 %v4738_v31  ;;  %v4772_v30 = vld [vmem:[%s6637_s13 + $0x508] ss:$100 sps:$4 sm:$0xff]  }
 0x58b   :  { %v4777_v31 = vld [vmem:[%s6637_s13 + $0x5cc] ss:$100 sps:$4 sm:$0xff]  }
 0x58c   :  { %2832 = vmatmul.mubr.bf16.vlgmr.msra.gmra.mrb[32].mxu1 %v5661_v35  ;;  %2873 = vmatmul.mubr.bf16.vlgmr.msra.gmra.mrb[32].mxu0 %v5661_v35 }
 0x58d   :  { %2882 = vmatpush1.bf16.msra.mxu1 %v4733_v37  ;;  %2923 = vmatpush1.bf16.msra.mxu0 %v4736_v39  ;;  %v4780_v37 = vld [vmem:[%s6637_s13 + $0x5d4] ss:$100 sps:$4 sm:$0xff]   ;;  %v4775_v39 = vld [vmem:[%s6637_s13 + $0x5c8] ss:$100 sps:$4 sm:$0xff]  }
 0x58e   :  { %2883 = vmatprep.subr.bf16.mxu1 %v4741_v2  ;;  %2924 = vmatprep.subr.bf16.mxu0 %v4744_v46  ;;  %v4778_v2 = vld [vmem:[%s6637_s13 + $0x5d0] ss:$100 sps:$4 sm:$0xff]   ;;  %v4781_v46 = vld [vmem:[%s6637_s13 + $0x60] ss:$100 sps:$4 sm:$0xff]  }
 0x58f   :  { %2913 = vmatprep.mubr.bf16.mxu1 %v5010_v60  ;;  %2954 = vmatprep.mubr.bf16.mxu0 %v5010_v60  ;;  %v4756_v60 = vld [vmem:[%s6637_s13 + $0x2b4] ss:$100 sps:$4 sm:$0xff]  }
 0x591   :  { %2884 = vmatpush1.bf16.msra.mxu1 %v4739_v50  ;;  %2925 = vmatpush1.bf16.msra.mxu0 %v4742_v51  ;;  %v4782_v50 = vld [vmem:[%s6637_s13 + $0x128] ss:$100 sps:$4 sm:$0xff]   ;;  %v4783_v51 = vld [vmem:[%s6637_s13 + $0x1f0] ss:$100 sps:$4 sm:$0xff]  }
 0x592   :  { %2885 = vmatprep.subr.bf16.mxu1 %v4747_v52  ;;  %2926 = vmatprep.subr.bf16.mxu0 %v4750_v54  ;;  %v4784_v52 = vld [vmem:[%s6637_s13 + $0x2b8] ss:$100 sps:$4 sm:$0xff]   ;;  %v4785_v54 = vld [vmem:[%s6637_s13 + $0x380] ss:$100 sps:$4 sm:$0xff]  }
 0x595   :  { %2886 = vmatpush1.bf16.msra.mxu1 %v4745_v55  ;;  %2927 = vmatpush1.bf16.msra.mxu0 %v4748_v56 }
 0x596   :  { %2887 = vmatprep.subr.bf16.mxu1 %v4753_v57  ;;  %2928 = vmatprep.subr.bf16.mxu0 %v4756_v60  ;;  %v4786_v57 = vld [vmem:[%s6637_s13 + $0x448] ss:$100 sps:$4 sm:$0xff]   ;;  %v4787_v60 = vld [vmem:[%s6637_s13 + $0x510] ss:$100 sps:$4 sm:$0xff]  }
 0x599   :  { %2888 = vmatpush1.bf16.msra.mxu1 %v4751_v59  ;;  %2929 = vmatpush1.bf16.msra.mxu0 %v4754_v63  ;;  %v4788_v59 = vld [vmem:[%s6637_s13 + $0x5d8] ss:$100 sps:$4 sm:$0xff]   ;;  %v6195_v63 = vsub.s32 0, %v5196_v32 }
 0x59a   :  { %2889 = vmatprep.subr.bf16.mxu1 %v4759_v0  ;;  %2930 = vmatprep.subr.bf16.mxu0 %v4762_v1  ;;  %v6198_v0 = vsub.s32 2, %v5196_v32  ;;  %v6203_v1 = vld [vmem:[%s6638_s14] sm:$0xff] }
 0x59d   :  { %2890 = vmatpush1.bf16.msra.mxu1 %v4757_v3  ;;  %2931 = vmatpush1.bf16.msra.mxu0 %v4760_v9  ;;  %v6206_v3 = vsub.s32 1, %v5196_v32  ;;  %v6209_v9 = vsub.s32 3, %v5196_v32 }
 0x59e   :  { %2891 = vmatprep.subr.bf16.mxu1 %v4765_v11  ;;  %2932 = vmatprep.subr.bf16.mxu0 %v4768_v18 }
 0x59f   :  { %v1345_v11 = vrot.slane %v6203_v1, %v6206_v3  ;;  %v1353_v18 = vrot.slane %v6203_v1, %v6209_v9 }
 0x5a1   :  { %2892 = vmatpush1.bf16.msra.mxu1 %v4763_v21  ;;  %2933 = vmatpush1.bf16.msra.mxu0 %v4766_v22 }
 0x5a2   :  { %2893 = vmatprep.subr.bf16.mxu1 %v4771_v23  ;;  %2934 = vmatprep.subr.bf16.mxu0 %v4774_v24 }
 0x5a5   :  { %2894 = vmatpush1.bf16.msra.mxu1 %v4769_v25  ;;  %2935 = vmatpush1.bf16.msra.mxu0 %v4772_v30 }
 0x5a6   :  { %2895 = vmatprep.subr.bf16.mxu1 %v4777_v31  ;;  %2936 = vmatprep.subr.bf16.mxu0 %v4780_v37 }
 0x5a9   :  { %2896 = vmatpush1.bf16.msra.mxu1 %v4775_v39  ;;  %2937 = vmatpush1.bf16.msra.mxu0 %v4778_v2 }
 0x5aa   :  { %4387 = vmatprep.subr.bf16.mxu1 %v5002_v40 }
 0x5ac   :  { %2914 = vmatmul.mubr.bf16.vlgmr.msra.gmra.mrb[36].mxu1 %v5661_v35  ;;  %2955 = vmatmul.mubr.bf16.vlgmr.msra.gmra.mrb[36].mxu0 %v5661_v35 }
 0x5ad   :  { %4388 = vmatpush3.bf16.msra.mxu1 %v4781_v46  ;;  %4403 = vmatprep.mubr.msk.bf16.mxu1 %vm5003_vm0, %v5002_v40  ;;  %vm936_vm0 = vcmask 23552  }
 0x5ae   :  { %4389 = vmatprep.subr.bf16.mxu1 %v5002_v40 }
 0x5b1   :  { %4390 = vmatpush3.bf16.msra.mxu1 %v4782_v50 }
 0x5b2   :  { %4391 = vmatprep.subr.bf16.mxu1 %v5002_v40 }
 0x5b5   :  { %4392 = vmatpush3.bf16.msra.mxu1 %v4783_v51 }
 0x5b6   :  { %4393 = vmatprep.subr.bf16.mxu1 %v5002_v40 }
 0x5b9   :  { %4394 = vmatpush3.bf16.msra.mxu1 %v4784_v52 }
 0x5ba   :  { %4395 = vmatprep.subr.bf16.mxu1 %v5002_v40 }
 0x5bc   :  { %v877_v55 = vpop.permute.xlu0 %876 }
 0x5bd   :  { %4396 = vmatpush3.bf16.msra.mxu1 %v4785_v54  ;;  %v879_v56 = vsel %vm849_vm5, %v877_v55, 0.0 }
 0x5be   :  { %880 = vadd.xlane.f32.xlu0 %v879_v56  ;;  %4397 = vmatprep.subr.bf16.mxu1 %v5002_v40 }
 0x5c1   :  { %4398 = vmatpush3.bf16.msra.mxu1 %v4786_v57 }
 0x5c2   :  { %4399 = vmatprep.subr.bf16.mxu1 %v5002_v40 }
 0x5c5   :  { %4400 = vmatpush3.bf16.msra.mxu1 %v4787_v60 }
 0x5c6   :  { %4401 = vmatprep.subr.bf16.mxu1 %v5002_v40  ;;  %v1341_v40 = vrot.slane %v6203_v1, %v6195_v63 }
 0x5c9   :  { %4402 = vmatpush3.bf16.msra.mxu1 %v4788_v59 }
 0x5cc   :  { %4404 = vmatmul.mubr.bf16.vlgmr.msra.gmra.mrb[40].mxu1 %v5661_v35  ;;  %v1349_v35 = vrot.slane %v6203_v1, %v6198_v0 }
 0x5df   :  { %v2505_v21 = vpop.f32.mrb[16].mxu1  ;;  %v2546_v22 = vpop.f32.mrb[16].mxu0 }
 0x5e0   :  { %v6219_v23 = vadd.f32 %v2505_v21, %v1341_v40  ;;  %v6221_v24 = vadd.f32 %v2546_v22, %v1349_v35  ;;  %v2507_v25 = vpop.f32.mrb[17].mxu1  ;;  %v2548_v30 = vpop.f32.mrb[17].mxu0 }
 0x5e1   :  { %v6223_v31 = vadd.f32 %v2507_v25, %v1345_v11  ;;  %v6225_v37 = vadd.f32 %v2548_v30, %v1353_v18  ;;  %v2509_v39 = vpop.f32.mrb[18].mxu1  ;;  %v2550_v2 = vpop.f32.mrb[18].mxu0 }
 0x5e2   :  { %v3003_v46 = vand.u32 2147483647, %v6219_v23  ;;  %v3005_v50 = vand.u32 2147483647, %v6221_v24  ;;  %v2510_v52 = vpop.f32.mrb[19].mxu1  ;;  %v2551_v56 = vpop.f32.mrb[19].mxu0 }
 0x5e3   :  { %v3004_v51 = vand.u32 2147483647, %v6223_v31  ;;  %v3006_v60 = vand.u32 2147483647, %v6225_v37  ;;  %v6235_v52 = vsub.s32 6, %v5196_v32  ;;  %v3230_v56 = vsub.f32 0.0, %v6221_v24 }
 0x5e4   :  { %v3028_v54 = vsub.f32 0.0, %v3003_v46  ;;  %v3030_v55 = vsub.f32 0.0, %v3005_v50  ;;  %v3181_v17 = vmax.f32 %v6225_v37, 0.0 }
 0x5e5   :  { %v3029_v57 = vsub.f32 0.0, %v3004_v51  ;;  %v3031_v11 = vsub.f32 0.0, %v3006_v60  ;;  %v6232_v51 = vsub.s32 4, %v5196_v32  ;;  %v3229_v60 = vsub.f32 0.0, %v6223_v31 }
 0x5e6   :  { %v3053_v59 = vmul.f32 1.442695, %v3028_v54  ;;  %v3057_v40 = vmul.f32 1.442695, %v3030_v55  ;;  %v6238_v54 = vsub.s32 5, %v5196_v32  ;;  %v3228_v55 = vsub.f32 0.0, %v6219_v23 }
 0x5e7   :  { %v3055_v35 = vmul.f32 1.442695, %v3029_v57  ;;  %v3059_v18 = vmul.f32 1.442695, %v3031_v11  ;;  %v1357_v57 = vrot.slane %v6203_v1, %v6232_v51  ;;  %v3254_v49 = vmax.f32 %v3229_v60, 0.0 }
 0x5e8   :  { %4801 = vpow2.f32 %v3053_v59  ;;  %v3231_v59 = vsub.f32 0.0, %v6225_v37  ;;  %v1361_v11 = vrot.slane %v6203_v1, %v6238_v54 }
 0x5e9   :  { %4803 = vpow2.f32 %v3057_v40  ;;  %v6247_v40 = vsub.s32 7, %v5196_v32  ;;  %v3255_v32 = vmax.f32 %v3230_v56, 0.0 }
 0x5ea   :  { %4805 = vpow2.f32 %v3055_v35  ;;  %v1365_v35 = vrot.slane %v6203_v1, %v6235_v52 }
 0x5eb   :  { %4807 = vpow2.f32 %v3059_v18 }
 0x5f2   :  { %v4802_v21 = vpop.eup %4801 }
 0x5f3   :  { %v4804_v22 = vpop.eup %4803  ;;  %v3103_v25 = vadd.f32 1.0, %v4802_v21  ;;  %v3178_v21 = vmax.f32 %v6219_v23, 0.0  ;;  %v3256_v23 = vmax.f32 %v3231_v59, 0.0 }
 0x5f4   :  { %v4806_v30 = vpop.eup %4805  ;;  %v3105_v39 = vadd.f32 1.0, %v4804_v22  ;;  %v3253_v22 = vmax.f32 %v3228_v55, 0.0 }
 0x5f5   :  { %v4808_v2 = vpop.eup %4807  ;;  %4809 = vlog2.f32 %v3103_v25  ;;  %v3104_v46 = vadd.f32 1.0, %v4806_v30  ;;  %v3180_v25 = vmax.f32 %v6221_v24, 0.0  ;;  %v3179_v30 = vmax.f32 %v6223_v31, 0.0 }
 0x5f6   :  { %4811 = vlog2.f32 %v3105_v39  ;;  %v3106_v50 = vadd.f32 1.0, %v4808_v2  ;;  %v1369_v24 = vrot.slane %v6203_v1, %v6247_v40 }
 0x5f7   :  { %4813 = vlog2.f32 %v3104_v46 }
 0x5f8   :  { %4815 = vlog2.f32 %v3106_v50 }
 0x5ff   :  { %v4810_v18 = vpop.eup %4809  ;;  %v2587_v39 = vpop.f32.mrb[20].mxu1 }
 0x600   :  { %v2628_v2 = vpop.f32.mrb[20].mxu0  ;;  %v4812_v46 = vpop.eup %4811  ;;  %v3129_v50 = vmul.f32 0.6931472, %v4810_v18  ;;  %v6257_v12 = vadd.f32 %v2587_v39, %v1357_v57 }
 0x601   :  { %v2589_v27 = vpop.f32.mrb[21].mxu1  ;;  %v2630_v53 = vpop.f32.mrb[21].mxu0  ;;  %v3133_v28 = vmul.f32 0.6931472, %v4812_v46  ;;  %v6261_v56 = vadd.f32 %v2628_v2, %v1365_v35 }
 0x602   :  { %v4814_v19 = vpop.eup %4813  ;;  %v2591_v55 = vpop.f32.mrb[22].mxu1  ;;  %v3203_v7 = vadd.f32 %v3178_v21, %v3129_v50  ;;  %v3278_v15 = vadd.f32 %v3253_v22, %v3129_v50  ;;  %v3007_v46 = vand.u32 2147483647, %v6257_v12 }
 0x603   :  { %v2632_v31 = vpop.f32.mrb[22].mxu0  ;;  %v4816_v34 = vpop.eup %4815  ;;  %v3131_v18 = vmul.f32 0.6931472, %v4814_v19  ;;  %v3205_v39 = vadd.f32 %v3180_v25, %v3133_v28  ;;  %v3280_v26 = vadd.f32 %v3255_v32, %v3133_v28  ;;  %v6264_v25 = vadd.f32 %v2589_v27, %v1361_v11 }
 0x604   :  { %v2592_v37 = vpop.f32.mrb[23].mxu1  ;;  %v2633_v57 = vpop.f32.mrb[23].mxu0  ;;  %v3135_v6 = vmul.f32 0.6931472, %v4816_v34  ;;  %v3303_v60 = vsub.f32 0.0, %v3278_v15  ;;  %v3527_v59 = vmin.f32 %v3203_v7, 100.0 }
 0x605   :  { %v3552_v13 = vmin.f32 %v3278_v15, 100.0  ;;  %v3204_v5 = vadd.f32 %v3179_v30, %v3131_v18  ;;  %v3305_v1 = vsub.f32 0.0, %v3280_v26  ;;  %v3529_v55 = vmin.f32 %v3205_v39, 100.0 }
 0x606   :  { %v3554_v31 = vmin.f32 %v3280_v26, 100.0  ;;  %v3279_v36 = vadd.f32 %v3254_v49, %v3131_v18  ;;  %v3328_v21 = vmul.f32 1.442695, %v3303_v60  ;;  %v3206_v35 = vadd.f32 %v3181_v17, %v3135_v6 }
 0x607   :  { %v3662_v22 = vsub.f32 %v3552_v13, %v3527_v59  ;;  %v3528_v19 = vmin.f32 %v3204_v5, 100.0  ;;  %v3332_v34 = vmul.f32 1.442695, %v3305_v1  ;;  %v3281_v32 = vadd.f32 %v3256_v23, %v3135_v6 }
 0x608   :  { %v3664_v2 = vsub.f32 %v3554_v31, %v3529_v55  ;;  %v3304_v50 = vsub.f32 0.0, %v3279_v36  ;;  %v3553_v37 = vmin.f32 %v3279_v36, 100.0  ;;  %v3530_v7 = vmin.f32 %v3206_v35, 100.0 }
 0x609   :  { %v3687_v28 = vmul.f32 %v3662_v22, %v5212_v42  ;;  %4817 = vpow2.f32 %v3328_v21  ;;  %v3306_v18 = vsub.f32 0.0, %v3281_v32  ;;  %v3555_v13 = vmin.f32 %v3281_v32, 100.0 }
 0x60a   :  { %v3689_v15 = vmul.f32 %v3664_v2, %v5215_v43  ;;  %v3330_v30 = vmul.f32 1.442695, %v3304_v50  ;;  %v3663_v26 = vsub.f32 %v3553_v37, %v3528_v19  ;;  %v3032_v5 = vsub.f32 0.0, %v3007_v46 }
 0x60b   :  { %v3712_v49 = vadd.f32 %v3687_v28, %v3527_v59  ;;  %v3334_v27 = vmul.f32 1.442695, %v3306_v18  ;;  %v3665_v11 = vsub.f32 %v3555_v13, %v3530_v7  ;;  %v3009_v6 = vand.u32 2147483647, %v6261_v56 }
 0x60c   :  { %v3714_v17 = vadd.f32 %v3689_v15, %v3529_v55  ;;  %4819 = vpow2.f32 %v3330_v30  ;;  %v3688_v36 = vmul.f32 %v3663_v26, %v5219_v44  ;;  %v3061_v42 = vmul.f32 1.442695, %v3032_v5  ;;  %v6284_v30 = vld [vmem:[%s6638_s14 + $0x8] sm:$0xff] }
 0x60d   :  { %4821 = vpow2.f32 %v3332_v34  ;;  %v6270_v23 = vadd.f32 %v2630_v53, %v1369_v24  ;;  %v3690_v43 = vmul.f32 %v3665_v11, %v5223_v45  ;;  %v3008_v39 = vand.u32 2147483647, %v6264_v25 }
 0x60e   :  { %v3713_v57 = vadd.f32 %v3688_v36, %v3528_v19  ;;  %4823 = vpow2.f32 %v3334_v27  ;;  %v3034_v46 = vsub.f32 0.0, %v3009_v6  ;;  %v3738_v44 = vsel %vm3737_vm8, %v3712_v49, 0.0 }
 0x60f   :  { %4825 = vpow2.f32 %v3061_v42  ;;  %v3715_v60 = vadd.f32 %v3690_v43, %v3530_v7  ;;  %v3033_v59 = vsub.f32 0.0, %v3008_v39  ;;  %v3010_v31 = vand.u32 2147483647, %v6270_v23 }
 0x610   :  { %v3739_v1 = vsel %vm3737_vm8, %v3713_v57, 0.0  ;;  %v3065_v55 = vmul.f32 1.442695, %v3034_v46  ;;  %v3741_v35 = vsel %vm3737_vm8, %v3714_v17, 0.0  ;;  %v1373_v13 = vrot.slane %v6284_v30, %v6195_v63 }
 0x611   :  { %v3063_v21 = vmul.f32 1.442695, %v3033_v59  ;;  %v3035_v24 = vsub.f32 0.0, %v3010_v31  ;;  %v3740_v22 = vadd.f32 %v3739_v1, %v3738_v44  ;;  %v3743_v28 = vsel %vm3737_vm8, %v3715_v60, 0.0 }
 0x612   :  { %4827 = vpow2.f32 %v3065_v55  ;;  %v1381_v5 = vrot.slane %v6284_v30, %v6198_v0  ;;  %v1377_v36 = vrot.slane %v6284_v30, %v6206_v3  ;;  %v1385_v57 = vrot.slane %v6284_v30, %v6209_v9 }
 0x613   :  { %v4818_v53 = vpop.eup %4817  ;;  %4829 = vpow2.f32 %v3063_v21  ;;  %v3067_v19 = vmul.f32 1.442695, %v3035_v24  ;;  %v3742_v37 = vadd.f32 %v3741_v35, %v3740_v22 }
 0x615   :  { %4831 = vpow2.f32 %v3067_v19  ;;  %v6279_v32 = vadd.f32 %v3743_v28, %v3742_v37  ;;  %v3182_v28 = vmax.f32 %v6257_v12, 0.0 }
 0x616   :  { %v4820_v45 = vpop.eup %4819 }
 0x617   :  { %v4822_v2 = vpop.eup %4821  ;;  %v3403_v50 = vcombine.low %v4818_v53, %v4820_v45  ;;  %v3232_v53 = vsub.f32 0.0, %v6257_v12  ;;  %v3184_v12 = vmax.f32 %v6261_v56, 0.0 }
 0x618   :  { %v4824_v34 = vpop.eup %4823 }
 0x619   :  { %v4826_v7 = vpop.eup %4825  ;;  %v3404_v15 = vcombine.low %v4822_v2, %v4824_v34  ;;  %v3411_v26 = vrot.slane %v3403_v50, %v5209_v41 }
 0x61a   :  { %v3107_v49 = vadd.f32 1.0, %v4826_v7 }
 0x61b   :  { %v3418_v18 = vrot.slane %v3404_v15, %v5209_v41 }
 0x61c   :  { %4833 = vlog2.f32 %v3107_v49  ;;  %v4828_v17 = vpop.eup %4827  ;;  %v3234_v49 = vsub.f32 0.0, %v6261_v56 }
 0x61d   :  { %v3419_v27 = vcombine.low %v3411_v26, %v3418_v18  ;;  %v4830_v11 = vpop.eup %4829  ;;  %v3109_v42 = vadd.f32 1.0, %v4828_v17  ;;  %v3257_v26 = vmax.f32 %v3232_v53, 0.0 }
 0x61e   :  { %v3108_v6 = vadd.f32 1.0, %v4830_v11 }
 0x61f   :  { %v2669_v43 = vpop.f32.mrb[24].mxu1  ;;  %v2710_v39 = vpop.f32.mrb[24].mxu0  ;;  %3519 = vst [vmem:[#allocation4] sm:$0xff] %v3419_v27  ;;  %4835 = vlog2.f32 %v3109_v42  ;;  %v3233_v27 = vsub.f32 0.0, %v6264_v25 }
 0x620   :  { %v6296_v46 = vadd.f32 %v2669_v43, %v1373_v13  ;;  %v6298_v60 = vadd.f32 %v2710_v39, %v1381_v5  ;;  %v2671_v59 = vpop.f32.mrb[25].mxu1  ;;  %v2712_v44 = vpop.f32.mrb[25].mxu0  ;;  %4837 = vlog2.f32 %v3108_v6  ;;  %v3259_v43 = vmax.f32 %v3234_v49, 0.0 }
 0x621   :  { %v4832_v1 = vpop.eup %4831  ;;  %v6300_v55 = vadd.f32 %v2671_v59, %v1377_v36  ;;  %v2673_v31 = vpop.f32.mrb[26].mxu1  ;;  %v6304_v45 = vadd.f32 %v2712_v44, %v1385_v57  ;;  %v3235_v39 = vsub.f32 0.0, %v6270_v23 }
 0x622   :  { %v2714_v21 = vpop.f32.mrb[26].mxu0  ;;  %v3110_v24 = vadd.f32 1.0, %v4832_v1  ;;  %v3011_v22 = vand.u32 2147483647, %v6296_v46  ;;  %v2674_v19 = vpop.f32.mrb[27].mxu1 }
 0x623   :  { %v3013_v35 = vand.u32 2147483647, %v6298_v60  ;;  %v3012_v2 = vand.u32 2147483647, %v6300_v55  ;;  %v2715_v37 = vpop.f32.mrb[27].mxu0  ;;  %v3258_v19 = vmax.f32 %v3233_v27, 0.0 }
 0x624   :  { %4839 = vlog2.f32 %v3110_v24  ;;  %v3036_v50 = vsub.f32 0.0, %v3011_v22  ;;  %v3014_v13 = vand.u32 2147483647, %v6304_v45  ;;  %v3183_v22 = vmax.f32 %v6264_v25, 0.0 }
 0x625   :  { %v3038_v34 = vsub.f32 0.0, %v3013_v35  ;;  %v3037_v7 = vsub.f32 0.0, %v3012_v2 }
 0x626   :  { %v4834_v15 = vpop.eup %4833  ;;  %v3069_v18 = vmul.f32 1.442695, %v3036_v50  ;;  %v3039_v11 = vsub.f32 0.0, %v3014_v13  ;;  %v3260_v13 = vmax.f32 %v3235_v39, 0.0 }
 0x627   :  { %v3137_v5 = vmul.f32 0.6931472, %v4834_v15  ;;  %v3073_v17 = vmul.f32 1.442695, %v3038_v34  ;;  %v3071_v36 = vmul.f32 1.442695, %v3037_v7 }
 0x628   :  { %4841 = vpow2.f32 %v3069_v18  ;;  %v3075_v59 = vmul.f32 1.442695, %v3039_v11  ;;  %v3185_v15 = vmax.f32 %v6270_v23, 0.0 }
 0x629   :  { %v6312_v42 = vadd.f32 %v3182_v28, %v3137_v5  ;;  %v3282_v57 = vadd.f32 %v3257_v26, %v3137_v5  ;;  %4843 = vpow2.f32 %v3073_v17  ;;  %v4836_v6 = vpop.eup %4835  ;;  %v3659_v28 = vsel %vm505_vm1, %v5270_v62, %v5433_v38 }
 0x62a   :  { %4845 = vpow2.f32 %v3071_v36  ;;  %v4838_v44 = vpop.eup %4837  ;;  %v3141_v53 = vmul.f32 0.6931472, %v4836_v6 }
 0x62b   :  { %v3307_v1 = vsub.f32 0.0, %v3282_v57  ;;  %v3531_v31 = vmin.f32 %v6312_v42, 100.0  ;;  %v3556_v21 = vmin.f32 %v3282_v57, 100.0  ;;  %v3139_v24 = vmul.f32 0.6931472, %v4838_v44 }
 0x62c   :  { %4847 = vpow2.f32 %v3075_v59  ;;  %v3284_v2 = vadd.f32 %v3259_v43, %v3141_v53  ;;  %v3209_v50 = vadd.f32 %v3184_v12, %v3141_v53 }
 0x62d   :  { %v3336_v35 = vmul.f32 1.442695, %v3307_v1  ;;  %v3666_v56 = vsub.f32 %v3556_v21, %v3531_v31  ;;  %v3208_v34 = vadd.f32 %v3183_v22, %v3139_v24  ;;  %v3283_v7 = vadd.f32 %v3258_v19, %v3139_v24 }
 0x62e   :  { %v4840_v37 = vpop.eup %4839  ;;  %v3309_v26 = vsub.f32 0.0, %v3284_v2  ;;  %v3558_v49 = vmin.f32 %v3284_v2, 100.0  ;;  %v3533_v36 = vmin.f32 %v3209_v50, 100.0 }
 0x62f   :  { %v3143_v18 = vmul.f32 0.6931472, %v4840_v37  ;;  %v3308_v25 = vsub.f32 0.0, %v3283_v7  ;;  %v3532_v5 = vmin.f32 %v3208_v34, 100.0  ;;  %v3557_v17 = vmin.f32 %v3283_v7, 100.0 }
 0x630   :  { %4849 = vpow2.f32 %v3336_v35  ;;  %v3340_v27 = vmul.f32 1.442695, %v3309_v26  ;;  %v3668_v62 = vsub.f32 %v3558_v49, %v3533_v36  ;;  %v3691_v38 = vmul.f32 %v3666_v56, %v5260_v58 }
 0x631   :  { %v3285_v11 = vadd.f32 %v3260_v13, %v3143_v18  ;;  %v3210_v42 = vadd.f32 %v3185_v15, %v3143_v18  ;;  %v3338_v12 = vmul.f32 1.442695, %v3308_v25  ;;  %v3667_v6 = vsub.f32 %v3557_v17, %v3532_v5 }
 0x632   :  { %v4842_v57 = vpop.eup %4841  ;;  %4851 = vpow2.f32 %v3340_v27  ;;  %v3693_v21 = vmul.f32 %v3668_v62, %v3659_v28  ;;  %v3716_v58 = vadd.f32 %v3691_v38, %v3531_v31  ;;  %v3236_v31 = vsub.f32 0.0, %v6296_v46 }
 0x633   :  { %v4844_v43 = vpop.eup %4843  ;;  %v3310_v23 = vsub.f32 0.0, %v3285_v11  ;;  %v3559_v59 = vmin.f32 %v3285_v11, 100.0  ;;  %v3111_v44 = vadd.f32 1.0, %v4842_v57  ;;  %4853 = vpow2.f32 %v3338_v12 }
 0x634   :  { %v4846_v39 = vpop.eup %4845  ;;  %v3113_v1 = vadd.f32 1.0, %v4844_v43  ;;  %v3534_v53 = vmin.f32 %v3210_v42, 100.0  ;;  %v3692_v19 = vmul.f32 %v3667_v6, %v5267_v61  ;;  %v3718_v2 = vadd.f32 %v3693_v21, %v3533_v36 }
 0x635   :  { %v3342_v24 = vmul.f32 1.442695, %v3310_v23  ;;  %4855 = vlog2.f32 %v3111_v44  ;;  %v3112_v22 = vadd.f32 1.0, %v4846_v39  ;;  %v3745_v34 = vsel %vm3737_vm8, %v3716_v58, 0.0 }
 0x636   :  { %v4848_v35 = vpop.eup %4847  ;;  %4857 = vlog2.f32 %v3113_v1  ;;  %v3669_v50 = vsub.f32 %v3559_v59, %v3534_v53  ;;  %v3717_v37 = vadd.f32 %v3692_v19, %v3532_v5  ;;  %3761 = vrot.lane.b32.xlu0 %v3718_v2, %s5011_s10  ;;  %v3746_v61 = vadd.f32 %v3745_v34, %v6279_v32 }
 0x637   :  { %4859 = vpow2.f32 %v3342_v24  ;;  %v3114_v56 = vadd.f32 1.0, %v4848_v35  ;;  %v1389_v18 = vrot.slane %v6284_v30, %v6232_v51  ;;  %v3750_v13 = vsel %vm3749_vm9, %v3718_v2, 0.0 }
 0x638   :  { %4861 = vlog2.f32 %v3112_v22  ;;  %v3694_v28 = vmul.f32 %v3669_v50, %v5441_v48  ;;  %v3747_v7 = vsel %vm3737_vm8, %v3717_v37, 0.0  ;;  %v1397_v48 = vrot.slane %v6284_v30, %v6235_v52 }
 0x639   :  { %4863 = vlog2.f32 %v3114_v56  ;;  %v3748_v49 = vadd.f32 %v3747_v7, %v3746_v61  ;;  %v3238_v32 = vsub.f32 0.0, %v6298_v60  ;;  %v3261_v11 = vmax.f32 %v3236_v31, 0.0 }
 0x63a   :  { %v3719_v15 = vadd.f32 %v3694_v28, %v3534_v53  ;;  %v6329_v26 = vpop.eup %4849  ;;  %v3237_v42 = vsub.f32 0.0, %v6300_v55  ;;  %v3239_v38 = vsub.f32 0.0, %v6304_v45  ;;  %v1393_v53 = vrot.slane %v6284_v30, %v6238_v54 }
 0x63b   :  { %v6341_v5 = vadd.f32 %v3750_v13, %v3748_v49  ;;  %v3263_v21 = vmax.f32 %v3238_v32, 0.0  ;;  %v1401_v58 = vrot.slane %v6284_v30, %v6247_v40 }
 0x63c   :  { %3763 = vrot.lane.b32.xlu0 %v3719_v15, %s5011_s10  ;;  %v6338_v25 = vpop.eup %4851  ;;  %v3262_v7 = vmax.f32 %v3237_v42, 0.0  ;;  %v3264_v49 = vmax.f32 %v3239_v38, 0.0  ;;  %v3186_v42 = vmax.f32 %v6296_v46, 0.0 }
 0x63d   :  { %v6343_v17 = vpop.eup %4853 }
 0x63e   :  { %v3420_v27 = vcombine.low %v6329_v26, %v6343_v17 }
 0x63f   :  { %v4856_v36 = vpop.eup %4855  ;;  %v2751_v57 = vpop.f32.mrb[28].mxu1 }
 0x640   :  { %v2792_v12 = vpop.f32.mrb[28].mxu0  ;;  %v4858_v6 = vpop.eup %4857  ;;  %v3145_v62 = vmul.f32 0.6931472, %v4856_v36  ;;  %v6349_v43 = vadd.f32 %v2751_v57, %v1389_v18 }
 0x641   :  { %v6351_v23 = vadd.f32 %v2792_v12, %v1397_v48  ;;  %v2753_v59 = vpop.f32.mrb[29].mxu1  ;;  %v2794_v44 = vpop.f32.mrb[29].mxu0  ;;  %v3149_v1 = vmul.f32 0.6931472, %v4858_v6 }
 0x642   :  { %v6353_v39 = vpop.eup %4859  ;;  %v2755_v24 = vpop.f32.mrb[30].mxu1  ;;  %v3286_v2 = vadd.f32 %v3261_v11, %v3145_v62  ;;  %v3015_v50 = vand.u32 2147483647, %v6349_v43  ;;  %v6365_v12 = vadd.f32 %v2794_v44, %v1401_v58  ;;  %v3428_v58 = vrot.slane %v3420_v27, %v5209_v41 }
 0x643   :  { %v2796_v22 = vpop.f32.mrb[30].mxu0  ;;  %v4862_v19 = vpop.eup %4861  ;;  %v3421_v35 = vcombine.low %v6338_v25, %v6353_v39  ;;  %v3288_v34 = vadd.f32 %v3263_v21, %v3149_v1  ;;  %v3017_v15 = vand.u32 2147483647, %v6351_v23  ;;  %v6363_v25 = vadd.f32 %v2753_v59, %v1393_v53 }
 0x644   :  { %v2756_v56 = vpop.f32.mrb[31].mxu1  ;;  %v2797_v37 = vpop.f32.mrb[31].mxu0  ;;  %v3147_v61 = vmul.f32 0.6931472, %v4862_v19  ;;  %v3311_v26 = vsub.f32 0.0, %v3286_v2  ;;  %v3040_v18 = vsub.f32 0.0, %v3015_v50 }
 0x645   :  { %v4864_v28 = vpop.eup %4863  ;;  %v3313_v48 = vsub.f32 0.0, %v3288_v34  ;;  %v3042_v30 = vsub.f32 0.0, %v3017_v15  ;;  %v3016_v21 = vand.u32 2147483647, %v6363_v25  ;;  %v3188_v59 = vmax.f32 %v6298_v60, 0.0 }
 0x646   :  { %v3151_v31 = vmul.f32 0.6931472, %v4864_v28  ;;  %v3287_v13 = vadd.f32 %v3262_v7, %v3147_v61  ;;  %v3344_v32 = vmul.f32 1.442695, %v3311_v26  ;;  %v3077_v36 = vmul.f32 1.442695, %v3040_v18 }
 0x647   :  { %v3348_v11 = vmul.f32 1.442695, %v3313_v48  ;;  %v3081_v38 = vmul.f32 1.442695, %v3042_v30  ;;  %v3187_v53 = vmax.f32 %v6300_v55, 0.0  ;;  %v3189_v22 = vmax.f32 %v6304_v45, 0.0 }
 0x648   :  { %v3289_v17 = vadd.f32 %v3264_v49, %v3151_v31  ;;  %v3312_v57 = vsub.f32 0.0, %v3287_v13  ;;  %4865 = vpow2.f32 %v3344_v32  ;;  %v3041_v44 = vsub.f32 0.0, %v3016_v21 }
 0x649   :  { %4867 = vpow2.f32 %v3348_v11  ;;  %v3018_v19 = vand.u32 2147483647, %v6365_v12  ;;  %v3560_v46 = vmin.f32 %v3286_v2, 100.0  ;;  %v3562_v50 = vmin.f32 %v3288_v34, 100.0 }
 0x64a   :  { %v3314_v6 = vsub.f32 0.0, %v3289_v17  ;;  %v3346_v39 = vmul.f32 1.442695, %v3312_v57  ;;  %4869 = vpow2.f32 %v3077_v36  ;;  %v3079_v56 = vmul.f32 1.442695, %v3041_v44 }
 0x64b   :  { %v3043_v37 = vsub.f32 0.0, %v3018_v19  ;;  %v3211_v28 = vadd.f32 %v3186_v42, %v3145_v62  ;;  %v3561_v60 = vmin.f32 %v3287_v13, 100.0  ;;  %v3563_v7 = vmin.f32 %v3289_v17, 100.0 }
 0x64c   :  { %v3350_v24 = vmul.f32 1.442695, %v3314_v6  ;;  %4871 = vpow2.f32 %v3346_v39  ;;  %v3214_v55 = vadd.f32 %v3189_v22, %v3151_v31  ;;  %v3213_v15 = vadd.f32 %v3188_v59, %v3149_v1 }
 0x64d   :  { %v3083_v26 = vmul.f32 1.442695, %v3043_v37  ;;  %v3535_v49 = vmin.f32 %v3211_v28, 100.0  ;;  %v3212_v45 = vadd.f32 %v3187_v53, %v3147_v61  ;;  %v3435_v2 = vrot.slane %v3421_v35, %v5209_v41 }
 0x64e   :  { %4873 = vpow2.f32 %v3350_v24  ;;  %v3538_v18 = vmin.f32 %v3214_v55, 100.0  ;;  %v3537_v48 = vmin.f32 %v3213_v15, 100.0  ;;  %v3592_v62 = vsel %vm505_vm1, %v5436_v47, %v5497_v10 }
 0x64f   :  { %4875 = vpow2.f32 %v3081_v38  ;;  %v3670_v34 = vsub.f32 %v3560_v46, %v3535_v49  ;;  %v3536_v32 = vmin.f32 %v3212_v45, 100.0  ;;  %v3436_v31 = vcombine.low %v3428_v58, %v3435_v2  ;;  %v6393_v46 = vld [vmem:[%s6638_s14 + $0x10] sm:$0xff] }
 0x650   :  { %4877 = vpow2.f32 %v3079_v56  ;;  %v3673_v13 = vsub.f32 %v3563_v7, %v3538_v18  ;;  %v3672_v17 = vsub.f32 %v3562_v50, %v3537_v48  ;;  %v3595_v61 = vsel %vm505_vm1, %v5626_v8, %v5519_v20 }
 0x651   :  { %4879 = vpow2.f32 %v3083_v26  ;;  %v3594_v35 = vsel %vm505_vm1, %v5637_v14, %v5626_v8  ;;  %v3695_v36 = vmul.f32 %v3670_v34, %v3592_v62  ;;  %v3671_v30 = vsub.f32 %v3561_v60, %v3536_v32  ;;  %3520 = vst [vmem:[#allocation4 + $0x8] sm:$0xff] %v3436_v31 }
 0x652   :  { %v4866_v27 = vpop.eup %4865  ;;  %v3593_v57 = vsel %vm505_vm1, %v5497_v10, %v5637_v14  ;;  %v3698_v47 = vmul.f32 %v3673_v13, %v3595_v61  ;;  %v3697_v42 = vmul.f32 %v3672_v17, %v3594_v35  ;;  %v1405_v60 = vrot.slane %v6393_v46, %v6195_v63 }
 0x653   :  { %v4868_v1 = vpop.eup %4867  ;;  %v3720_v38 = vadd.f32 %v3695_v36, %v3535_v49  ;;  %v3696_v21 = vmul.f32 %v3671_v30, %v3593_v57  ;;  %v1413_v7 = vrot.slane %v6393_v46, %v6198_v0  ;;  %v1409_v55 = vrot.slane %v6393_v46, %v6206_v3 }
 0x654   :  { %v4870_v11 = vpop.eup %4869  ;;  %v3723_v53 = vadd.f32 %v3698_v47, %v3538_v18  ;;  %v3722_v24 = vadd.f32 %v3697_v42, %v3537_v48  ;;  %v3240_v15 = vsub.f32 0.0, %v6349_v43  ;;  %v1417_v63 = vrot.slane %v6393_v46, %v6209_v9 }
 0x655   :  { %v3115_v39 = vadd.f32 1.0, %v4870_v11  ;;  %3765 = vrot.lane.b32.xlu0 %v3720_v38, %s5011_s10  ;;  %v3721_v44 = vadd.f32 %v3696_v21, %v3536_v32  ;;  %v3242_v3 = vsub.f32 0.0, %v6351_v23  ;;  %v3241_v31 = vsub.f32 0.0, %v6363_v25 }
 0x656   :  { %v4872_v6 = vpop.eup %4871  ;;  %3771 = vrot.lane.b32.xlu1 %v3723_v53, %s5011_s10  ;;  %v3265_v13 = vmax.f32 %v3240_v15, 0.0  ;;  %v3190_v9 = vmax.f32 %v6349_v43, 0.0  ;;  %v3191_v43 = vmax.f32 %v6363_v25, 0.0 }
 0x657   :  { %v3437_v20 = vcombine.low %v4866_v27, %v4872_v6  ;;  %4881 = vlog2.f32 %v3115_v39  ;;  %v3267_v6 = vmax.f32 %v3242_v3, 0.0  ;;  %v3243_v39 = vsub.f32 0.0, %v6365_v12 }
 0x658   :  { %v4874_v59 = vpop.eup %4873 }
 0x659   :  { %v4876_v22 = vpop.eup %4875  ;;  %v3438_v8 = vcombine.low %v4868_v1, %v4874_v59  ;;  %v3445_v10 = vrot.slane %v3437_v20, %v5209_v41  ;;  %3769 = vrot.lane.b32.xlu0 %v3722_v24, %s5011_s10  ;;  %v3192_v20 = vmax.f32 %v6351_v23, 0.0  ;;  %v3193_v23 = vmax.f32 %v6365_v12, 0.0 }
 0x65a   :  { %v3117_v19 = vadd.f32 1.0, %v4876_v22  ;;  %v4878_v14 = vpop.eup %4877 }
 0x65b   :  { %v3452_v50 = vrot.slane %v3438_v8, %v5209_v41  ;;  %v3116_v58 = vadd.f32 1.0, %v4878_v14  ;;  %v4880_v56 = vpop.eup %4879 }
 0x65c   :  { %4883 = vlog2.f32 %v3117_v19  ;;  %v3118_v28 = vadd.f32 1.0, %v4880_v56 }
 0x65d   :  { %v3453_v37 = vcombine.low %v3445_v10, %v3452_v50  ;;  %4885 = vlog2.f32 %v3116_v58  ;;  %3767 = vrot.lane.b32.xlu0 %v3721_v44, %s5011_s10  ;;  %v3266_v44 = vmax.f32 %v3241_v31, 0.0 }
 0x65e   :  { %4887 = vlog2.f32 %v3118_v28  ;;  %v3268_v28 = vmax.f32 %v3243_v39, 0.0  ;;  %v3620_v39 = vsel %vm963_vm4, %v5616_v4, %v5641_v16 }
 0x65f   :  { %3521 = vst [vmem:[#allocation4 + $0x10] sm:$0xff] %v3453_v37  ;;  %v2833_v26 = vpop.f32.mrb[32].mxu1  ;;  %v2874_v49 = vpop.f32.mrb[32].mxu0 }
 0x660   :  { %v6405_v45 = vadd.f32 %v2833_v26, %v1405_v60  ;;  %v6407_v18 = vadd.f32 %v2874_v49, %v1413_v7  ;;  %v2835_v48 = vpop.f32.mrb[33].mxu1  ;;  %v2876_v0 = vpop.f32.mrb[33].mxu0 }
 0x661   :  { %v4882_v2 = vpop.eup %4881  ;;  %v6412_v34 = vadd.f32 %v2835_v48, %v1409_v55  ;;  %v2837_v32 = vpop.f32.mrb[34].mxu1  ;;  %v6419_v11 = vadd.f32 %v2876_v0, %v1417_v63 }
 0x662   :  { %v2878_v27 = vpop.f32.mrb[34].mxu0  ;;  %v3153_v62 = vmul.f32 0.6931472, %v4882_v2  ;;  %v3019_v17 = vand.u32 2147483647, %v6405_v45  ;;  %v2838_v57 = vpop.f32.mrb[35].mxu1 }
 0x663   :  { %v3021_v1 = vand.u32 2147483647, %v6407_v18  ;;  %v3020_v61 = vand.u32 2147483647, %v6412_v34  ;;  %v2879_v47 = vpop.f32.mrb[35].mxu0 }
 0x664   :  { %v3290_v36 = vadd.f32 %v3265_v13, %v3153_v62  ;;  %v3044_v30 = vsub.f32 0.0, %v3019_v17  ;;  %v3022_v50 = vand.u32 2147483647, %v6419_v11  ;;  %v3215_v63 = vadd.f32 %v3190_v9, %v3153_v62 }
 0x665   :  { %v3046_v38 = vsub.f32 0.0, %v3021_v1  ;;  %v3045_v24 = vsub.f32 0.0, %v3020_v61  ;;  %v3619_v47 = vsel %vm963_vm4, %v5551_v33, %v5616_v4 }
 0x666   :  { %v4884_v35 = vpop.eup %4883  ;;  %v3315_v59 = vsub.f32 0.0, %v3290_v36  ;;  %v3085_v53 = vmul.f32 1.442695, %v3044_v30  ;;  %v3564_v60 = vmin.f32 %v3290_v36, 100.0  ;;  %v3047_v55 = vsub.f32 0.0, %v3022_v50 }
 0x667   :  { %v3157_v42 = vmul.f32 0.6931472, %v4884_v35  ;;  %v4886_v21 = vpop.eup %4885  ;;  %v3089_v14 = vmul.f32 1.442695, %v3046_v38  ;;  %v3087_v7 = vmul.f32 1.442695, %v3045_v24 }
 0x668   :  { %v3155_v8 = vmul.f32 0.6931472, %v4886_v21  ;;  %v4888_v19 = vpop.eup %4887  ;;  %v3352_v10 = vmul.f32 1.442695, %v3315_v59  ;;  %4889 = vpow2.f32 %v3085_v53  ;;  %v3091_v48 = vmul.f32 1.442695, %v3047_v55 }
 0x669   :  { %v3292_v22 = vadd.f32 %v3267_v6, %v3157_v42  ;;  %v3159_v37 = vmul.f32 0.6931472, %v4888_v19  ;;  %v3539_v32 = vmin.f32 %v3215_v63, 100.0  ;;  %v3217_v27 = vadd.f32 %v3192_v20, %v3157_v42  ;;  %v6671_v59 = vld [vmem:[#allocation10_spill] sm:$0xff] }
 0x66a   :  { %v3291_v56 = vadd.f32 %v3266_v44, %v3155_v8  ;;  %4891 = vpow2.f32 %v3352_v10  ;;  %v3216_v13 = vadd.f32 %v3191_v43, %v3155_v8  ;;  %v1425_v55 = vrot.slane %v6393_v46, %v6238_v54 }
 0x66b   :  { %v3317_v58 = vsub.f32 0.0, %v3292_v22  ;;  %v3293_v25 = vadd.f32 %v3268_v28, %v3159_v37  ;;  %v3566_v49 = vmin.f32 %v3292_v22, 100.0  ;;  %4893 = vpow2.f32 %v3089_v14 }
 0x66c   :  { %v3316_v26 = vsub.f32 0.0, %v3291_v56  ;;  %v3565_v2 = vmin.f32 %v3291_v56, 100.0  ;;  %v3218_v31 = vadd.f32 %v3193_v23, %v3159_v37  ;;  %v3674_v1 = vsub.f32 %v3564_v60, %v3539_v32 }
 0x66d   :  { %v3356_v15 = vmul.f32 1.442695, %v3317_v58  ;;  %v3318_v3 = vsub.f32 0.0, %v3293_v25  ;;  %v3567_v17 = vmin.f32 %v3293_v25, 100.0  ;;  %v3541_v61 = vmin.f32 %v3217_v27, 100.0 }
 0x66e   :  { %v3354_v0 = vmul.f32 1.442695, %v3316_v26  ;;  %v3540_v35 = vmin.f32 %v3216_v13, 100.0  ;;  %v3542_v36 = vmin.f32 %v3218_v31, 100.0  ;;  %v3699_v62 = vmul.f32 %v3674_v1, %v5541_v29 }
 0x66f   :  { %4895 = vpow2.f32 %v3356_v15  ;;  %v3358_v12 = vmul.f32 1.442695, %v3318_v3  ;;  %v3676_v9 = vsub.f32 %v3566_v49, %v3541_v61  ;;  %v3244_v56 = vsub.f32 0.0, %v6405_v45 }
 0x670   :  { %4897 = vpow2.f32 %v3087_v7  ;;  %v3675_v57 = vsub.f32 %v3565_v2, %v3540_v35  ;;  %v3677_v6 = vsub.f32 %v3567_v17, %v3542_v36  ;;  %v3724_v38 = vadd.f32 %v3699_v62, %v3539_v32  ;;  %v6673_v62 = vld [vmem:[#allocation17_spill] sm:$0xff] }
 0x671   :  { %4899 = vpow2.f32 %v3354_v0  ;;  %v3701_v21 = vmul.f32 %v3676_v9, %v3619_v47  ;;  %v1421_v60 = vrot.slane %v6393_v46, %v6232_v51  ;;  %v1429_v23 = vrot.slane %v6393_v46, %v6235_v52 }
 0x672   :  { %4901 = vpow2.f32 %v3091_v48  ;;  %v4890_v30 = vpop.eup %4889  ;;  %v3700_v20 = vmul.f32 %v3675_v57, %v6671_v59  ;;  %v3702_v24 = vmul.f32 %v3677_v6, %v3620_v39  ;;  %3810 = vrot.lane.b32.xlu0 %v3724_v38, %s5005_s8  ;;  %v3269_v25 = vmax.f32 %v3244_v56, 0.0 }
 0x673   :  { %4903 = vpow2.f32 %v3358_v12  ;;  %v3119_v42 = vadd.f32 1.0, %v4890_v30  ;;  %v3726_v22 = vadd.f32 %v3701_v21, %v3541_v61  ;;  %v3246_v49 = vsub.f32 0.0, %v6407_v18  ;;  %v6672_v30 = vld [vmem:[#allocation11_spill] sm:$0xff] }
 0x674   :  { %v4892_v53 = vpop.eup %4891  ;;  %v3725_v8 = vadd.f32 %v3700_v20, %v3540_v35  ;;  %v3727_v44 = vadd.f32 %v3702_v24, %v3542_v36  ;;  %v3245_v48 = vsub.f32 0.0, %v6412_v34  ;;  %v1433_v13 = vrot.slane %v6393_v46, %v6247_v40 }
 0x675   :  { %4905 = vlog2.f32 %v3119_v42  ;;  %v4894_v29 = vpop.eup %4893  ;;  %v3623_v9 = vsel %vm963_vm4, %v6673_v62, %v6672_v30  ;;  %v3271_v57 = vmax.f32 %v3246_v49, 0.0  ;;  %v3247_v21 = vsub.f32 0.0, %v6419_v11 }
 0x676   :  { %v3121_v33 = vadd.f32 1.0, %v4894_v29  ;;  %3814 = vrot.lane.b32.xlu0 %v3726_v22, %s5005_s8  ;;  %v3270_v6 = vmax.f32 %v3245_v48, 0.0 }
 0x678   :  { %4907 = vlog2.f32 %v3121_v33  ;;  %v3194_v33 = vmax.f32 %v6405_v45, 0.0 }
 0x679   :  { %v4896_v43 = vpop.eup %4895 }
 0x67a   :  { %v4898_v19 = vpop.eup %4897  ;;  %3773 = vrot.lane.b32.xlu0 %v3724_v38, %s5011_s10 }
 0x67b   :  { %v4900_v10 = vpop.eup %4899  ;;  %v3120_v14 = vadd.f32 1.0, %v4898_v19  ;;  %v3196_v19 = vmax.f32 %v6407_v18, 0.0 }
 0x67c   :  { %v4902_v4 = vpop.eup %4901  ;;  %v3454_v50 = vcombine.low %v4892_v53, %v4900_v10 }
 0x67d   :  { %v4904_v58 = vpop.eup %4903  ;;  %4909 = vlog2.f32 %v3120_v14  ;;  %v3122_v37 = vadd.f32 1.0, %v4902_v4 }
 0x67e   :  { %v3455_v28 = vcombine.low %v4896_v43, %v4904_v58  ;;  %v3462_v7 = vrot.slane %v3454_v50, %v5209_v41  ;;  %3812 = vrot.lane.b32.xlu0 %v3725_v8, %s5005_s8  ;;  %v3195_v50 = vmax.f32 %v6412_v34, 0.0 }
 0x67f   :  { %4911 = vlog2.f32 %v3122_v37  ;;  %v4906_v26 = vpop.eup %4905  ;;  %v2915_v51 = vpop.f32.mrb[36].mxu1  ;;  %v3272_v37 = vmax.f32 %v3247_v21, 0.0 }
 0x680   :  { %v3469_v15 = vrot.slane %v3455_v28, %v5209_v41  ;;  %v2956_v63 = vpop.f32.mrb[36].mxu0  ;;  %v6448_v0 = vmul.f32 0.6931472, %v4906_v26  ;;  %v6450_v52 = vadd.f32 %v2915_v51, %v1421_v60  ;;  %v2917_v3 = vpop.f32.mrb[37].mxu1 }
 0x681   :  { %v6452_v2 = vadd.f32 %v2956_v63, %v1429_v23  ;;  %v2958_v54 = vpop.f32.mrb[37].mxu0  ;;  %v6454_v27 = vadd.f32 %v2917_v3, %v1425_v55  ;;  %v2919_v12 = vpop.f32.mrb[38].mxu1  ;;  %v3197_v23 = vmax.f32 %v6419_v11, 0.0 }
 0x682   :  { %v3470_v32 = vcombine.low %v3462_v7, %v3469_v15  ;;  %v2960_v17 = vpop.f32.mrb[38].mxu0  ;;  %v6459_v31 = vadd.f32 %v3269_v25, %v6448_v0  ;;  %v3023_v1 = vand.u32 2147483647, %v6450_v52  ;;  %v2920_v61 = vpop.f32.mrb[39].mxu1  ;;  %v6470_v53 = vadd.f32 %v2958_v54, %v1433_v13  ;;  %3816 = vrot.lane.b32.xlu0 %v3727_v44, %s5005_s8 }
 0x683   :  { %v2961_v35 = vpop.f32.mrb[39].mxu0  ;;  %v4908_v36 = vpop.eup %4907  ;;  %v3025_v40 = vand.u32 2147483647, %v6452_v2  ;;  %v3024_v46 = vand.u32 2147483647, %v6454_v27  ;;  %v3219_v3 = vadd.f32 %v3194_v33, %v6448_v0  ;;  %v6674_v17 = vld [vmem:[#allocation12_spill] sm:$0xff] }
 0x684   :  { %3522 = vst [vmem:[#allocation4 + $0x18] sm:$0xff] %v3470_v32  ;;  %v3319_v47 = vsub.f32 0.0, %v6459_v31  ;;  %v3165_v42 = vmul.f32 0.6931472, %v4908_v36  ;;  %v3048_v39 = vsub.f32 0.0, %v3023_v1  ;;  %v3568_v45 = vmin.f32 %v6459_v31, 100.0 }
 0x685   :  { %v3050_v59 = vsub.f32 0.0, %v3025_v40  ;;  %v3049_v20 = vsub.f32 0.0, %v3024_v46  ;;  %v3026_v28 = vand.u32 2147483647, %v6470_v53  ;;  %v3543_v12 = vmin.f32 %v3219_v3, 100.0  ;;  %v6675_v36 = vld [vmem:[#allocation14_spill] sm:$0xff] }
 0x686   :  { %v3360_v24 = vmul.f32 1.442695, %v3319_v47  ;;  %v3296_v29 = vadd.f32 %v3271_v57, %v3165_v42  ;;  %v3093_v8 = vmul.f32 1.442695, %v3048_v39  ;;  %v3221_v34 = vadd.f32 %v3196_v19, %v3165_v42  ;;  %v6676_v39 = vld [vmem:[#allocation18_spill] sm:$0xff] }
 0x687   :  { %v4910_v38 = vpop.eup %4909  ;;  %v3097_v10 = vmul.f32 1.442695, %v3050_v59  ;;  %v3095_v14 = vmul.f32 1.442695, %v3049_v20  ;;  %v3051_v7 = vsub.f32 0.0, %v3026_v28  ;;  %v3661_v31 = vsel %vm3645_vm7, %v3623_v9, %v6674_v17 }
 0x688   :  { %v3163_v22 = vmul.f32 0.6931472, %v4910_v38  ;;  %4913 = vpow2.f32 %v3360_v24  ;;  %v3321_v4 = vsub.f32 0.0, %v3296_v29  ;;  %v3570_v55 = vmin.f32 %v3296_v29, 100.0  ;;  %v4029_v28 = vld [vmem:[%s6638_s14 + $0x18] ss:$0 sm:$0xff] }
 0x689   :  { %v4912_v43 = vpop.eup %4911  ;;  %4915 = vpow2.f32 %v3093_v8  ;;  %v3099_v49 = vmul.f32 1.442695, %v3051_v7  ;;  %v3545_v63 = vmin.f32 %v3221_v34, 100.0  ;;  %v3622_v30 = vsel %vm963_vm4, %v6675_v36, %v6673_v62  ;;  %s5013_s14 = smov 72  }
 0x68a   :  { %v3295_v58 = vadd.f32 %v3270_v6, %v3163_v22  ;;  %v3167_v56 = vmul.f32 0.6931472, %v4912_v43  ;;  %v3364_v60 = vmul.f32 1.442695, %v3321_v4  ;;  %4917 = vpow2.f32 %v3097_v10 }
 0x68b   :  { %4919 = vpow2.f32 %v3095_v14  ;;  %v3220_v48 = vadd.f32 %v3195_v50, %v3163_v22  ;;  %v3680_v13 = vsub.f32 %v3570_v55, %v3545_v63  ;;  %v3678_v40 = vsub.f32 %v3568_v45, %v3543_v12 }
 0x68c   :  { %v3320_v44 = vsub.f32 0.0, %v3295_v58  ;;  %v3297_v18 = vadd.f32 %v3272_v37, %v3167_v56  ;;  %v3569_v26 = vmin.f32 %v3295_v58, 100.0  ;;  %4921 = vpow2.f32 %v3364_v60 }
 0x68d   :  { %v3544_v54 = vmin.f32 %v3220_v48, 100.0  ;;  %v3222_v32 = vadd.f32 %v3197_v23, %v3167_v56  ;;  %v3705_v57 = vmul.f32 %v3680_v13, %v3661_v31  ;;  %v3621_v46 = vsel %vm963_vm4, %v5641_v16, %v6675_v36 }
 0x68e   :  { %v3362_v15 = vmul.f32 1.442695, %v3320_v44  ;;  %v3322_v25 = vsub.f32 0.0, %v3297_v18  ;;  %v3571_v51 = vmin.f32 %v3297_v18, 100.0  ;;  %v3646_v9 = vsel %vm3645_vm7, %v6674_v17, %v6676_v39  ;;  %v6677_v18 = vld [vmem:[#allocation13_spill] sm:$0xff] }
 0x68f   :  { %v3679_v1 = vsub.f32 %v3569_v26, %v3544_v54  ;;  %v3546_v61 = vmin.f32 %v3222_v32, 100.0  ;;  %v6491_v21 = vadd.f32 %v3705_v57, %v3545_v63  ;;  %v3703_v59 = vmul.f32 %v3678_v40, %v3621_v46 }
 0x690   :  { %4923 = vpow2.f32 %v3362_v15  ;;  %v3366_v11 = vmul.f32 1.442695, %v3322_v25  ;;  %v3248_v56 = vsub.f32 0.0, %v6450_v52  ;;  %v3250_v37 = vsub.f32 0.0, %v6452_v2 }
 0x691   :  { %4925 = vpow2.f32 %v3099_v49  ;;  %v3704_v47 = vmul.f32 %v3679_v1, %v3622_v30  ;;  %v3681_v42 = vsub.f32 %v3571_v51, %v3546_v61  ;;  %3859 = vrot.lane.b32.xlu0 %v6491_v21, %s5012_s17  ;;  %v3728_v16 = vadd.f32 %v3703_v59, %v3543_v12 }
 0x692   :  { %4927 = vpow2.f32 %v3366_v11  ;;  %v4914_v35 = vpop.eup %4913  ;;  %v3249_v60 = vsub.f32 0.0, %v6454_v27  ;;  %v3647_v7 = vsel %vm3645_vm7, %v6676_v39, %v6677_v18  ;;  %v3198_v55 = vmax.f32 %v6450_v52, 0.0 }
 0x693   :  { %v4916_v0 = vpop.eup %4915  ;;  %v3729_v24 = vadd.f32 %v3704_v47, %v3544_v54  ;;  %v3706_v29 = vmul.f32 %v3681_v42, %v3646_v9  ;;  %v3273_v48 = vmax.f32 %v3248_v56, 0.0  ;;  %v3200_v51 = vmax.f32 %v6452_v2, 0.0 }
 0x694   :  { %v4918_v6 = vpop.eup %4917  ;;  %v3123_v38 = vadd.f32 1.0, %v4916_v0  ;;  %v3275_v63 = vmax.f32 %v3250_v37, 0.0  ;;  %v3199_v32 = vmax.f32 %v6454_v27, 0.0  ;;  %v3274_v13 = vmax.f32 %v3249_v60, 0.0 }
 0x695   :  { %v4920_v20 = vpop.eup %4919  ;;  %v3125_v62 = vadd.f32 1.0, %v4918_v6  ;;  %3820 = vrot.lane.b32.xlu1 %v3729_v24, %s5005_s8  ;;  %v3731_v43 = vadd.f32 %v3706_v29, %v3546_v61  ;;  %3818 = vrot.lane.b32.xlu0 %v3728_v16, %s5005_s8  ;;  %v3251_v31 = vsub.f32 0.0, %v6470_v53  ;;  %v3201_v36 = vmax.f32 %v6470_v53, 0.0 }
 0x696   :  { %4929 = vlog2.f32 %v3123_v38  ;;  %v3124_v22 = vadd.f32 1.0, %v4920_v20  ;;  %v4922_v8 = vpop.eup %4921 }
 0x697   :  { %4931 = vlog2.f32 %v3125_v62  ;;  %v3276_v20 = vmax.f32 %v3251_v31, 0.0 }
 0x698   :  { %4933 = vlog2.f32 %v3124_v22 }
 0x699   :  { %3861 = vrot.lane.b32.xlu0 %v3731_v43, %s5012_s17 }
 0x69a   :  { %v4924_v33 = vpop.eup %4923 }
 0x69b   :  { %v4926_v19 = vpop.eup %4925  ;;  %v3471_v10 = vcombine.low %v4914_v35, %v4924_v33  ;;  %v6678_v33 = vld [vmem:[#allocation21_spill] sm:$0xff] }
 0x69c   :  { %v3126_v14 = vadd.f32 1.0, %v4926_v19  ;;  %v4928_v4 = vpop.eup %4927 }
 0x69d   :  { %v3472_v50 = vcombine.low %v4922_v8, %v4928_v4  ;;  %v3479_v58 = vrot.slane %v3471_v10, %v5209_v41 }
 0x69e   :  { %4935 = vlog2.f32 %v3126_v14 }
 0x69f   :  { %v3486_v44 = vrot.slane %v3472_v50, %v5209_v41  ;;  %v2997_v23 = vpop.f32.mrb[40].mxu1 }
 0x6a0   :  { %v4930_v45 = vpop.eup %4929  ;;  %v6510_v15 = vadd.f32 %v4029_v28, %v2997_v23  ;;  %v4405_v26 = vpop.f32.mrb[41].mxu1  ;;  %v6680_v23 = vld [vmem:[#allocation20_spill] sm:$0xff] }
 0x6a1   :  { %v3487_v34 = vcombine.low %v3479_v58, %v3486_v44  ;;  %v4932_v25 = vpop.eup %4931  ;;  %v3169_v49 = vmul.f32 0.6931472, %v4930_v45  ;;  %v3000_v3 = vpop.f32.mrb[42].mxu1  ;;  %v6679_v44 = vld [vmem:[#allocation15_spill] sm:$0xff] }
 0x6a2   :  { %v4934_v11 = vpop.eup %4933  ;;  %v3173_v54 = vmul.f32 0.6931472, %v4932_v25  ;;  %v3027_v12 = vand.u32 2147483647, %v6510_v15  ;;  %v4406_v1 = vpop.f32.mrb[43].mxu1  ;;  %v3650_v45 = vsel %vm3645_vm7, %v6680_v23, %v6679_v44 }
 0x6a3   :  { %3523 = vst [vmem:[#allocation4 + $0x20] sm:$0xff] %v3487_v34  ;;  %v3298_v52 = vadd.f32 %v3273_v48, %v3169_v49  ;;  %v3171_v17 = vmul.f32 0.6931472, %v4934_v11  ;;  %v3223_v61 = vadd.f32 %v3198_v55, %v3169_v49  ;;  %v6681_v55 = vld [vmem:[#allocation19_spill] sm:$0xff] }
 0x6a4   :  { %v3300_v35 = vadd.f32 %v3275_v63, %v3173_v54  ;;  %v3052_v2 = vsub.f32 0.0, %v3027_v12  ;;  %v3225_v30 = vadd.f32 %v3200_v51, %v3173_v54  ;;  %v3648_v26 = vsel %vm3645_vm7, %v6677_v18, %v6681_v55 }
 0x6a5   :  { %v3323_v57 = vsub.f32 0.0, %v3298_v52  ;;  %v3572_v40 = vmin.f32 %v3298_v52, 100.0  ;;  %v3299_v0 = vadd.f32 %v3274_v13, %v3171_v17  ;;  %v3547_v46 = vmin.f32 %v3223_v61, 100.0 }
 0x6a6   :  { %v3325_v47 = vsub.f32 0.0, %v3300_v35  ;;  %v3574_v42 = vmin.f32 %v3300_v35, 100.0  ;;  %v3101_v6 = vmul.f32 1.442695, %v3052_v2  ;;  %v3549_v39 = vmin.f32 %v3225_v30, 100.0 }
 0x6a7   :  { %v3368_v9 = vmul.f32 1.442695, %v3323_v57  ;;  %v3324_v38 = vsub.f32 0.0, %v3299_v0  ;;  %v3682_v24 = vsub.f32 %v3572_v40, %v3547_v46  ;;  %v3573_v8 = vmin.f32 %v3299_v0, 100.0 }
 0x6a8   :  { %v4936_v27 = vpop.eup %4935  ;;  %v3372_v62 = vmul.f32 1.442695, %v3325_v47  ;;  %4937 = vpow2.f32 %v3101_v6  ;;  %v3684_v29 = vsub.f32 %v3574_v42, %v3549_v39  ;;  %v3224_v10 = vadd.f32 %v3199_v32, %v3171_v17  ;;  %v6682_v17 = vld [vmem:[#allocation9_spill] sm:$0xff] }
 0x6a9   :  { %v3175_v59 = vmul.f32 0.6931472, %v4936_v27  ;;  %4939 = vpow2.f32 %v3368_v9  ;;  %v3370_v53 = vmul.f32 1.442695, %v3324_v38  ;;  %v3707_v43 = vmul.f32 %v3682_v24, %v3647_v7  ;;  %v6541_v38 = vpop.xlane.xlu0 %880 }
 0x6aa   :  { %v3709_v19 = vmul.f32 %v3684_v29, %v6678_v33  ;;  %v3548_v37 = vmin.f32 %v3224_v10, 100.0  ;;  %v3252_v52 = vsub.f32 0.0, %v6510_v15 }
 0x6ab   :  { %v3301_v22 = vadd.f32 %v3276_v20, %v3175_v59  ;;  %v3226_v16 = vadd.f32 %v3201_v36, %v3175_v59  ;;  %4941 = vpow2.f32 %v3370_v53  ;;  %v3732_v58 = vadd.f32 %v3707_v43, %v3547_v46  ;;  %v3644_v46 = vpop.permute.xlu1 %3643 }
 0x6ac   :  { %v3734_v56 = vadd.f32 %v3709_v19, %v3549_v39  ;;  %4943 = vpow2.f32 %v3372_v62  ;;  %v3683_v7 = vsub.f32 %v3573_v8, %v3548_v37  ;;  %v3202_v36 = vmax.f32 %v6510_v15, 0.0 }
 0x6ad   :  { %v3326_v14 = vsub.f32 0.0, %v3301_v22  ;;  %v3575_v4 = vmin.f32 %v3301_v22, 100.0  ;;  %v3550_v50 = vmin.f32 %v3226_v16, 100.0  ;;  %3863 = vrot.lane.b32.xlu1 %v3732_v58, %s5012_s17  ;;  %v3277_v2 = vmax.f32 %v3252_v52, 0.0  ;;  %v3762_v59 = vpop.permute.xlu0 %3761 }
 0x6ae   :  { %3867 = vrot.lane.b32.xlu0 %v3734_v56, %s5012_s17  ;;  %v3708_v25 = vmul.f32 %v3683_v7, %v3648_v26  ;;  %v3651_v42 = vsel %vm3645_vm7, %v6679_v44, %v3644_v46 }
 0x6af   :  { %v3374_v28 = vmul.f32 1.442695, %v3326_v14  ;;  %v3685_v60 = vsub.f32 %v3575_v4, %v3550_v50  ;;  %v6543_v14 = vpop.xlane.xlu1 %918 }
 0x6b0   :  { %v3733_v51 = vadd.f32 %v3708_v25, %v3548_v37 }
 0x6b1   :  { %4945 = vpow2.f32 %v3374_v28  ;;  %v3710_v34 = vmul.f32 %v3685_v60, %v3650_v45  ;;  %v3764_v20 = vpop.permute.xlu0 %3763 }
 0x6b2   :  { %v4938_v48 = vpop.eup %4937  ;;  %3865 = vrot.lane.b32.xlu0 %v3733_v51, %s5012_s17 }
 0x6b3   :  { %v3735_v49 = vadd.f32 %v3710_v34, %v3550_v50  ;;  %v4940_v63 = vpop.eup %4939  ;;  %v3127_v3 = vadd.f32 1.0, %v4938_v48  ;;  %v3776_v50 = vsel %vm3775_vm11, %v3762_v59, %v3764_v20 }
 0x6b4   :  { %v3789_v28 = vsel %vm3737_vm8, %v3776_v50, 0.0 }
 0x6b5   :  { %3869 = vrot.lane.b32.xlu1 %v3735_v49, %s5012_s17  ;;  %v4942_v11 = vpop.eup %4941  ;;  %4947 = vlog2.f32 %v3127_v3 }
 0x6b6   :  { %v3488_v54 = vcombine.low %v4940_v63, %v4942_v11  ;;  %v4944_v32 = vpop.eup %4943  ;;  %3822 = vrot.lane.b32.xlu0 %v6491_v21, %s5005_s8 }
 0x6b8   :  { %v3496_v12 = vrot.slane %v3488_v54, %v5209_v41 }
 0x6ba   :  { %920 = vrot.lane.b32.xlu0 %v6682_v17, %s5012_s17 }
 0x6bb   :  { %v4946_v18 = vpop.eup %4945 }
 0x6bc   :  { %v3489_v13 = vcombine.low %v4944_v32, %v4946_v18 }
 0x6be   :  { %v3503_v31 = vrot.slane %v3489_v13, %v5209_v41 }
 0x6bf   :  { %v4948_v61 = vpop.eup %4947 }
 0x6c0   :  { %v3504_v1 = vcombine.low %v3496_v12, %v3503_v31  ;;  %v3177_v35 = vmul.f32 0.6931472, %v4948_v61 }
 0x6c2   :  { %3524 = vst [vmem:[#allocation4 + $0x28] sm:$0xff] %v3504_v1  ;;  %v3302_v30 = vadd.f32 %v3277_v2, %v3177_v35  ;;  %v3227_v21 = vadd.f32 %v3202_v36, %v3177_v35 }
 0x6c4   :  { %v3327_v57 = vsub.f32 0.0, %v3302_v30  ;;  %v3576_v40 = vmin.f32 %v3302_v30, 100.0  ;;  %v3551_v0 = vmin.f32 %v3227_v21, 100.0 }
 0x6c6   :  { %v3376_v27 = vmul.f32 1.442695, %v3327_v57  ;;  %v3686_v47 = vsub.f32 %v3576_v40, %v3551_v0 }
 0x6c7   :  { %v3766_v62 = vpop.permute.xlu0 %3765 }
 0x6c8   :  { %4949 = vpow2.f32 %v3376_v27  ;;  %v3711_v6 = vmul.f32 %v3686_v47, %v3651_v42  ;;  %v3772_v37 = vpop.permute.xlu1 %3771 }
 0x6c9   :  { %4951 = vlog2.f32 %v6541_v38 }
 0x6ca   :  { %v3736_v39 = vadd.f32 %v3711_v6, %v3551_v0 }
 0x6cb   :  { %v3770_v24 = vpop.permute.xlu0 %3769 }
 0x6cc   :  { %3871 = vrot.lane.b32.xlu1 %v3736_v39, %s5012_s17  ;;  %v3780_v25 = vsel %vm3775_vm11, %v3770_v24, %v3772_v37 }
 0x6cd   :  { %v3796_v3 = vsel %vm3737_vm8, %v3780_v25, 0.0 }
 0x6cf   :  { %v3768_v29 = vpop.permute.xlu0 %3767 }
 0x6d0   :  { %926 = vrot.lane.b32.xlu1 %v6682_v17, %s5013_s14  ;;  %v3778_v58 = vsel %vm3775_vm11, %v3766_v62, %v3768_v29  ;;  %v3779_v45 = vsel %vm3775_vm11, %v3768_v29, %v3770_v24 }
 0x6d1   :  { %v3792_v60 = vsel %vm3737_vm8, %v3778_v58, 0.0  ;;  %v3794_v34 = vsel %vm3737_vm8, %v3779_v45, 0.0 }
 0x6d2   :  { %v4950_v15 = vpop.eup %4949 }
 0x6d3   :  { %v3511_v9 = vrot.slane %v4950_v15, %v5209_v41  ;;  %v3777_v41 = vsel %vm3775_vm11, %v3764_v20, %v3766_v62 }
 0x6d4   :  { %v3790_v56 = vsel %vm3737_vm8, %v3777_v41, 0.0 }
 0x6d5   :  { %3526 = vst.msk [vmem:[#allocation4 + $0x30] sm:$0x3] %vm3525_vm10, %v3511_v9  ;;  %v3791_v44 = vadd.f32 %v3790_v56, %v3789_v28 }
 0x6d7   :  { %v3793_v7 = vadd.f32 %v3792_v60, %v3791_v44  ;;  %v4952_v60 = vpop.eup %4951 }
 0x6d8   :  { %v883_v44 = vmul.f32 0.6931472, %v4952_v60 }
 0x6d9   :  { %v3795_v49 = vadd.f32 %v3794_v34, %v3793_v7 }
 0x6db   :  { %v3797_v18 = vadd.f32 %v3796_v3, %v3795_v49 }
 0x6e4   :  { %v3811_v53 = vpop.permute.xlu0 %3810 }
 0x6e8   :  { %v3815_v22 = vpop.permute.xlu0 %3814 }
 0x6ec   :  { %v3774_v16 = vpop.permute.xlu0 %3773 }
 0x6ed   :  { %v3781_v48 = vsel %vm3775_vm11, %v3772_v37, %v3774_v16  ;;  %v3800_v2 = vsel %vm3749_vm9, %v3774_v16, 0.0 }
 0x6ee   :  { %v3798_v11 = vsel %vm3737_vm8, %v3781_v48, 0.0 }
 0x6ef   :  { %v3799_v1 = vadd.f32 %v3798_v11, %v3797_v18 }
 0x6f0   :  { %v3813_v8 = vpop.permute.xlu0 %3812 }
 0x6f1   :  { %v3825_v52 = vsel %vm3824_vm12, %v3811_v53, %v3813_v8  ;;  %v3826_v17 = vsel %vm3824_vm12, %v3813_v8, %v3815_v22  ;;  %v3801_v0 = vadd.f32 %v3800_v2, %v3799_v1 }
 0x6f2   :  { %v3838_v30 = vsel %vm3737_vm8, %v3825_v52, 0.0  ;;  %v3839_v21 = vsel %vm3737_vm8, %v3826_v17, 0.0 }
 0x6f3   :  { %v3840_v42 = vadd.f32 %v3839_v21, %v3838_v30 }
 0x6f4   :  { %v3817_v43 = vpop.permute.xlu0 %3816 }
 0x6f5   :  { %v3827_v61 = vsel %vm3824_vm12, %v3815_v22, %v3817_v43 }
 0x6f6   :  { %v3841_v46 = vsel %vm3737_vm8, %v3827_v61, 0.0 }
 0x6f7   :  { %v3842_v39 = vadd.f32 %v3841_v46, %v3840_v42 }
 0x703   :  { %v3860_v33 = vpop.permute.xlu0 %3859 }
 0x707   :  { %v3819_v19 = vpop.permute.xlu0 %3818  ;;  %v3821_v55 = vpop.permute.xlu1 %3820 }
 0x708   :  { %v3828_v40 = vsel %vm3824_vm12, %v3817_v43, %v3819_v19  ;;  %v3829_v20 = vsel %vm3824_vm12, %v3819_v19, %v3821_v55 }
 0x709   :  { %v3845_v22 = vsel %vm3737_vm8, %v3829_v20, 0.0 }
 0x70b   :  { %v3862_v10 = vpop.permute.xlu0 %3861 }
 0x70c   :  { %v3874_v13 = vsel %vm3873_vm13, %v3860_v33, %v3862_v10 }
 0x70d   :  { %v3887_v35 = vsel %vm3737_vm8, %v3874_v13, 0.0 }
 0x71f   :  { %v3864_v51 = vpop.permute.xlu1 %3863 }
 0x720   :  { %v3868_v4 = vpop.permute.xlu0 %3867  ;;  %v3875_v54 = vsel %vm3873_vm13, %v3862_v10, %v3864_v51 }
 0x721   :  { %v3888_v31 = vsel %vm3737_vm8, %v3875_v54, 0.0 }
 0x722   :  { %v3889_v57 = vadd.f32 %v3888_v31, %v3887_v35 }
 0x724   :  { %v3866_v23 = vpop.permute.xlu0 %3865 }
 0x725   :  { %v3876_v12 = vsel %vm3873_vm13, %v3864_v51, %v3866_v23  ;;  %v3877_v27 = vsel %vm3873_vm13, %v3866_v23, %v3868_v4  ;;  %v6683_v23 = vld [vmem:[#allocation22_spill] sm:$0xff] }
 0x726   :  { %v3890_v36 = vsel %vm3737_vm8, %v3876_v12, 0.0  ;;  %v3892_v15 = vsel %vm3737_vm8, %v3877_v27, 0.0  ;;  %v884_v45 = vsub.f32 %v6683_v23, %v883_v44 }
 0x727   :  { %v3891_v47 = vadd.f32 %v3890_v36, %v3889_v57  ;;  %v3870_v6 = vpop.permute.xlu1 %3869 }
 0x728   :  { %v3823_v26 = vpop.permute.xlu0 %3822  ;;  %v3878_v9 = vsel %vm3873_vm13, %v3868_v4, %v3870_v6 }
 0x729   :  { %v3893_v59 = vadd.f32 %v3892_v15, %v3891_v47  ;;  %v3830_v24 = vsel %vm3824_vm12, %v3821_v55, %v3823_v26  ;;  %v3894_v29 = vsel %vm3737_vm8, %v3878_v9, 0.0  ;;  %v3849_v37 = vsel %vm3749_vm9, %v3823_v26, 0.0  ;;  %v6684_v26 = vld [vmem:[#allocation16_spill] sm:$0xff] }
 0x72a   :  { %v3847_v16 = vsel %vm3737_vm8, %v3830_v24, 0.0  ;;  %v933_v34 = vsel %vm932_vm14, %v6684_v26, %v6543_v14 }
 0x72b   :  { %v3895_v43 = vadd.f32 %v3894_v29, %v3893_v59 }
 0x72c   :  { %v921_v63 = vpop.permute.xlu0 %920 }
 0x72d   :  { %v923_v32 = vsel %vm910_vm6, %v921_v63, 0.0 }
 0x72e   :  { %924 = vadd.xlane.f32.xlu0 %v923_v32 }
 0x732   :  { %3752 = vadd.xlane.f32.xlu0 %v6341_v5  ;;  %v3843_v5 = vsel %vm3737_vm8, %v3828_v40, 0.0 }
 0x733   :  { %v3844_v62 = vadd.f32 %v3843_v5, %v3842_v39 }
 0x735   :  { %v3846_v33 = vadd.f32 %v3845_v22, %v3844_v62 }
 0x736   :  { %3802 = vadd.xlane.f32.xlu0 %v3801_v0 }
 0x737   :  { %v3848_v50 = vadd.f32 %v3847_v16, %v3846_v33 }
 0x739   :  { %v3850_v28 = vadd.f32 %v3849_v37, %v3848_v50 }
 0x73e   :  { %v3872_v53 = vpop.permute.xlu1 %3871 }
 0x73f   :  { %v3879_v8 = vsel %vm3873_vm13, %v3870_v6, %v3872_v53  ;;  %v3898_v4 = vsel %vm3749_vm9, %v3872_v53, 0.0 }
 0x740   :  { %v3896_v10 = vsel %vm3737_vm8, %v3879_v8, 0.0 }
 0x741   :  { %v3897_v41 = vadd.f32 %v3896_v10, %v3895_v43 }
 0x742   :  { %v927_v19 = vpop.permute.xlu1 %926 }
 0x743   :  { %v929_v58 = vsel %vm910_vm6, %v927_v19, 0.0  ;;  %v3899_v56 = vadd.f32 %v3898_v4, %v3897_v41 }
 0x744   :  { %930 = vadd.xlane.f32.xlu1 %v929_v58 }
 0x745   :  { %3900 = vadd.xlane.f32.xlu0 %v3899_v56 }
 0x748   :  { %3851 = vadd.xlane.f32.xlu1 %v3850_v28 }
 0x759   :  { %3906 = vrot.lane.b32.xlu1 %v884_v45, %s5005_s8 }
 0x7bb   :  { %v925_v7 = vpop.xlane.xlu0 %924 }
 0x7bc   :  { %v935_v38 = vsel %vm934_vm15, %v933_v34, %v925_v7 }
 0x7bf   :  { %v3753_v55 = vpop.xlane.xlu0 %3752 }
 0x7d1   :  { %v931_v25 = vpop.xlane.xlu1 %930 }
 0x7d2   :  { %4964 = shalt.err (!%p4961_p4)
}
 0x7d3   :  { %s4965_s7 = scalar_lea.hbm %s6640_s16, 800 }
 0x7d4   :  { %p4966_p5 = scmp.ne.s32.totalorder %s6640_s16, %s4965_s7  ;;  %p4969_p6 = scmp.lt.u32.totalorder %s4965_s7, %s6640_s16 }
 0x7d6   :  { %p4971_p7 = pnand %p4969_p6, %p4966_p5 }
 0x7d8   :  { %4974 = shalt.err (!%p4971_p7)
}
 0x7d9   :  { %3944 = dma.vmem_to_hbm [thread:$0]  %s3942_s20, 800, %s6640_s16, [#allocation5]   ;;  %v3803_v14 = vpop.xlane.xlu0 %3802  ;;  %v937_v49 = vsel %vm936_vm0, %v935_v38, %v931_v25  ;;  %v3852_v63 = vpop.xlane.xlu1 %3851  ;;  %vm3918_vm1 = vcmask 293888   ;;  %vm3920_vm2 = vcmask 326656   ;;  %v6685_v13 = vld [vmem:[#allocation8_spill] sm:$0xff]  ;;  %vm3922_vm3 = vcmask 359424  }
 0x7da   :  { %v938_v48 = vmul.f32 -0.5, %v937_v49  ;;  %v3902_v51 = vsel %vm932_vm14, %v3753_v55, %v3803_v14  ;;  %s5015_s26 = smov 36   ;;  %s5016_s9 = smov 40  }
 0x7db   :  { %v3903_v11 = vsel %vm934_vm15, %v3902_v51, %v3852_v63  ;;  %s5017_s16 = smov [#allocation2]  }
 0x7dc   :  { %3910 = vrot.lane.b32.xlu0 %v938_v48, %s5015_s26  ;;  %s3931_s28 = sshll.u32 %s5017_s16, 4  ;;  %s3932_s28 = int_to_ptr.vmem [resolvable:$true] %s3931_s28 }
 0x7dd   :  { %v3901_v3 = vpop.xlane.xlu0 %3900  ;;  %v3907_v32 = vpop.permute.xlu1 %3906  ;;  %s4975_s4 = scalar_lea.vmem %s3932_s28, 32  ;;  %p4980_p9 = scmp.lt.s32.totalorder %s3932_s28, %s3932_s28 }
 0x7de   :  { %v3904_v54 = vsel %vm936_vm0, %v3903_v11, %v3901_v3  ;;  %v3917_v12 = vsel %vm963_vm4, %v6685_v13, %v3907_v32  ;;  %p4976_p8 = scmp.ne.s32.totalorder %s3932_s28, %s4975_s4  ;;  %p4981_p10 = scmp.lt.s32.totalorder %s4975_s4, %s4975_s4 }
 0x7df   :  { %3914 = vrot.lane.b32.xlu1 %v3904_v54, %s5016_s9 }
 0x7e0   :  { %p4982_p11 = por %p4981_p10, %p4980_p9 }
 0x7e2   :  { %p4983_p12 = pnand %p4982_p11, %p4976_p8 }
 0x84e   :  { %v3911_v18 = vpop.permute.xlu0 %3910 }
 0x84f   :  { %v3919_v52 = vsel %vm3918_vm1, %v3917_v12, %v3911_v18 }
 0x851   :  { %v3915_v17 = vpop.permute.xlu1 %3914 }
 0x852   :  { %v3921_v31 = vsel %vm3920_vm2, %v3919_v52, %v3915_v17 }
 0x853   :  { %v3923_v1 = vsel %vm3922_vm3, %v3921_v31, 0.0 }
 0x854   :  { %3924 = vst [vmem:[#allocation2] sm:$0x3] %v3923_v1 }
 0x855   :  { %4986 = shalt.err (!%p4983_p12)
}
 0x856   :  { %s4987_s5 = scalar_lea.hbm %s6639_s15, 32 }
 0x857   :  { %p4988_p13 = scmp.ne.s32.totalorder %s6639_s15, %s4987_s5  ;;  %p4991_p0 = scmp.lt.u32.totalorder %s4987_s5, %s6639_s15 }
 0x859   :  { %p4993_p1 = pnand %p4991_p0, %p4988_p13 }
 0x85b   :  { %4996 = shalt.err (!%p4993_p1)
}
 0x85c   :  { %3934 = dma.vmem_to_hbm [thread:$0]  %s3932_s28, 32, %s6639_s15, [#allocation3]  }
 0x85d   :  { %4997 = dma.done.wait [#allocation3], 32  }
 0x85e   :  { %4998 = vsyncadd [#allocation3], 4294967264 }
 0x85f   :  { %4999 = dma.done.wait [#allocation5], 800  }
 0x860   :  { %5000 = vsyncadd [#allocation5], 4294966496 }
 0x861   :  { %3951 = vsyncpa [#allocation3], 1 }
 0x862   :  { %3952 = vsyncpa [#allocation5], 1 }

</bundles_post_ra>
